<compile_context>
chip_gen: v7x
topology: tpu7x:2x2x1
jax: 0.10.0
libtpu: 0.0.40
codegen_flags: <defaults>
</compile_context>

<pallas_src>
import jax
import jax.numpy as jnp
from jax.experimental import pallas as pl
from jax.experimental.pallas import tpu as pltpu

HIDDEN = 1036   # logical hidden width of the PyTorch module
LANE = 128
TB_MAX = 512    # batch tile for large batches (sweep 512-1024 on v6e/v7x)


def _round_up(n, m):
    return ((n + m - 1) // m) * m


def _pad2(a, rows, cols):
    r, c = a.shape
    return jnp.pad(a, ((0, rows - r), (0, cols - c)))


def mlp_kernel(x_ref, w1_ref, b1_ref, w2_ref, b2_ref, w3_ref, b3_ref,
               o_ref, h_ref):
    # Layer 1: x @ W1 + b1, ReLU.  x arrives f32 (un-padded lanes) and is cast
    # to bf16 in-kernel; f32 accumulation on the MXU.
    x = x_ref[...].astype(jnp.bfloat16)
    h = jnp.dot(x, w1_ref[...], preferred_element_type=jnp.float32)
    h_ref[...] = jnp.maximum(h + b1_ref[...], 0.0).astype(jnp.bfloat16)

    # Layer 2: h @ W2 + b2, ReLU (h already rounded to bf16 in scratch).
    h = jnp.dot(h_ref[...], w2_ref[...], preferred_element_type=jnp.float32)
    h_ref[...] = jnp.maximum(h + b2_ref[...], 0.0).astype(jnp.bfloat16)

    # Layer 3: h @ W3 + b3 (no activation).
    out = jnp.dot(h_ref[...], w3_ref[...], preferred_element_type=jnp.float32)
    o_ref[...] = (out + b3_ref[...]).astype(o_ref.dtype)


def prepare_params(w1, b1, w2, b2, w3, b3):
    """One-time prep: pad hidden/output lanes to multiples of 128 and cast the
    matmul weights to bf16.  Hoisted out of mlp_forward so no per-call XLA
    pad/convert pass touches the (dominant) W2."""
    d_in, h1 = w1.shape
    d_out = w3.shape[1]
    assert h1 == HIDDEN, f"w1 output dim {h1} != {HIDDEN}"
    assert w2.shape == (HIDDEN, HIDDEN), f"w2 shape {w2.shape}"
    assert w3.shape[0] == HIDDEN, f"w3 shape {w3.shape}"
    assert b1.shape == (1, HIDDEN), f"b1 shape {b1.shape}"
    assert b2.shape == (1, HIDDEN), f"b2 shape {b2.shape}"
    assert b3.shape == (1, d_out), f"b3 shape {b3.shape}"

    hid_p = _round_up(HIDDEN, LANE)
    dout_p = _round_up(d_out, LANE)

    return dict(
        d_in=d_in, d_out=d_out,
        w1=_pad2(w1, d_in, hid_p).astype(jnp.bfloat16),   # D_in left un-padded
        w2=_pad2(w2, hid_p, hid_p).astype(jnp.bfloat16),
        w3=_pad2(w3, hid_p, dout_p).astype(jnp.bfloat16),
        b1=_pad2(b1, 1, hid_p),
        b2=_pad2(b2, 1, hid_p),
        b3=_pad2(b3, 1, dout_p),
    )


def _choose_batch_tiling(batch):
    if batch <= TB_MAX:
        # Single tile, minimal pad (avoids un-hidden padded MXU work on v5e).
        # Round to 16 so the bf16 hidden scratch is sublane-packing aligned.
        return _round_up(batch, 16), 1
    return TB_MAX, pl.cdiv(batch, TB_MAX)   # >=2 steps feeds both v7x cores


def mlp_forward(x, params):
    """x: (B, D_in) f32.  params: output of prepare_params."""
    B, d_in = x.shape
    assert d_in == params["d_in"], (d_in, params["d_in"])
    w1_p, b1_p = params["w1"], params["b1"]
    w2_p, b2_p = params["w2"], params["b2"]
    w3_p, b3_p = params["w3"], params["b3"]
    d_out = params["d_out"]
    hid_p = w1_p.shape[1]
    dout_p = w3_p.shape[1]

    tb, nb = _choose_batch_tiling(B)
    b_p = tb * nb
    x_p = x if b_p == B else jnp.pad(x, ((0, b_p - B), (0, 0)))

    resident = lambda shape: pl.BlockSpec(shape, lambda i: (0, 0))

    flops = 2 * b_p * (d_in * hid_p + hid_p * hid_p + hid_p * dout_p)
    bytes_accessed = (x_p.size * 4
                      + (w1_p.size + w2_p.size + w3_p.size) * 2
                      + (b1_p.size + b2_p.size + b3_p.size) * 4
                      + b_p * dout_p * 4)

    out_p = pl.pallas_call(
        mlp_kernel,
        out_shape=jax.ShapeDtypeStruct((b_p, dout_p), jnp.float32),
        grid=(nb,),
        in_specs=[
            pl.BlockSpec((tb, d_in), lambda i: (i, 0)),   # x tile (pipelined)
            resident(w1_p.shape), resident(b1_p.shape),   # weights VMEM-resident
            resident(w2_p.shape), resident(b2_p.shape),
            resident(w3_p.shape), resident(b3_p.shape),
        ],
        out_specs=pl.BlockSpec((tb, dout_p), lambda i: (i, 0)),
        scratch_shapes=[pltpu.VMEM((tb, hid_p), jnp.bfloat16)],
        compiler_params=pltpu.CompilerParams(
            dimension_semantics=("parallel",)),
        cost_estimate=pl.CostEstimate(
            flops=flops, transcendentals=0, bytes_accessed=bytes_accessed),
    )(x_p, w1_p, b1_p, w2_p, b2_p, w3_p, b3_p)

    return out_p[:B, :d_out]


def init_linear_params(key, fan_in, fan_out):
    # Deterministic init mimicking PyTorch's uniform(-1/sqrt(fan_in), 1/sqrt(fan_in)).
    kw, kb = jax.random.split(key)
    bound = 1.0 / jnp.sqrt(jnp.float32(fan_in))
    # Stored directly as (in, out) = W^T so the kernel does x @ W.
    w = jax.random.uniform(kw, (fan_in, fan_out), jnp.float32, -bound, bound)
    b = jax.random.uniform(kb, (1, fan_out), jnp.float32, -bound, bound)
    return w, b


if __name__ == "__main__":
    input_dim = 32
    output_dim = 8
    batch = 2

    root = jax.random.PRNGKey(0)
    kx, k1, k2, k3 = jax.random.split(root, 4)

    x = jax.random.normal(kx, (batch, input_dim), jnp.float32)
    w1, b1 = init_linear_params(k1, input_dim, HIDDEN)
    w2, b2 = init_linear_params(k2, HIDDEN, HIDDEN)
    w3, b3 = init_linear_params(k3, HIDDEN, output_dim)

    # One-time prep (pad + bf16 cast hoisted out of the per-call path).
    params = prepare_params(w1, b1, w2, b2, w3, b3)

    out = mlp_forward(x, params)
    out = jax.block_until_ready(out)
    assert out.shape == (batch, output_dim)

    # Pure-JAX reference mirroring the kernel's bf16-operand / f32-accumulate
    # path.  (Note: bf16 weights deviate from a pure-f32 PyTorch MLP by up to
    # ~1e-2 relative error; this precision choice is intentional.)
    bf = jnp.bfloat16
    ref = jnp.maximum(
        jnp.dot(x.astype(bf), w1.astype(bf), preferred_element_type=jnp.float32) + b1, 0.0)
    ref = jnp.maximum(
        jnp.dot(ref.astype(bf), w2.astype(bf), preferred_element_type=jnp.float32) + b2, 0.0)
    ref = jnp.dot(ref.astype(bf), w3.astype(bf), preferred_element_type=jnp.float32) + b3
    assert jnp.allclose(out, ref, atol=2e-2, rtol=2e-2), (
        f"max abs err {jnp.max(jnp.abs(out - ref))}")

    print("KERNEL_OK")
</pallas_src>

<mosaic_0001>
module attributes {stable_mosaic.version = 11 : i64} {
  func.func @mlp_kernel(%arg0: i32, %arg1: memref<16x32xf32, #tpu.memory_space<vmem>>, %arg2: memref<32x1152xbf16, #tpu.memory_space<vmem>>, %arg3: memref<1x1152xf32, #tpu.memory_space<vmem>>, %arg4: memref<1152x1152xbf16, #tpu.memory_space<vmem>>, %arg5: memref<1x1152xf32, #tpu.memory_space<vmem>>, %arg6: memref<1152x128xbf16, #tpu.memory_space<vmem>>, %arg7: memref<1x128xf32, #tpu.memory_space<vmem>>, %arg8: memref<16x128xf32, #tpu.memory_space<vmem>>, %arg9: memref<16x1152xbf16, #tpu.memory_space<vmem>>) attributes {dimension_semantics = [#tpu.dimension_semantics<parallel>], iteration_bounds = array<i64: 1>, scalar_prefetch = 0 : i64, scratch_operands = 1 : i64, tpu.core_type = #tpu.core_type<tc>, window_params = [{transform_indices = @transform_0, window_bounds = array<i64: 16, 32>}, {pipeline_mode = #tpu.pipeline_mode<synchronous>, transform_indices = @transform_1, window_bounds = array<i64: 32, 1152>}, {pipeline_mode = #tpu.pipeline_mode<synchronous>, transform_indices = @transform_2, window_bounds = array<i64: 1, 1152>}, {pipeline_mode = #tpu.pipeline_mode<synchronous>, transform_indices = @transform_3, window_bounds = array<i64: 1152, 1152>}, {pipeline_mode = #tpu.pipeline_mode<synchronous>, transform_indices = @transform_4, window_bounds = array<i64: 1, 1152>}, {pipeline_mode = #tpu.pipeline_mode<synchronous>, transform_indices = @transform_5, window_bounds = array<i64: 1152, 128>}, {pipeline_mode = #tpu.pipeline_mode<synchronous>, transform_indices = @transform_6, window_bounds = array<i64: 1, 128>}, {transform_indices = @transform_7, window_bounds = array<i64: 16, 128>}]} {
    %c0 = arith.constant 0 : index
    %c0_0 = arith.constant 0 : index
    %0 = vector.load %arg1[%c0, %c0_0] : memref<16x32xf32, #tpu.memory_space<vmem>>, vector<16x32xf32>
    %1 = arith.truncf %0 : vector<16x32xf32> to vector<16x32xbf16>
    %c0_1 = arith.constant 0 : index
    %c0_2 = arith.constant 0 : index
    %2 = vector.load %arg2[%c0_1, %c0_2] : memref<32x1152xbf16, #tpu.memory_space<vmem>>, vector<32x1152xbf16>
    %cst = arith.constant dense<0.000000e+00> : vector<16x1152xf32>
    %3 = tpu.matmul %1, %2, %cst {dimension_numbers = #tpu.dot_dimension_numbers<[1], [0], [0], [1], [0, 0, 1, 1], [], []>} : vector<16x32xbf16>, vector<32x1152xbf16>, vector<16x1152xf32> -> vector<16x1152xf32>
    %c0_3 = arith.constant 0 : index
    %c0_4 = arith.constant 0 : index
    %4 = vector.load %arg3[%c0_3, %c0_4] : memref<1x1152xf32, #tpu.memory_space<vmem>>, vector<1x1152xf32>
    %5 = vector.broadcast %4 : vector<1x1152xf32> to vector<16x1152xf32>
    %6 = arith.addf %3, %5 : vector<16x1152xf32>
    %cst_5 = arith.constant 0.000000e+00 : f32
    %7 = vector.broadcast %cst_5 : f32 to vector<16x1152xf32>
    %8 = arith.maximumf %6, %7 : vector<16x1152xf32>
    %9 = arith.truncf %8 : vector<16x1152xf32> to vector<16x1152xbf16>
    %c0_6 = arith.constant 0 : index
    %c0_7 = arith.constant 0 : index
    %10 = vector.load %arg9[%c0_6, %c0_7] : memref<16x1152xbf16, #tpu.memory_space<vmem>>, vector<16x1152xbf16>
    tpu.vector_store %arg9[%c0_6, %c0_7], %9 {strides = array<i32>} : memref<16x1152xbf16, #tpu.memory_space<vmem>>, vector<16x1152xbf16>,
    %c0_8 = arith.constant 0 : index
    %c0_9 = arith.constant 0 : index
    %11 = vector.load %arg9[%c0_8, %c0_9] : memref<16x1152xbf16, #tpu.memory_space<vmem>>, vector<16x1152xbf16>
    %c0_10 = arith.constant 0 : index
    %c0_11 = arith.constant 0 : index
    %12 = vector.load %arg4[%c0_10, %c0_11] : memref<1152x1152xbf16, #tpu.memory_space<vmem>>, vector<1152x1152xbf16>
    %cst_12 = arith.constant dense<0.000000e+00> : vector<16x1152xf32>
    %13 = tpu.matmul %11, %12, %cst_12 {dimension_numbers = #tpu.dot_dimension_numbers<[1], [0], [0], [1], [0, 0, 1, 1], [], []>} : vector<16x1152xbf16>, vector<1152x1152xbf16>, vector<16x1152xf32> -> vector<16x1152xf32>
    %c0_13 = arith.constant 0 : index
    %c0_14 = arith.constant 0 : index
    %14 = vector.load %arg5[%c0_13, %c0_14] : memref<1x1152xf32, #tpu.memory_space<vmem>>, vector<1x1152xf32>
    %15 = vector.broadcast %14 : vector<1x1152xf32> to vector<16x1152xf32>
    %16 = arith.addf %13, %15 : vector<16x1152xf32>
    %cst_15 = arith.constant 0.000000e+00 : f32
    %17 = vector.broadcast %cst_15 : f32 to vector<16x1152xf32>
    %18 = arith.maximumf %16, %17 : vector<16x1152xf32>
    %19 = arith.truncf %18 : vector<16x1152xf32> to vector<16x1152xbf16>
    %c0_16 = arith.constant 0 : index
    %c0_17 = arith.constant 0 : index
    %20 = vector.load %arg9[%c0_16, %c0_17] : memref<16x1152xbf16, #tpu.memory_space<vmem>>, vector<16x1152xbf16>
    tpu.vector_store %arg9[%c0_16, %c0_17], %19 {strides = array<i32>} : memref<16x1152xbf16, #tpu.memory_space<vmem>>, vector<16x1152xbf16>,
    %c0_18 = arith.constant 0 : index
    %c0_19 = arith.constant 0 : index
    %21 = vector.load %arg9[%c0_18, %c0_19] : memref<16x1152xbf16, #tpu.memory_space<vmem>>, vector<16x1152xbf16>
    %c0_20 = arith.constant 0 : index
    %c0_21 = arith.constant 0 : index
    %22 = vector.load %arg6[%c0_20, %c0_21] : memref<1152x128xbf16, #tpu.memory_space<vmem>>, vector<1152x128xbf16>
    %cst_22 = arith.constant dense<0.000000e+00> : vector<16x128xf32>
    %23 = tpu.matmul %21, %22, %cst_22 {dimension_numbers = #tpu.dot_dimension_numbers<[1], [0], [0], [1], [0, 0, 1, 1], [], []>} : vector<16x1152xbf16>, vector<1152x128xbf16>, vector<16x128xf32> -> vector<16x128xf32>
    %c0_23 = arith.constant 0 : index
    %c0_24 = arith.constant 0 : index
    %24 = vector.load %arg7[%c0_23, %c0_24] : memref<1x128xf32, #tpu.memory_space<vmem>>, vector<1x128xf32>
    %25 = vector.broadcast %24 : vector<1x128xf32> to vector<16x128xf32>
    %26 = arith.addf %23, %25 : vector<16x128xf32>
    %c0_25 = arith.constant 0 : index
    %c0_26 = arith.constant 0 : index
    %27 = vector.load %arg8[%c0_25, %c0_26] : memref<16x128xf32, #tpu.memory_space<vmem>>, vector<16x128xf32>
    tpu.vector_store %arg8[%c0_25, %c0_26], %26 {strides = array<i32>} : memref<16x128xf32, #tpu.memory_space<vmem>>, vector<16x128xf32>,
    return
  }
  func.func @transform_0(%arg0: i32) -> (i32, i32) {
    %c0_i32 = arith.constant 0 : i32
    %c0_i32_0 = arith.constant 0 : i32
    return %arg0, %c0_i32 : i32, i32
  }
  func.func @transform_1(%arg0: i32) -> (i32, i32) {
    %c0_i32 = arith.constant 0 : i32
    %c0_i32_0 = arith.constant 0 : i32
    %c0_i32_1 = arith.constant 0 : i32
    return %c0_i32, %c0_i32_0 : i32, i32
  }
  func.func @transform_2(%arg0: i32) -> (i32, i32) {
    %c0_i32 = arith.constant 0 : i32
    %c0_i32_0 = arith.constant 0 : i32
    %c0_i32_1 = arith.constant 0 : i32
    return %c0_i32, %c0_i32_0 : i32, i32
  }
  func.func @transform_3(%arg0: i32) -> (i32, i32) {
    %c0_i32 = arith.constant 0 : i32
    %c0_i32_0 = arith.constant 0 : i32
    %c0_i32_1 = arith.constant 0 : i32
    return %c0_i32, %c0_i32_0 : i32, i32
  }
  func.func @transform_4(%arg0: i32) -> (i32, i32) {
    %c0_i32 = arith.constant 0 : i32
    %c0_i32_0 = arith.constant 0 : i32
    %c0_i32_1 = arith.constant 0 : i32
    return %c0_i32, %c0_i32_0 : i32, i32
  }
  func.func @transform_5(%arg0: i32) -> (i32, i32) {
    %c0_i32 = arith.constant 0 : i32
    %c0_i32_0 = arith.constant 0 : i32
    %c0_i32_1 = arith.constant 0 : i32
    return %c0_i32, %c0_i32_0 : i32, i32
  }
  func.func @transform_6(%arg0: i32) -> (i32, i32) {
    %c0_i32 = arith.constant 0 : i32
    %c0_i32_0 = arith.constant 0 : i32
    %c0_i32_1 = arith.constant 0 : i32
    return %c0_i32, %c0_i32_0 : i32, i32
  }
  func.func @transform_7(%arg0: i32) -> (i32, i32) {
    %c0_i32 = arith.constant 0 : i32
    %c0_i32_0 = arith.constant 0 : i32
    return %arg0, %c0_i32 : i32, i32
  }
}

</mosaic_0001>

<bundles_post_ra>
// kernel: tpu_custom_call.1
= control target key start
LH: loop header
LB: loop body
LE: loop exit
PB: predicated region body
PF: predicated region fallthrough
CT: control target
= control target key end

     0   :  { %12 = vsyncpa [#allocation4], 0  ;;  %s9185_s0 = inlined_call_operand.hbm [shape: f32[16,32], index: 0, kind: input, shape index: {}]   ;;  %s9186_s1 = inlined_call_operand.hbm [shape: bf16[32,1152], index: 1, kind: input, shape index: {}]   ;;  %s9187_s2 = inlined_call_operand.hbm [shape: f32[1,1152], index: 2, kind: input, shape index: {}]   ;;  %s9188_s3 = inlined_call_operand.hbm [shape: bf16[1152,1152], index: 3, kind: input, shape index: {}]   ;;  %s9189_s4 = inlined_call_operand.hbm [shape: f32[1,1152], index: 4, kind: input, shape index: {}]   ;;  %s9190_s5 = inlined_call_operand.hbm [shape: bf16[1152,128], index: 5, kind: input, shape index: {}]   ;;  %s9191_s6 = inlined_call_operand.hbm [shape: f32[1,128], index: 6, kind: input, shape index: {}]   ;;  %s9192_s7 = inlined_call_operand.hbm [shape: f32[16,128], index: 7, kind: output, shape index: {}]  }
   0x1   :  { %13 = vsyncpa [#allocation7], 0 }
   0x2   :  { %14 = vsyncpa [#allocation10], 0 }
   0x3   :  { %15 = vsyncpa [#allocation13], 0 }
   0x4   :  { %16 = vsyncpa [#allocation5], 0  ;;  %s8852_s24 = smov [#allocation6]   ;;  %s8666_s28 = scalar_lea.hbm %s9186_s1, 2304 }
   0x5   :  { %s34_s25 = sshll.u32 %s8852_s24, 4  ;;  %p8667_p0 = scmp.ne.s32.totalorder %s9186_s1, %s8666_s28  ;;  %s35_s25 = int_to_ptr.vmem [resolvable:$true] %s34_s25 }
   0x6   :  { %p8670_p1 = scmp.lt.u32.totalorder %s8666_s28, %s9186_s1 }
   0x8   :  { %p8672_p2 = pnand %p8670_p1, %p8667_p0 }
   0xa   :  { %8675 = shalt.err (!%p8672_p2)
}
   0xb   :  { %s8676_s10 = scalar_lea.vmem %s35_s25, 2304  ;;  %p8681_p4 = scmp.lt.s32.totalorder %s35_s25, %s35_s25 }
   0xc   :  { %p8677_p3 = scmp.ne.s32.totalorder %s35_s25, %s8676_s10  ;;  %p8682_p5 = scmp.lt.s32.totalorder %s8676_s10, %s8676_s10 }
   0xe   :  { %p8683_p6 = por %p8682_p5, %p8681_p4 }
  0x10   :  { %p8684_p7 = pnand %p8683_p6, %p8677_p3 }
  0x12   :  { %8687 = shalt.err (!%p8684_p7)
}
  0x13   :  { %s8853_s11 = smov 576   ;;  %s8854_s12 = smov 36  }
  0x14   :  { %40 = dma.hbm_to_vmem [thread:$0]  %s9186_s1, 2304, %s35_s25, [#allocation7], %s8853_s11, %s8853_s11, %s8854_s12  }
  0x15   :  { %s8855_s15 = smov [#allocation9]   ;;  %s8856_s17 = smov [#allocation12]  }
  0x16   :  { %s56_s16 = sshll.u32 %s8855_s15, 4  ;;  %s78_s18 = sshll.u32 %s8856_s17, 4  ;;  %s57_s16 = int_to_ptr.vmem [resolvable:$true] %s56_s16  ;;  %s79_s18 = int_to_ptr.vmem [resolvable:$true] %s78_s18 }
  0x17   :  { %s8688_s21 = scalar_lea.hbm %s9188_s3, 82944 }
  0x18   :  { %p8689_p8 = scmp.ne.s32.totalorder %s9188_s3, %s8688_s21  ;;  %p8692_p9 = scmp.lt.u32.totalorder %s8688_s21, %s9188_s3 }
  0x1a   :  { %p8694_p10 = pnand %p8692_p9, %p8689_p8 }
  0x1c   :  { %8697 = shalt.err (!%p8694_p10)
}
  0x1d   :  { %s8698_s1 = scalar_lea.vmem %s57_s16, 82944  ;;  %p8703_p12 = scmp.lt.s32.totalorder %s57_s16, %s57_s16 }
  0x1e   :  { %p8699_p11 = scmp.ne.s32.totalorder %s57_s16, %s8698_s1  ;;  %p8704_p13 = scmp.lt.s32.totalorder %s8698_s1, %s8698_s1 }
  0x20   :  { %p8705_p0 = por %p8704_p13, %p8703_p12 }
  0x22   :  { %p8706_p1 = pnand %p8705_p0, %p8699_p11 }
  0x24   :  { %8709 = shalt.err (!%p8706_p1)
}
  0x25   :  { %62 = dma.hbm_to_vmem [thread:$0]  %s9188_s3, 82944, %s57_s16, [#allocation10], %s8853_s11, %s8853_s11, %s8854_s12  }
  0x26   :  { %s8710_s30 = scalar_lea.hbm %s9190_s5, 9216 }
  0x27   :  { %p8711_p2 = scmp.ne.s32.totalorder %s9190_s5, %s8710_s30  ;;  %p8714_p3 = scmp.lt.u32.totalorder %s8710_s30, %s9190_s5 }
  0x29   :  { %p8716_p4 = pnand %p8714_p3, %p8711_p2 }
  0x2b   :  { %8719 = shalt.err (!%p8716_p4)
}
  0x2c   :  { %s8720_s14 = scalar_lea.vmem %s79_s18, 9216  ;;  %p8725_p6 = scmp.lt.s32.totalorder %s79_s18, %s79_s18 }
  0x2d   :  { %p8721_p5 = scmp.ne.s32.totalorder %s79_s18, %s8720_s14  ;;  %p8726_p7 = scmp.lt.s32.totalorder %s8720_s14, %s8720_s14 }
  0x2f   :  { %p8727_p8 = por %p8726_p7, %p8725_p6 }
  0x31   :  { %p8728_p9 = pnand %p8727_p8, %p8721_p5 }
  0x33   :  { %8731 = shalt.err (!%p8728_p9)
}
  0x34   :  { %s8857_s3 = smov 64   ;;  %s8858_s11 = smov 4  }
  0x35   :  { %84 = dma.hbm_to_vmem [thread:$0]  %s9190_s5, 9216, %s79_s18, [#allocation13], %s8857_s3, %s8857_s3, %s8858_s11  }
  0x36   :  { %s8859_s16 = smov [#allocation3]   ;;  %s8732_s21 = scalar_lea.hbm %s9185_s0, 256 }
  0x37   :  { %s22_s17 = sshll.u32 %s8859_s16, 4  ;;  %p8733_p10 = scmp.ne.s32.totalorder %s9185_s0, %s8732_s21  ;;  %s23_s17 = int_to_ptr.vmem [resolvable:$true] %s22_s17 }
  0x38   :  { %p8736_p11 = scmp.lt.u32.totalorder %s8732_s21, %s9185_s0 }
  0x3a   :  { %p8738_p12 = pnand %p8736_p11, %p8733_p10 }
  0x3c   :  { %8741 = shalt.err (!%p8738_p12)
}
  0x3d   :  { %s8742_s1 = scalar_lea.vmem %s23_s17, 256  ;;  %p8747_p0 = scmp.lt.s32.totalorder %s23_s17, %s23_s17 }
  0x3e   :  { %p8743_p13 = scmp.ne.s32.totalorder %s23_s17, %s8742_s1  ;;  %p8748_p1 = scmp.lt.s32.totalorder %s8742_s1, %s8742_s1 }
  0x40   :  { %p8749_p2 = por %p8748_p1, %p8747_p0 }
  0x42   :  { %p8750_p3 = pnand %p8749_p2, %p8743_p13 }
  0x44   :  { %8753 = shalt.err (!%p8750_p3)
}
  0x45   :  { %s8860_s5 = smov 128   ;;  %s8861_s18 = smov 8  }
  0x46   :  { %28 = dma.hbm_to_vmem [thread:$0]  %s9185_s0, 256, %s23_s17, [#allocation4], %s8860_s5, %s8860_s5, %s8861_s18  }
  0x47   :  { %s8862_s28 = smov [#allocation8]   ;;  %s8863_s30 = smov [#allocation11]  }
  0x48   :  { %s47_s29 = sshll.u32 %s8862_s28, 4  ;;  %s69_s8 = sshll.u32 %s8863_s30, 4  ;;  %s48_s29 = int_to_ptr.vmem [resolvable:$true] %s47_s29  ;;  %s70_s8 = int_to_ptr.vmem [resolvable:$true] %s69_s8 }
  0x49   :  { %s8754_s13 = scalar_lea.hbm %s9187_s2, 144 }
  0x4a   :  { %p8755_p4 = scmp.ne.s32.totalorder %s9187_s2, %s8754_s13  ;;  %p8758_p5 = scmp.lt.u32.totalorder %s8754_s13, %s9187_s2 }
  0x4c   :  { %p8760_p6 = pnand %p8758_p5, %p8755_p4 }
  0x4e   :  { %8763 = shalt.err (!%p8760_p6)
}
  0x4f   :  { %s8764_s0 = scalar_lea.vmem %s48_s29, 144  ;;  %s8768_s15 = scalar_lea.vmem %s48_s29, 160 }
  0x50   :  { %p8765_p7 = scmp.ne.s32.totalorder %s48_s29, %s8764_s0  ;;  %p8769_p8 = scmp.lt.s32.totalorder %s48_s29, %s48_s29 }
  0x51   :  { %p8770_p9 = scmp.lt.s32.totalorder %s8768_s15, %s8764_s0 }
  0x53   :  { %p8771_p10 = por %p8770_p9, %p8769_p8 }
  0x55   :  { %p8772_p11 = pnand %p8771_p10, %p8765_p7 }
  0x57   :  { %8775 = shalt.err (!%p8772_p11)
}
  0x58   :  { %50 = dma.hbm_to_vmem [thread:$0]  %s9187_s2, 144, %s48_s29, [#allocation7]  }
  0x59   :  { %s8776_s21 = scalar_lea.hbm %s9189_s4, 144 }
  0x5a   :  { %p8777_p12 = scmp.ne.s32.totalorder %s9189_s4, %s8776_s21  ;;  %p8780_p13 = scmp.lt.u32.totalorder %s8776_s21, %s9189_s4 }
  0x5c   :  { %p8782_p0 = pnand %p8780_p13, %p8777_p12 }
  0x5e   :  { %8785 = shalt.err (!%p8782_p0)
}
  0x5f   :  { %s8786_s1 = scalar_lea.vmem %s70_s8, 144  ;;  %s8790_s25 = scalar_lea.vmem %s70_s8, 160 }
  0x60   :  { %p8787_p1 = scmp.ne.s32.totalorder %s70_s8, %s8786_s1  ;;  %p8791_p2 = scmp.lt.s32.totalorder %s70_s8, %s70_s8 }
  0x61   :  { %p8792_p3 = scmp.lt.s32.totalorder %s8790_s25, %s8786_s1 }
  0x63   :  { %p8793_p4 = por %p8792_p3, %p8791_p2 }
  0x65   :  { %p8794_p5 = pnand %p8793_p4, %p8787_p1 }
  0x67   :  { %8797 = shalt.err (!%p8794_p5)
}
  0x68   :  { %72 = dma.hbm_to_vmem [thread:$0]  %s9189_s4, 144, %s70_s8, [#allocation10]  }
  0x69   :  { %s8864_s28 = smov [#allocation14]   ;;  %s8798_s10 = scalar_lea.hbm %s9191_s6, 16 }
  0x6a   :  { %s91_s29 = sshll.u32 %s8864_s28, 4  ;;  %p8799_p6 = scmp.ne.s32.totalorder %s9191_s6, %s8798_s10  ;;  %s92_s29 = int_to_ptr.vmem [resolvable:$true] %s91_s29 }
  0x6b   :  { %p8802_p7 = scmp.lt.u32.totalorder %s8798_s10, %s9191_s6 }
  0x6d   :  { %p8804_p8 = pnand %p8802_p7, %p8799_p6 }
  0x6f   :  { %8807 = shalt.err (!%p8804_p8)
}
  0x70   :  { %s8808_s12 = scalar_lea.vmem %s92_s29, 16  ;;  %s8812_s4 = scalar_lea.vmem %s92_s29, 32 }
  0x71   :  { %p8809_p9 = scmp.ne.s32.totalorder %s92_s29, %s8808_s12  ;;  %p8813_p10 = scmp.lt.s32.totalorder %s92_s29, %s92_s29 }
  0x72   :  { %p8814_p11 = scmp.lt.s32.totalorder %s8812_s4, %s8808_s12 }
  0x74   :  { %p8815_p12 = por %p8814_p11, %p8813_p10 }
  0x76   :  { %p8816_p13 = pnand %p8815_p12, %p8809_p9 }
  0x78   :  { %8819 = shalt.err (!%p8816_p13)
}
  0x79   :  { %94 = dma.hbm_to_vmem [thread:$0]  %s9191_s6, 16, %s92_s29, [#allocation13]  }
  0x7a   :  { %8842 = dma.done.wait [#allocation4], 256  }
  0x7b   :  { %8843 = vsyncadd [#allocation4], 4294967040 }
  0x7c   :  { %8844 = dma.done.wait [#allocation7], 2448  }
  0x7d   :  { %8845 = vsyncadd [#allocation7], 4294964848 }
  0x7e   :  { %8846 = dma.done.wait [#allocation10], 83088  }
  0x7f   :  { %8847 = vsyncadd [#allocation10], 4294884208 }
  0x80   :  { %8848 = dma.done.wait [#allocation13], 9232  }
  0x81   :  { %8849 = vsyncadd [#allocation13], 4294958064  ;;  %v8865_v0 = vmov 0   ;;  %v7632_v1 = vld [vmem:[#allocation6 + $0x4] ss:$36 sps:$4 sm:$0xff]   ;;  %v117_v5 = vld [vmem:[#allocation3] sm:$0xff] }
  0x82   :  { %317 = vmatprep.mubr.bf16.mxu0 %v8865_v0  ;;  %360 = vmatprep.mubr.bf16.mxu1 %v8865_v0  ;;  %v7634_v2 = vld [vmem:[#allocation6] ss:$36 sps:$4 sm:$0xff]   ;;  %v7635_v3 = vld [vmem:[#allocation6 + $0x4c] ss:$36 sps:$4 sm:$0xff]   ;;  %v118_v6 = vld [vmem:[#allocation3 + $0x8] sm:$0xff]  ;;  %vm281_vm0 = vcmask 261120  }
  0x83   :  { %285 = vmatprep.subr.bf16.mxu0 %v7632_v1  ;;  %v7637_v4 = vld [vmem:[#allocation6 + $0x48] ss:$36 sps:$4 sm:$0xff]   ;;  %v7641_v9 = vld [vmem:[#allocation6 + $0x54] ss:$36 sps:$4 sm:$0xff]   ;;  %v119_v11 = vpack.c.bf16 %v118_v6, %v117_v5  ;;  %v7649_v14 = vld [vmem:[#allocation6 + $0x5c] ss:$36 sps:$4 sm:$0xff]  }
  0x84   :  { %286 = vmatpush1.bf16.msra.mxu0 %v7634_v2  ;;  %v7638_v7 = vld [vmem:[#allocation6 + $0xc] ss:$36 sps:$4 sm:$0xff]   ;;  %v7646_v13 = vld [vmem:[#allocation6 + $0x14] ss:$36 sps:$4 sm:$0xff]   ;;  %v7652_v15 = vld [vmem:[#allocation6 + $0x1c] ss:$36 sps:$4 sm:$0xff]  }
  0x85   :  { %287 = vmatprep.subr.bf16.mxu0 %v7635_v3  ;;  %v7640_v8 = vld [vmem:[#allocation6 + $0x8] ss:$36 sps:$4 sm:$0xff]   ;;  %v7643_v10 = vld [vmem:[#allocation6 + $0x50] ss:$36 sps:$4 sm:$0xff]   ;;  %328 = vmatprep.subr.bf16.mxu1 %v7638_v7  ;;  %v7647_v16 = vld [vmem:[#allocation6 + $0x58] ss:$36 sps:$4 sm:$0xff]  }
  0x86   :  { %v7644_v12 = vld [vmem:[#allocation6 + $0x10] ss:$36 sps:$4 sm:$0xff]   ;;  %329 = vmatpush1.bf16.msra.mxu1 %v7640_v8  ;;  %v7650_v17 = vld [vmem:[#allocation6 + $0x18] ss:$36 sps:$4 sm:$0xff]   ;;  %v7656_v18 = vld [vmem:[#allocation6 + $0x64] ss:$36 sps:$4 sm:$0xff]  }
  0x87   :  { %330 = vmatprep.subr.bf16.mxu1 %v7641_v9  ;;  %v7653_v19 = vld [vmem:[#allocation6 + $0x20] ss:$36 sps:$4 sm:$0xff]   ;;  %v8866_v21 = vmov 0.0   ;;  %v7657_v23 = vld [vmem:[#allocation6 + $0x68] ss:$36 sps:$4 sm:$0xff]   ;;  %vm8867_vm1 = vmmov 0  }
  0x88   :  { %288 = vmatpush1.bf16.msra.mxu0 %v7637_v4  ;;  %v7654_v20 = vld [vmem:[#allocation6 + $0x60] ss:$36 sps:$4 sm:$0xff]   ;;  %v7669_v29 = vld [vmem:[#allocation9 + $0x54] ss:$36 sps:$4 sm:$0xff]   ;;  %v7675_v33 = vld [vmem:[#allocation9 + $0x9c] ss:$36 sps:$4 sm:$0xff]  }
  0x89   :  { %371 = vmatprep.subr.bf16.mxu0 %v7646_v13  ;;  %v7660_v22 = vld [vmem:[#allocation9 + $0x4] ss:$36 sps:$4 sm:$0xff]   ;;  %v7663_v25 = vld [vmem:[#allocation9 + $0xc] ss:$36 sps:$4 sm:$0xff]   ;;  %v7672_v30 = vld [vmem:[#allocation9 + $0x94] ss:$36 sps:$4 sm:$0xff]  }
  0x8a   :  { %331 = vmatpush1.bf16.msra.mxu1 %v7643_v10  ;;  %v7658_v24 = vld [vmem:[#allocation9] ss:$36 sps:$4 sm:$0xff]   ;;  %v7666_v26 = vld [vmem:[#allocation9 + $0x4c] ss:$36 sps:$4 sm:$0xff]   ;;  %v7673_v35 = vld [vmem:[#allocation9 + $0x98] ss:$36 sps:$4 sm:$0xff]  }
  0x8b   :  { %6563 = vmatmul.mubr.msk.bf16.vlgmr.msra.gmra.mrb[0].mxu0 %vm281_vm0, %v119_v11  ;;  %414 = vmatprep.subr.bf16.mxu1 %v7652_v15  ;;  %v7661_v27 = vld [vmem:[#allocation9 + $0x8] ss:$36 sps:$4 sm:$0xff]   ;;  %v7667_v31 = vld [vmem:[#allocation9 + $0x50] ss:$36 sps:$4 sm:$0xff]   ;;  %v7678_v34 = vld [vmem:[#allocation9 + $0xdc] ss:$36 sps:$4 sm:$0xff]  }
  0x8c   :  { %372 = vmatpush1.bf16.msra.mxu0 %v7644_v12  ;;  %403 = vmatprep.mubr.bf16.mxu0 %v8865_v0  ;;  %v7664_v28 = vld [vmem:[#allocation9 + $0x48] ss:$36 sps:$4 sm:$0xff]   ;;  %v7670_v32 = vld [vmem:[#allocation9 + $0x90] ss:$36 sps:$4 sm:$0xff]   ;;  %v7676_v36 = vld [vmem:[#allocation9 + $0xd8] ss:$36 sps:$4 sm:$0xff]  }
  0x8d   :  { %373 = vmatprep.subr.bf16.mxu0 %v7649_v14  ;;  %6564 = vmatmul.mubr.msk.bf16.vlgmr.msra.gmra.mrb[0].mxu1 %vm281_vm0, %v119_v11  ;;  %v7681_v37 = vld [vmem:[#allocation9 + $0xe4] ss:$36 sps:$4 sm:$0xff]   ;;  %v7687_v41 = vld [vmem:[#allocation9 + $0x12c] ss:$36 sps:$4 sm:$0xff]   ;;  %v7693_v45 = vld [vmem:[#allocation9 + $0x174] ss:$36 sps:$4 sm:$0xff]  }
  0x8e   :  { %415 = vmatpush1.bf16.msra.mxu1 %v7650_v17  ;;  %446 = vmatprep.mubr.bf16.mxu1 %v8865_v0  ;;  %v7684_v38 = vld [vmem:[#allocation9 + $0x124] ss:$36 sps:$4 sm:$0xff]   ;;  %v7690_v42 = vld [vmem:[#allocation9 + $0x16c] ss:$36 sps:$4 sm:$0xff]   ;;  %v7696_v46 = vld [vmem:[#allocation9 + $0x1b4] ss:$36 sps:$4 sm:$0xff]  }
  0x8f   :  { %416 = vmatprep.subr.bf16.mxu1 %v7656_v18  ;;  %v7679_v39 = vld [vmem:[#allocation9 + $0xe0] ss:$36 sps:$4 sm:$0xff]   ;;  %v7685_v43 = vld [vmem:[#allocation9 + $0x128] ss:$36 sps:$4 sm:$0xff]   ;;  %v7691_v47 = vld [vmem:[#allocation9 + $0x170] ss:$36 sps:$4 sm:$0xff]  }
  0x90   :  { %374 = vmatpush1.bf16.msra.mxu0 %v7647_v16  ;;  %v7682_v40 = vld [vmem:[#allocation9 + $0x120] ss:$36 sps:$4 sm:$0xff]   ;;  %v7688_v44 = vld [vmem:[#allocation9 + $0x168] ss:$36 sps:$4 sm:$0xff]   ;;  %v7694_v48 = vld [vmem:[#allocation9 + $0x1b0] ss:$36 sps:$4 sm:$0xff]  }
  0x91   :  { %7487 = vmatprep.subr.bf16.mxu0 %v8866_v21  ;;  %v7699_v49 = vld [vmem:[#allocation9 + $0x1bc] ss:$36 sps:$4 sm:$0xff]   ;;  %v7705_v53 = vld [vmem:[#allocation9 + $0x204] ss:$36 sps:$4 sm:$0xff]   ;;  %v7711_v57 = vld [vmem:[#allocation9 + $0x24c] ss:$36 sps:$4 sm:$0xff]  }
  0x92   :  { %417 = vmatpush1.bf16.msra.mxu1 %v7654_v20  ;;  %v7702_v50 = vld [vmem:[#allocation9 + $0x1fc] ss:$36 sps:$4 sm:$0xff]   ;;  %v7708_v54 = vld [vmem:[#allocation9 + $0x244] ss:$36 sps:$4 sm:$0xff]   ;;  %v7714_v58 = vld [vmem:[#allocation9 + $0x28c] ss:$36 sps:$4 sm:$0xff]  }
  0x93   :  { %6565 = vmatmul.mubr.msk.bf16.vlgmr.msra.gmra.mrb[4].mxu0 %vm281_vm0, %v119_v11  ;;  %4624 = vmatprep.subr.bf16.mxu1 %v7660_v22  ;;  %v7697_v51 = vld [vmem:[#allocation9 + $0x1b8] ss:$36 sps:$4 sm:$0xff]   ;;  %v7703_v55 = vld [vmem:[#allocation9 + $0x200] ss:$36 sps:$4 sm:$0xff]   ;;  %v7709_v59 = vld [vmem:[#allocation9 + $0x248] ss:$36 sps:$4 sm:$0xff]  }
  0x94   :  { %7488 = vmatpush3.bf16.msra.mxu0 %v7653_v19  ;;  %7491 = vmatprep.mubr.msk.bf16.mxu0 %vm8867_vm1, %v8866_v21  ;;  %v7700_v52 = vld [vmem:[#allocation9 + $0x1f8] ss:$36 sps:$4 sm:$0xff]   ;;  %v7706_v56 = vld [vmem:[#allocation9 + $0x240] ss:$36 sps:$4 sm:$0xff]   ;;  %v7712_v60 = vld [vmem:[#allocation9 + $0x288] ss:$36 sps:$4 sm:$0xff]  }
  0x95   :  { %7489 = vmatprep.subr.bf16.mxu0 %v8866_v21  ;;  %6566 = vmatmul.mubr.msk.bf16.vlgmr.msra.gmra.mrb[4].mxu1 %vm281_vm0, %v119_v11  ;;  %v7717_v61 = vld [vmem:[#allocation9 + $0x294] ss:$36 sps:$4 sm:$0xff]   ;;  %v7723_v2 = vld [vmem:[#allocation9 + $0x2dc] ss:$36 sps:$4 sm:$0xff]   ;;  %v7729_v6 = vld [vmem:[#allocation9 + $0x324] ss:$36 sps:$4 sm:$0xff]  }
  0x96   :  { %4625 = vmatpush1.bf16.msra.mxu1 %v7658_v24  ;;  %v7720_v62 = vld [vmem:[#allocation9 + $0x2d4] ss:$36 sps:$4 sm:$0xff]   ;;  %v7726_v3 = vld [vmem:[#allocation9 + $0x31c] ss:$36 sps:$4 sm:$0xff]   ;;  %v7732_v7 = vld [vmem:[#allocation9 + $0x364] ss:$36 sps:$4 sm:$0xff]  }
  0x97   :  { %4626 = vmatprep.subr.bf16.mxu1 %v7666_v26  ;;  %v7715_v63 = vld [vmem:[#allocation9 + $0x290] ss:$36 sps:$4 sm:$0xff]   ;;  %v7721_v4 = vld [vmem:[#allocation9 + $0x2d8] ss:$36 sps:$4 sm:$0xff]   ;;  %v7727_v8 = vld [vmem:[#allocation9 + $0x320] ss:$36 sps:$4 sm:$0xff]  }
  0x98   :  { %7490 = vmatpush3.bf16.msra.mxu0 %v7657_v23  ;;  %v7718_v1 = vld [vmem:[#allocation9 + $0x2d0] ss:$36 sps:$4 sm:$0xff]   ;;  %v7724_v5 = vld [vmem:[#allocation9 + $0x318] ss:$36 sps:$4 sm:$0xff]   ;;  %v7730_v9 = vld [vmem:[#allocation9 + $0x360] ss:$36 sps:$4 sm:$0xff]  }
  0x99   :  { %4839 = vmatprep.subr.bf16.mxu0 %v7663_v25  ;;  %v7735_v10 = vld [vmem:[#allocation9 + $0x36c] ss:$36 sps:$4 sm:$0xff]   ;;  %v7741_v14 = vld [vmem:[#allocation9 + $0x3b4] ss:$36 sps:$4 sm:$0xff]   ;;  %v7747_v17 = vld [vmem:[#allocation9 + $0x3fc] ss:$36 sps:$4 sm:$0xff]  }
  0x9a   :  { %4627 = vmatpush1.bf16.msra.mxu1 %v7664_v28  ;;  %v7733_v12 = vld [vmem:[#allocation9 + $0x368] ss:$36 sps:$4 sm:$0xff]   ;;  %v7739_v15 = vld [vmem:[#allocation9 + $0x3b0] ss:$36 sps:$4 sm:$0xff]   ;;  %v7745_v19 = vld [vmem:[#allocation9 + $0x3f8] ss:$36 sps:$4 sm:$0xff]  }
  0x9b   :  { %7492 = vmatmul.mubr.msk.bf16.vlgmr.msra.gmra.mrb[8].mxu0 %vm281_vm0, %v119_v11  ;;  %4628 = vmatprep.subr.bf16.mxu1 %v7672_v30  ;;  %v7738_v11 = vld [vmem:[#allocation9 + $0x3ac] ss:$36 sps:$4 sm:$0xff]   ;;  %v7744_v16 = vld [vmem:[#allocation9 + $0x3f4] ss:$36 sps:$4 sm:$0xff]   ;;  %v7750_v20 = vld [vmem:[#allocation9 + $0x43c] ss:$36 sps:$4 sm:$0xff]  }
  0x9c   :  { %4840 = vmatpush1.bf16.msra.mxu0 %v7661_v27  ;;  %v7736_v13 = vld [vmem:[#allocation9 + $0x3a8] ss:$36 sps:$4 sm:$0xff]   ;;  %v7742_v18 = vld [vmem:[#allocation9 + $0x3f0] ss:$36 sps:$4 sm:$0xff]   ;;  %v7748_v23 = vld [vmem:[#allocation9 + $0x438] ss:$36 sps:$4 sm:$0xff]   ;;  %v144_v27 = vlaneseq }
  0x9d   :  { %4841 = vmatprep.subr.bf16.mxu0 %v7669_v29  ;;  %v7753_v22 = vld [vmem:[#allocation9 + $0x444] ss:$36 sps:$4 sm:$0xff]   ;;  %v7759_v26 = vld [vmem:[#allocation9 + $0x48c] ss:$36 sps:$4 sm:$0xff]   ;;  %v9011_v29 = vld [vmem:[#allocation8] sm:$0xff]  ;;  %s8868_s6 = smov [#allocation15]  }
  0x9e   :  { %4629 = vmatpush1.bf16.msra.mxu1 %v7670_v32  ;;  %v7751_v24 = vld [vmem:[#allocation9 + $0x440] ss:$36 sps:$4 sm:$0xff]   ;;  %v9009_v28 = vshrl.u32 %v144_v27, 7  ;;  %s6529_s15 = sshll.u32 %s8868_s6, 4  ;;  %s6530_s15 = int_to_ptr.vmem [resolvable:$true] %s6529_s15 }
  0x9f   :  { %4630 = vmatprep.subr.bf16.mxu1 %v7678_v34  ;;  %v7756_v25 = vld [vmem:[#allocation9 + $0x484] ss:$36 sps:$4 sm:$0xff]   ;;  %s8820_s16 = scalar_lea.vmem %s6530_s15, 256  ;;  %p8825_p1 = scmp.lt.s32.totalorder %s6530_s15, %s6530_s15 }
  0xa0   :  { %4842 = vmatpush1.bf16.msra.mxu0 %v7667_v31  ;;  %v146_v30 = vsub.s32 0, %v9009_v28  ;;  %v150_v31 = vsub.s32 1, %v9009_v28  ;;  %p8821_p0 = scmp.ne.s32.totalorder %s6530_s15, %s8820_s16  ;;  %p8826_p2 = scmp.lt.s32.totalorder %s8820_s16, %s8820_s16 }
  0xa1   :  { %4843 = vmatprep.subr.bf16.mxu0 %v7675_v33  ;;  %v154_v33 = vsub.s32 2, %v9009_v28 }
  0xa2   :  { %4631 = vmatpush1.bf16.msra.mxu1 %v7676_v36  ;;  %v147_v32 = vrot.slane %v9011_v29, %v146_v30  ;;  %v151_v34 = vrot.slane %v9011_v29, %v150_v31  ;;  %p8827_p3 = por %p8826_p2, %p8825_p1 }
  0xa3   :  { %4632 = vmatprep.subr.bf16.mxu1 %v7684_v38 }
  0xa4   :  { %4844 = vmatpush1.bf16.msra.mxu0 %v7673_v35  ;;  %v158_v35 = vsub.s32 3, %v9009_v28  ;;  %p8828_p4 = pnand %p8827_p3, %p8821_p0 }
  0xa5   :  { %4845 = vmatprep.subr.bf16.mxu0 %v7681_v37 }
  0xa6   :  { %4633 = vmatpush1.bf16.msra.mxu1 %v7682_v40  ;;  %v162_v40 = vsub.s32 4, %v9009_v28 }
  0xa7   :  { %4634 = vmatprep.subr.bf16.mxu1 %v7690_v42 }
  0xa8   :  { %4846 = vmatpush1.bf16.msra.mxu0 %v7679_v39  ;;  %v155_v39 = vrot.slane %v9011_v29, %v154_v33 }
  0xa9   :  { %4847 = vmatprep.subr.bf16.mxu0 %v7687_v41 }
  0xaa   :  { %4635 = vmatpush1.bf16.msra.mxu1 %v7688_v44  ;;  %v166_v44 = vsub.s32 5, %v9009_v28 }
  0xab   :  { %4636 = vmatprep.subr.bf16.mxu1 %v7696_v46 }
  0xac   :  { %4848 = vmatpush1.bf16.msra.mxu0 %v7685_v43  ;;  %v159_v43 = vrot.slane %v9011_v29, %v158_v35 }
  0xad   :  { %4849 = vmatprep.subr.bf16.mxu0 %v7693_v45 }
  0xae   :  { %4637 = vmatpush1.bf16.msra.mxu1 %v7694_v48 }
  0xaf   :  { %4638 = vmatprep.subr.bf16.mxu1 %v7702_v50 }
  0xb0   :  { %4850 = vmatpush1.bf16.msra.mxu0 %v7691_v47 }
  0xb1   :  { %4851 = vmatprep.subr.bf16.mxu0 %v7699_v49 }
  0xb2   :  { %4639 = vmatpush1.bf16.msra.mxu1 %v7700_v52 }
  0xb3   :  { %4640 = vmatprep.subr.bf16.mxu1 %v7708_v54 }
  0xb4   :  { %4852 = vmatpush1.bf16.msra.mxu0 %v7697_v51 }
  0xb5   :  { %4853 = vmatprep.subr.bf16.mxu0 %v7705_v53  ;;  %v163_v53 = vrot.slane %v9011_v29, %v162_v40 }
  0xb6   :  { %4641 = vmatpush1.bf16.msra.mxu1 %v7706_v56  ;;  %v7754_v56 = vld [vmem:[#allocation9 + $0x480] ss:$36 sps:$4 sm:$0xff]  }
  0xb7   :  { %4642 = vmatprep.subr.bf16.mxu1 %v7714_v58 }
  0xb8   :  { %4854 = vmatpush1.bf16.msra.mxu0 %v7703_v55 }
  0xb9   :  { %4855 = vmatprep.subr.bf16.mxu0 %v7711_v57  ;;  %v7757_v57 = vld [vmem:[#allocation9 + $0x488] ss:$36 sps:$4 sm:$0xff]  }
  0xba   :  { %4643 = vmatpush1.bf16.msra.mxu1 %v7712_v60  ;;  %v167_v60 = vrot.slane %v9011_v29, %v166_v44 }
  0xbb   :  { %4644 = vmatprep.subr.bf16.mxu1 %v7720_v62 }
  0xbc   :  { %4856 = vmatpush1.bf16.msra.mxu0 %v7709_v59 }
  0xbd   :  { %4857 = vmatprep.subr.bf16.mxu0 %v7717_v61 }
  0xbe   :  { %4645 = vmatpush1.bf16.msra.mxu1 %v7718_v1 }
  0xbf   :  { %4646 = vmatprep.subr.bf16.mxu1 %v7726_v3 }
  0xc0   :  { %4858 = vmatpush1.bf16.msra.mxu0 %v7715_v63 }
  0xc1   :  { %4859 = vmatprep.subr.bf16.mxu0 %v7723_v2 }
  0xc2   :  { %4647 = vmatpush1.bf16.msra.mxu1 %v7724_v5 }
  0xc3   :  { %4648 = vmatprep.subr.bf16.mxu1 %v7732_v7  ;;  %v7765_v7 = vld [vmem:[#allocation9 + $0x4d4] ss:$36 sps:$4 sm:$0xff]  }
  0xc4   :  { %4860 = vmatpush1.bf16.msra.mxu0 %v7721_v4 }
  0xc5   :  { %4861 = vmatprep.subr.bf16.mxu0 %v7729_v6  ;;  %v7762_v6 = vld [vmem:[#allocation9 + $0x4cc] ss:$36 sps:$4 sm:$0xff]  }
  0xc6   :  { %4649 = vmatpush1.bf16.msra.mxu1 %v7730_v9 }
  0xc7   :  { %4650 = vmatprep.subr.bf16.mxu1 %v7738_v11 }
  0xc8   :  { %4862 = vmatpush1.bf16.msra.mxu0 %v7727_v8 }
  0xc9   :  { %4863 = vmatprep.subr.bf16.mxu0 %v7735_v10 }
  0xca   :  { %4651 = vmatpush1.bf16.msra.mxu1 %v7736_v13 }
  0xcb   :  { %4652 = vmatprep.subr.bf16.mxu1 %v7744_v16 }
  0xcc   :  { %4864 = vmatpush1.bf16.msra.mxu0 %v7733_v12 }
  0xcd   :  { %4865 = vmatprep.subr.bf16.mxu0 %v7741_v14 }
  0xce   :  { %4653 = vmatpush1.bf16.msra.mxu1 %v7742_v18  ;;  %v7760_v18 = vld [vmem:[#allocation9 + $0x4c8] ss:$36 sps:$4 sm:$0xff]  }
  0xcf   :  { %4654 = vmatprep.subr.bf16.mxu1 %v7750_v20 }
  0xd0   :  { %4866 = vmatpush1.bf16.msra.mxu0 %v7739_v15 }
  0xd1   :  { %4867 = vmatprep.subr.bf16.mxu0 %v7747_v17 }
  0xd2   :  { %4655 = vmatpush1.bf16.msra.mxu1 %v7748_v23 }
  0xd3   :  { %4667 = vmatprep.subr.bf16.mxu1 %v7756_v25  ;;  %v7771_v25 = vld [vmem:[#allocation9 + $0x51c] ss:$36 sps:$4 sm:$0xff]  }
  0xd4   :  { %4868 = vmatpush1.bf16.msra.mxu0 %v7745_v19  ;;  %v7763_v19 = vld [vmem:[#allocation9 + $0x4d0] ss:$36 sps:$4 sm:$0xff]  }
  0xd5   :  { %4869 = vmatprep.subr.bf16.mxu0 %v7753_v22 }
  0xd8   :  { %4870 = vmatpush1.bf16.msra.mxu0 %v7751_v24  ;;  %v7768_v24 = vld [vmem:[#allocation9 + $0x514] ss:$36 sps:$4 sm:$0xff]  }
  0xd9   :  { %4882 = vmatprep.subr.bf16.mxu0 %v7759_v26 }
 0x15e   :  { %v319_v36 = vpop.f32.mrb[0].mxu0 }
 0x15f   :  { %v320_v37 = vadd.f32 %v319_v36, %v147_v32  ;;  %v321_v38 = vpop.f32.mrb[1].mxu0  ;;  %v7769_v36 = vld [vmem:[#allocation9 + $0x518] ss:$36 sps:$4 sm:$0xff]  }
 0x160   :  { %v322_v41 = vadd.f32 %v321_v38, %v151_v34  ;;  %v323_v42 = vpop.f32.mrb[2].mxu0  ;;  %v362_v48 = vpop.f32.mrb[0].mxu1  ;;  %v7774_v38 = vld [vmem:[#allocation9 + $0x55c] ss:$36 sps:$4 sm:$0xff]  }
 0x161   :  { %v324_v45 = vadd.f32 %v323_v42, %v147_v32  ;;  %v325_v46 = vpop.f32.mrb[3].mxu0  ;;  %v498_v49 = vmax.f32 %v320_v37, 0.0  ;;  %v363_v51 = vadd.f32 %v362_v48, %v155_v39  ;;  %v364_v52 = vpop.f32.mrb[1].mxu1  ;;  %v7775_v42 = vld [vmem:[#allocation9 + $0x560] ss:$36 sps:$4 sm:$0xff]  }
 0x162   :  { %v326_v47 = vadd.f32 %v325_v46, %v151_v34  ;;  %v499_v54 = vmax.f32 %v322_v41, 0.0  ;;  %v365_v58 = vadd.f32 %v364_v52, %v159_v43  ;;  %v366_v59 = vpop.f32.mrb[2].mxu1  ;;  %v7766_v34 = vld [vmem:[#allocation9 + $0x510] ss:$36 sps:$4 sm:$0xff]   ;;  %v7772_v41 = vld [vmem:[#allocation9 + $0x558] ss:$36 sps:$4 sm:$0xff]  }
 0x163   :  { %v507_v50 = vmax.f32 %v324_v45, 0.0  ;;  %v500_v62 = vmax.f32 %v363_v51, 0.0  ;;  %v367_v63 = vadd.f32 %v366_v59, %v155_v39  ;;  %v368_v1 = vpop.f32.mrb[3].mxu1  ;;  %v7777_v39 = vld [vmem:[#allocation9 + $0x564] ss:$36 sps:$4 sm:$0xff]  }
 0x164   :  { %v508_v55 = vmax.f32 %v326_v47, 0.0  ;;  %v501_v3 = vmax.f32 %v365_v58, 0.0  ;;  %v369_v4 = vadd.f32 %v368_v1, %v159_v43  ;;  %v7780_v43 = vld [vmem:[#allocation9 + $0x5a4] ss:$36 sps:$4 sm:$0xff]   ;;  %v7783_v45 = vld [vmem:[#allocation9 + $0x5ac] ss:$36 sps:$4 sm:$0xff]  }
 0x165   :  { %v9037_v61 = vpack.c.bf16 %v507_v50, %v498_v49  ;;  %v509_v8 = vmax.f32 %v367_v63, 0.0  ;;  %v7778_v46 = vld [vmem:[#allocation9 + $0x5a0] ss:$36 sps:$4 sm:$0xff]   ;;  %v7781_v47 = vld [vmem:[#allocation9 + $0x5a8] ss:$36 sps:$4 sm:$0xff]   ;;  %v170_v50 = vsub.s32 6, %v9009_v28 }
 0x166   :  { %v9039_v2 = vpack.c.bf16 %v508_v55, %v499_v54  ;;  %v405_v5 = vpop.f32.mrb[4].mxu0  ;;  %v510_v11 = vmax.f32 %v369_v4, 0.0  ;;  %v7786_v48 = vld [vmem:[#allocation9 + $0x5ec] ss:$36 sps:$4 sm:$0xff]   ;;  %v7789_v49 = vld [vmem:[#allocation9 + $0x5f4] ss:$36 sps:$4 sm:$0xff]  }
 0x167   :  { %v406_v9 = vadd.f32 %v405_v5, %v163_v53  ;;  %v407_v10 = vpop.f32.mrb[5].mxu0  ;;  %v9045_v14 = vpack.c.bf16 %v509_v8, %v500_v62  ;;  %v171_v52 = vrot.slane %v9011_v29, %v170_v50  ;;  %v7787_v54 = vld [vmem:[#allocation9 + $0x5f0] ss:$36 sps:$4 sm:$0xff]   ;;  %v174_v55 = vsub.s32 7, %v9009_v28  ;;  %v7795_v58 = vld [vmem:[#allocation9 + $0x63c] ss:$36 sps:$4 sm:$0xff]  }
 0x168   :  { %4656 = vmatprep.mubr.bf16.mxu1 %v9039_v2  ;;  %4871 = vmatprep.mubr.bf16.mxu0 %v9039_v2  ;;  %v408_v12 = vadd.f32 %v407_v10, %v167_v60  ;;  %v409_v13 = vpop.f32.mrb[6].mxu0  ;;  %v9047_v20 = vpack.c.bf16 %v510_v11, %v501_v3  ;;  %v448_v51 = vpop.f32.mrb[4].mxu1  ;;  %v7790_v4 = vld [vmem:[#allocation9 + $0x630] ss:$36 sps:$4 sm:$0xff]   ;;  %v7793_v5 = vld [vmem:[#allocation9 + $0x638] ss:$36 sps:$4 sm:$0xff]  }
 0x169   :  { %4657 = vmatmul.mubr.bf16.vlgmr.msra.gmra.mrb[8].mxu1 %v9037_v61  ;;  %4872 = vmatmul.mubr.bf16.vlgmr.msra.gmra.mrb[12].mxu0 %v9037_v61  ;;  %v502_v15 = vmax.f32 %v406_v9, 0.0  ;;  %v410_v16 = vadd.f32 %v409_v13, %v163_v53  ;;  %v411_v17 = vpop.f32.mrb[7].mxu0  ;;  %v7784_v53 = vld [vmem:[#allocation9 + $0x5e8] ss:$36 sps:$4 sm:$0xff]   ;;  %v449_v59 = vadd.f32 %v448_v51, %v171_v52  ;;  %v175_v62 = vrot.slane %v9011_v29, %v174_v55  ;;  %v7798_v9 = vld [vmem:[#allocation9 + $0x67c] ss:$36 sps:$4 sm:$0xff]  }
 0x16a   :  { %4668 = vmatpush1.bf16.msra.mxu1 %v7754_v56  ;;  %4883 = vmatpush1.bf16.msra.mxu0 %v7757_v57  ;;  %v503_v22 = vmax.f32 %v408_v12, 0.0  ;;  %v412_v23 = vadd.f32 %v411_v17, %v167_v60  ;;  %v450_v56 = vpop.f32.mrb[5].mxu1  ;;  %v7792_v57 = vld [vmem:[#allocation9 + $0x634] ss:$36 sps:$4 sm:$0xff]   ;;  %v7801_v10 = vld [vmem:[#allocation9 + $0x684] ss:$36 sps:$4 sm:$0xff]  }
 0x16b   :  { %4669 = vmatprep.subr.bf16.mxu1 %v7762_v6  ;;  %4884 = vmatprep.subr.bf16.mxu0 %v7765_v7  ;;  %v511_v26 = vmax.f32 %v410_v16, 0.0  ;;  %v452_v60 = vpop.f32.mrb[6].mxu1  ;;  %v504_v3 = vmax.f32 %v449_v59, 0.0  ;;  %v451_v6 = vadd.f32 %v450_v56, %v175_v62  ;;  %v7796_v29 = vld [vmem:[#allocation9 + $0x678] ss:$36 sps:$4 sm:$0xff]  }
 0x16c   :  { %4699 = vmatprep.mubr.bf16.mxu1 %v9047_v20  ;;  %4914 = vmatprep.mubr.bf16.mxu0 %v9047_v20  ;;  %v512_v27 = vmax.f32 %v412_v23, 0.0  ;;  %v453_v63 = vadd.f32 %v452_v60, %v171_v52  ;;  %v454_v1 = vpop.f32.mrb[7].mxu1  ;;  %v7804_v17 = vld [vmem:[#allocation9 + $0x6c4] ss:$36 sps:$4 sm:$0xff]   ;;  %v7810_v23 = vld [vmem:[#allocation9 + $0x70c] ss:$36 sps:$4 sm:$0xff]  }
 0x16d   :  { %v9051_v32 = vpack.c.bf16 %v511_v26, %v502_v15  ;;  %v455_v8 = vadd.f32 %v454_v1, %v175_v62  ;;  %v505_v11 = vmax.f32 %v451_v6, 0.0  ;;  %v7799_v15 = vld [vmem:[#allocation9 + $0x680] ss:$36 sps:$4 sm:$0xff]   ;;  %v7811_v26 = vld [vmem:[#allocation9 + $0x710] ss:$36 sps:$4 sm:$0xff]  }
 0x16e   :  { %4670 = vmatpush1.bf16.msra.mxu1 %v7760_v18  ;;  %4885 = vmatpush1.bf16.msra.mxu0 %v7763_v19  ;;  %v9053_v37 = vpack.c.bf16 %v512_v27, %v503_v22  ;;  %v513_v7 = vmax.f32 %v453_v63, 0.0  ;;  %v7807_v18 = vld [vmem:[#allocation9 + $0x6cc] ss:$36 sps:$4 sm:$0xff]   ;;  %v7802_v19 = vld [vmem:[#allocation9 + $0x6c0] ss:$36 sps:$4 sm:$0xff]  }
 0x16f   :  { %4671 = vmatprep.subr.bf16.mxu1 %v7768_v24  ;;  %4886 = vmatprep.subr.bf16.mxu0 %v7771_v25  ;;  %v514_v13 = vmax.f32 %v455_v8, 0.0  ;;  %v7805_v22 = vld [vmem:[#allocation9 + $0x6c8] ss:$36 sps:$4 sm:$0xff]   ;;  %v7813_v24 = vld [vmem:[#allocation9 + $0x714] ss:$36 sps:$4 sm:$0xff]  }
 0x170   :  { %v9063_v12 = vpack.c.bf16 %v513_v7, %v504_v3  ;;  %v7808_v25 = vld [vmem:[#allocation9 + $0x708] ss:$36 sps:$4 sm:$0xff]   ;;  %v7816_v27 = vld [vmem:[#allocation9 + $0x754] ss:$36 sps:$4 sm:$0xff]   ;;  %v7826_v51 = vld [vmem:[#allocation9 + $0x7e0] ss:$36 sps:$4 sm:$0xff]  }
 0x171   :  { %v9065_v16 = vpack.c.bf16 %v514_v13, %v505_v11  ;;  %v7832_v63 = vld [vmem:[#allocation9 + $0x828] ss:$36 sps:$4 sm:$0xff]   ;;  %v7835_v1 = vld [vmem:[#allocation9 + $0x830] ss:$36 sps:$4 sm:$0xff]   ;;  %v7841_v7 = vld [vmem:[#allocation9 + $0x878] ss:$36 sps:$4 sm:$0xff]  }
 0x172   :  { %4672 = vmatpush1.bf16.msra.mxu1 %v7766_v34  ;;  %4887 = vmatpush1.bf16.msra.mxu0 %v7769_v36  ;;  %v7819_v34 = vld [vmem:[#allocation9 + $0x75c] ss:$36 sps:$4 sm:$0xff]   ;;  %v7814_v36 = vld [vmem:[#allocation9 + $0x750] ss:$36 sps:$4 sm:$0xff]   ;;  %v7852_v13 = vld [vmem:[#allocation9 + $0x904] ss:$36 sps:$4 sm:$0xff]  }
 0x173   :  { %4673 = vmatprep.subr.bf16.mxu1 %v7774_v38  ;;  %4888 = vmatprep.subr.bf16.mxu0 %v7777_v39  ;;  %v7817_v38 = vld [vmem:[#allocation9 + $0x758] ss:$36 sps:$4 sm:$0xff]   ;;  %v7838_v6 = vld [vmem:[#allocation9 + $0x870] ss:$36 sps:$4 sm:$0xff]   ;;  %v7847_v11 = vld [vmem:[#allocation9 + $0x8c0] ss:$36 sps:$4 sm:$0xff]  }
 0x174   :  { %v7822_v39 = vld [vmem:[#allocation9 + $0x79c] ss:$36 sps:$4 sm:$0xff]   ;;  %v7840_v3 = vld [vmem:[#allocation9 + $0x874] ss:$36 sps:$4 sm:$0xff]  }
 0x175   :  { %v7846_v8 = vld [vmem:[#allocation9 + $0x8bc] ss:$36 sps:$4 sm:$0xff]  }
 0x176   :  { %4674 = vmatpush1.bf16.msra.mxu1 %v7772_v41  ;;  %4889 = vmatpush1.bf16.msra.mxu0 %v7775_v42  ;;  %v7825_v41 = vld [vmem:[#allocation9 + $0x7a4] ss:$36 sps:$4 sm:$0xff]   ;;  %v7820_v42 = vld [vmem:[#allocation9 + $0x798] ss:$36 sps:$4 sm:$0xff]  }
 0x177   :  { %4675 = vmatprep.subr.bf16.mxu1 %v7780_v43  ;;  %4890 = vmatprep.subr.bf16.mxu0 %v7783_v45  ;;  %v7823_v43 = vld [vmem:[#allocation9 + $0x7a0] ss:$36 sps:$4 sm:$0xff]   ;;  %v6544_v45 = vld [vmem:[#allocation8 + $0x8] ss:$0 sm:$0xff] }
 0x17a   :  { %4676 = vmatpush1.bf16.msra.mxu1 %v7778_v46  ;;  %4891 = vmatpush1.bf16.msra.mxu0 %v7781_v47  ;;  %v491_v46 = vpop.f32.mrb[8].mxu0  ;;  %v7828_v47 = vld [vmem:[#allocation9 + $0x7e4] ss:$36 sps:$4 sm:$0xff]  }
 0x17b   :  { %4677 = vmatprep.subr.bf16.mxu1 %v7786_v48  ;;  %4892 = vmatprep.subr.bf16.mxu0 %v7789_v49  ;;  %v7831_v48 = vld [vmem:[#allocation9 + $0x7ec] ss:$36 sps:$4 sm:$0xff]   ;;  %v492_v49 = vadd.f32 %v6544_v45, %v491_v46  ;;  %v7493_v52 = vpop.f32.mrb[9].mxu0 }
 0x17c   :  { %v494_v56 = vpop.f32.mrb[10].mxu0  ;;  %v7882_v46 = vld [vmem:[#allocation9 + $0xa6c] ss:$36 sps:$4 sm:$0xff]   ;;  %v7891_v52 = vld [vmem:[#allocation9 + $0xabc] ss:$36 sps:$4 sm:$0xff]  }
 0x17d   :  { %v495_v59 = vadd.f32 %v6544_v45, %v494_v56  ;;  %v7494_v60 = vpop.f32.mrb[11].mxu0  ;;  %v7877_v45 = vld [vmem:[#allocation9 + $0xa28] ss:$36 sps:$4 sm:$0xff]   ;;  %v7894_v56 = vld [vmem:[#allocation9 + $0xafc] ss:$36 sps:$4 sm:$0xff]  }
 0x17e   :  { %4678 = vmatpush1.bf16.msra.mxu1 %v7784_v53  ;;  %4893 = vmatpush1.bf16.msra.mxu0 %v7787_v54  ;;  %v7829_v53 = vld [vmem:[#allocation9 + $0x7e8] ss:$36 sps:$4 sm:$0xff]  }
 0x17f   :  { %4679 = vmatprep.subr.bf16.mxu1 %v7792_v57  ;;  %4894 = vmatprep.subr.bf16.mxu0 %v7795_v58  ;;  %v7834_v54 = vld [vmem:[#allocation9 + $0x82c] ss:$36 sps:$4 sm:$0xff]   ;;  %v7837_v57 = vld [vmem:[#allocation9 + $0x834] ss:$36 sps:$4 sm:$0xff]   ;;  %v506_v58 = vmax.f32 %v492_v49, 0.0  ;;  %v515_v62 = vmax.f32 %v495_v59, 0.0 }
 0x180   :  { %v7883_v49 = vld [vmem:[#allocation9 + $0xa70] ss:$36 sps:$4 sm:$0xff]   ;;  %v7895_v59 = vld [vmem:[#allocation9 + $0xb00] ss:$36 sps:$4 sm:$0xff]  }
 0x181   :  { %v7900_v60 = vld [vmem:[#allocation9 + $0xb44] ss:$36 sps:$4 sm:$0xff]  }
 0x182   :  { %4680 = vmatpush1.bf16.msra.mxu1 %v7790_v4  ;;  %4895 = vmatpush1.bf16.msra.mxu0 %v7793_v5  ;;  %v7843_v4 = vld [vmem:[#allocation9 + $0x87c] ss:$36 sps:$4 sm:$0xff]   ;;  %v9067_v5 = vpack.c.bf16 %v515_v62, %v506_v58  ;;  %v7903_v62 = vld [vmem:[#allocation9 + $0xb4c] ss:$36 sps:$4 sm:$0xff]  }
 0x183   :  { %4681 = vmatprep.subr.bf16.mxu1 %v7798_v9  ;;  %4896 = vmatprep.subr.bf16.mxu0 %v7801_v10  ;;  %v7849_v9 = vld [vmem:[#allocation9 + $0x8c4] ss:$36 sps:$4 sm:$0xff]   ;;  %v7844_v10 = vld [vmem:[#allocation9 + $0x8b8] ss:$36 sps:$4 sm:$0xff]  }
 0x184   :  { %v7892_v58 = vld [vmem:[#allocation9 + $0xaf8] ss:$36 sps:$4 sm:$0xff]  }
 0x186   :  { %4682 = vmatpush1.bf16.msra.mxu1 %v7796_v29  ;;  %4897 = vmatpush1.bf16.msra.mxu0 %v7799_v15  ;;  %v7855_v29 = vld [vmem:[#allocation9 + $0x90c] ss:$36 sps:$4 sm:$0xff]   ;;  %v7850_v15 = vld [vmem:[#allocation9 + $0x900] ss:$36 sps:$4 sm:$0xff]  }
 0x187   :  { %4683 = vmatprep.subr.bf16.mxu1 %v7804_v17  ;;  %4898 = vmatprep.subr.bf16.mxu0 %v7807_v18  ;;  %v7853_v17 = vld [vmem:[#allocation9 + $0x908] ss:$36 sps:$4 sm:$0xff]  }
 0x188   :  { %v7858_v18 = vld [vmem:[#allocation9 + $0x94c] ss:$36 sps:$4 sm:$0xff]  }
 0x18a   :  { %4684 = vmatpush1.bf16.msra.mxu1 %v7802_v19  ;;  %4899 = vmatpush1.bf16.msra.mxu0 %v7805_v22  ;;  %v7861_v19 = vld [vmem:[#allocation9 + $0x954] ss:$36 sps:$4 sm:$0xff]   ;;  %v7856_v22 = vld [vmem:[#allocation9 + $0x948] ss:$36 sps:$4 sm:$0xff]  }
 0x18b   :  { %4685 = vmatprep.subr.bf16.mxu1 %v7810_v23  ;;  %4900 = vmatprep.subr.bf16.mxu0 %v7813_v24  ;;  %v7859_v23 = vld [vmem:[#allocation9 + $0x950] ss:$36 sps:$4 sm:$0xff]  }
 0x18c   :  { %v7864_v24 = vld [vmem:[#allocation9 + $0x994] ss:$36 sps:$4 sm:$0xff]  }
 0x18e   :  { %4686 = vmatpush1.bf16.msra.mxu1 %v7808_v25  ;;  %4901 = vmatpush1.bf16.msra.mxu0 %v7811_v26  ;;  %v7867_v25 = vld [vmem:[#allocation9 + $0x99c] ss:$36 sps:$4 sm:$0xff]   ;;  %v7862_v26 = vld [vmem:[#allocation9 + $0x990] ss:$36 sps:$4 sm:$0xff]  }
 0x18f   :  { %4687 = vmatprep.subr.bf16.mxu1 %v7816_v27  ;;  %4902 = vmatprep.subr.bf16.mxu0 %v7819_v34  ;;  %v7865_v27 = vld [vmem:[#allocation9 + $0x998] ss:$36 sps:$4 sm:$0xff]  }
 0x190   :  { %v7870_v34 = vld [vmem:[#allocation9 + $0x9dc] ss:$36 sps:$4 sm:$0xff]  }
 0x192   :  { %4688 = vmatpush1.bf16.msra.mxu1 %v7814_v36  ;;  %4903 = vmatpush1.bf16.msra.mxu0 %v7817_v38  ;;  %v7873_v36 = vld [vmem:[#allocation9 + $0x9e4] ss:$36 sps:$4 sm:$0xff]   ;;  %v7868_v38 = vld [vmem:[#allocation9 + $0x9d8] ss:$36 sps:$4 sm:$0xff]  }
 0x193   :  { %4689 = vmatprep.subr.bf16.mxu1 %v7822_v39  ;;  %4904 = vmatprep.subr.bf16.mxu0 %v7825_v41  ;;  %v7871_v39 = vld [vmem:[#allocation9 + $0x9e0] ss:$36 sps:$4 sm:$0xff]  }
 0x194   :  { %v7876_v41 = vld [vmem:[#allocation9 + $0xa24] ss:$36 sps:$4 sm:$0xff]  }
 0x196   :  { %4690 = vmatpush1.bf16.msra.mxu1 %v7820_v42  ;;  %4905 = vmatpush1.bf16.msra.mxu0 %v7823_v43  ;;  %v7879_v42 = vld [vmem:[#allocation9 + $0xa2c] ss:$36 sps:$4 sm:$0xff]   ;;  %v7874_v43 = vld [vmem:[#allocation9 + $0xa20] ss:$36 sps:$4 sm:$0xff]  }
 0x197   :  { %4691 = vmatprep.subr.bf16.mxu1 %v7828_v47  ;;  %4906 = vmatprep.subr.bf16.mxu0 %v7831_v48  ;;  %v7885_v47 = vld [vmem:[#allocation9 + $0xa74] ss:$36 sps:$4 sm:$0xff]   ;;  %v7880_v48 = vld [vmem:[#allocation9 + $0xa68] ss:$36 sps:$4 sm:$0xff]  }
 0x19a   :  { %4692 = vmatpush1.bf16.msra.mxu1 %v7826_v51  ;;  %4907 = vmatpush1.bf16.msra.mxu0 %v7829_v53  ;;  %v7888_v51 = vld [vmem:[#allocation9 + $0xab4] ss:$36 sps:$4 sm:$0xff]  }
 0x19b   :  { %4693 = vmatprep.subr.bf16.mxu1 %v7834_v54  ;;  %4908 = vmatprep.subr.bf16.mxu0 %v7837_v57  ;;  %v7886_v53 = vld [vmem:[#allocation9 + $0xab0] ss:$36 sps:$4 sm:$0xff]   ;;  %v7889_v54 = vld [vmem:[#allocation9 + $0xab8] ss:$36 sps:$4 sm:$0xff]   ;;  %v7897_v57 = vld [vmem:[#allocation9 + $0xb04] ss:$36 sps:$4 sm:$0xff]  }
 0x19e   :  { %4694 = vmatpush1.bf16.msra.mxu1 %v7832_v63  ;;  %4909 = vmatpush1.bf16.msra.mxu0 %v7835_v1  ;;  %v7898_v63 = vld [vmem:[#allocation9 + $0xb40] ss:$36 sps:$4 sm:$0xff]   ;;  %v7901_v1 = vld [vmem:[#allocation9 + $0xb48] ss:$36 sps:$4 sm:$0xff]  }
 0x19f   :  { %4695 = vmatprep.subr.bf16.mxu1 %v7840_v3  ;;  %4910 = vmatprep.subr.bf16.mxu0 %v7843_v4  ;;  %v7906_v3 = vld [vmem:[#allocation9 + $0xb8c] ss:$36 sps:$4 sm:$0xff]   ;;  %v7909_v4 = vld [vmem:[#allocation9 + $0xb94] ss:$36 sps:$4 sm:$0xff]  }
 0x1a2   :  { %4696 = vmatpush1.bf16.msra.mxu1 %v7838_v6  ;;  %4911 = vmatpush1.bf16.msra.mxu0 %v7841_v7  ;;  %v7904_v6 = vld [vmem:[#allocation9 + $0xb88] ss:$36 sps:$4 sm:$0xff]   ;;  %v7907_v7 = vld [vmem:[#allocation9 + $0xb90] ss:$36 sps:$4 sm:$0xff]  }
 0x1a3   :  { %4697 = vmatprep.subr.bf16.mxu1 %v7846_v8  ;;  %4912 = vmatprep.subr.bf16.mxu0 %v7849_v9  ;;  %v7912_v8 = vld [vmem:[#allocation9 + $0xbd4] ss:$36 sps:$4 sm:$0xff]   ;;  %v7915_v9 = vld [vmem:[#allocation9 + $0xbdc] ss:$36 sps:$4 sm:$0xff]  }
 0x1a6   :  { %4698 = vmatpush1.bf16.msra.mxu1 %v7844_v10  ;;  %4913 = vmatpush1.bf16.msra.mxu0 %v7847_v11  ;;  %v7910_v10 = vld [vmem:[#allocation9 + $0xbd0] ss:$36 sps:$4 sm:$0xff]   ;;  %v7913_v11 = vld [vmem:[#allocation9 + $0xbd8] ss:$36 sps:$4 sm:$0xff]  }
 0x1a7   :  { %4710 = vmatprep.subr.bf16.mxu1 %v7852_v13  ;;  %4925 = vmatprep.subr.bf16.mxu0 %v7855_v29  ;;  %v7918_v13 = vld [vmem:[#allocation9 + $0xc1c] ss:$36 sps:$4 sm:$0xff]   ;;  %v7921_v29 = vld [vmem:[#allocation9 + $0xc24] ss:$36 sps:$4 sm:$0xff]  }
 0x1a9   :  { %4700 = vmatmul.mubr.bf16.vlgmr.msra.gmra.mrb[8].mxu1 %v9045_v14  ;;  %4915 = vmatmul.mubr.bf16.vlgmr.msra.gmra.mrb[12].mxu0 %v9045_v14 }
 0x1aa   :  { %4711 = vmatpush1.bf16.msra.mxu1 %v7850_v15  ;;  %4926 = vmatpush1.bf16.msra.mxu0 %v7853_v17  ;;  %v7916_v15 = vld [vmem:[#allocation9 + $0xc18] ss:$36 sps:$4 sm:$0xff]   ;;  %v7919_v17 = vld [vmem:[#allocation9 + $0xc20] ss:$36 sps:$4 sm:$0xff]  }
 0x1ab   :  { %4712 = vmatprep.subr.bf16.mxu1 %v7858_v18  ;;  %4927 = vmatprep.subr.bf16.mxu0 %v7861_v19  ;;  %v7924_v18 = vld [vmem:[#allocation9 + $0xc64] ss:$36 sps:$4 sm:$0xff]   ;;  %v7927_v19 = vld [vmem:[#allocation9 + $0xc6c] ss:$36 sps:$4 sm:$0xff]  }
 0x1ac   :  { %4742 = vmatprep.mubr.bf16.mxu1 %v9053_v37  ;;  %4957 = vmatprep.mubr.bf16.mxu0 %v9053_v37 }
 0x1ae   :  { %4713 = vmatpush1.bf16.msra.mxu1 %v7856_v22  ;;  %4928 = vmatpush1.bf16.msra.mxu0 %v7859_v23  ;;  %v7922_v22 = vld [vmem:[#allocation9 + $0xc60] ss:$36 sps:$4 sm:$0xff]   ;;  %v7925_v23 = vld [vmem:[#allocation9 + $0xc68] ss:$36 sps:$4 sm:$0xff]  }
 0x1af   :  { %4714 = vmatprep.subr.bf16.mxu1 %v7864_v24  ;;  %4929 = vmatprep.subr.bf16.mxu0 %v7867_v25  ;;  %v7930_v24 = vld [vmem:[#allocation9 + $0xcac] ss:$36 sps:$4 sm:$0xff]   ;;  %v7933_v25 = vld [vmem:[#allocation9 + $0xcb4] ss:$36 sps:$4 sm:$0xff]  }
 0x1b2   :  { %4715 = vmatpush1.bf16.msra.mxu1 %v7862_v26  ;;  %4930 = vmatpush1.bf16.msra.mxu0 %v7865_v27  ;;  %v7928_v26 = vld [vmem:[#allocation9 + $0xca8] ss:$36 sps:$4 sm:$0xff]   ;;  %v7931_v27 = vld [vmem:[#allocation9 + $0xcb0] ss:$36 sps:$4 sm:$0xff]  }
 0x1b3   :  { %4716 = vmatprep.subr.bf16.mxu1 %v7870_v34  ;;  %4931 = vmatprep.subr.bf16.mxu0 %v7873_v36  ;;  %v7936_v34 = vld [vmem:[#allocation9 + $0xcf4] ss:$36 sps:$4 sm:$0xff]   ;;  %v7939_v36 = vld [vmem:[#allocation9 + $0xcfc] ss:$36 sps:$4 sm:$0xff]  }
 0x1b6   :  { %4717 = vmatpush1.bf16.msra.mxu1 %v7868_v38  ;;  %4932 = vmatpush1.bf16.msra.mxu0 %v7871_v39  ;;  %v7934_v38 = vld [vmem:[#allocation9 + $0xcf0] ss:$36 sps:$4 sm:$0xff]   ;;  %v7937_v39 = vld [vmem:[#allocation9 + $0xcf8] ss:$36 sps:$4 sm:$0xff]  }
 0x1b7   :  { %4718 = vmatprep.subr.bf16.mxu1 %v7876_v41  ;;  %4933 = vmatprep.subr.bf16.mxu0 %v7879_v42  ;;  %v7942_v41 = vld [vmem:[#allocation9 + $0xd3c] ss:$36 sps:$4 sm:$0xff]   ;;  %v7945_v42 = vld [vmem:[#allocation9 + $0xd44] ss:$36 sps:$4 sm:$0xff]  }
 0x1ba   :  { %4719 = vmatpush1.bf16.msra.mxu1 %v7874_v43  ;;  %4934 = vmatpush1.bf16.msra.mxu0 %v7877_v45  ;;  %v7940_v43 = vld [vmem:[#allocation9 + $0xd38] ss:$36 sps:$4 sm:$0xff]   ;;  %v7943_v45 = vld [vmem:[#allocation9 + $0xd40] ss:$36 sps:$4 sm:$0xff]  }
 0x1bb   :  { %4720 = vmatprep.subr.bf16.mxu1 %v7882_v46  ;;  %4935 = vmatprep.subr.bf16.mxu0 %v7885_v47  ;;  %v7948_v46 = vld [vmem:[#allocation9 + $0xd84] ss:$36 sps:$4 sm:$0xff]   ;;  %v7951_v47 = vld [vmem:[#allocation9 + $0xd8c] ss:$36 sps:$4 sm:$0xff]  }
 0x1be   :  { %4721 = vmatpush1.bf16.msra.mxu1 %v7880_v48  ;;  %4936 = vmatpush1.bf16.msra.mxu0 %v7883_v49  ;;  %v7946_v48 = vld [vmem:[#allocation9 + $0xd80] ss:$36 sps:$4 sm:$0xff]   ;;  %v7949_v49 = vld [vmem:[#allocation9 + $0xd88] ss:$36 sps:$4 sm:$0xff]  }
 0x1bf   :  { %4722 = vmatprep.subr.bf16.mxu1 %v7888_v51  ;;  %4937 = vmatprep.subr.bf16.mxu0 %v7891_v52  ;;  %v7954_v51 = vld [vmem:[#allocation9 + $0xdcc] ss:$36 sps:$4 sm:$0xff]   ;;  %v7957_v52 = vld [vmem:[#allocation9 + $0xdd4] ss:$36 sps:$4 sm:$0xff]  }
 0x1c2   :  { %4723 = vmatpush1.bf16.msra.mxu1 %v7886_v53  ;;  %4938 = vmatpush1.bf16.msra.mxu0 %v7889_v54  ;;  %v7952_v53 = vld [vmem:[#allocation9 + $0xdc8] ss:$36 sps:$4 sm:$0xff]   ;;  %v7955_v54 = vld [vmem:[#allocation9 + $0xdd0] ss:$36 sps:$4 sm:$0xff]  }
 0x1c3   :  { %4724 = vmatprep.subr.bf16.mxu1 %v7894_v56  ;;  %4939 = vmatprep.subr.bf16.mxu0 %v7897_v57  ;;  %v7960_v56 = vld [vmem:[#allocation9 + $0xe14] ss:$36 sps:$4 sm:$0xff]   ;;  %v7963_v57 = vld [vmem:[#allocation9 + $0xe1c] ss:$36 sps:$4 sm:$0xff]  }
 0x1c6   :  { %4725 = vmatpush1.bf16.msra.mxu1 %v7892_v58  ;;  %4940 = vmatpush1.bf16.msra.mxu0 %v7895_v59  ;;  %v7958_v58 = vld [vmem:[#allocation9 + $0xe10] ss:$36 sps:$4 sm:$0xff]   ;;  %v7961_v59 = vld [vmem:[#allocation9 + $0xe18] ss:$36 sps:$4 sm:$0xff]  }
 0x1c7   :  { %4726 = vmatprep.subr.bf16.mxu1 %v7900_v60  ;;  %4941 = vmatprep.subr.bf16.mxu0 %v7903_v62  ;;  %v7966_v60 = vld [vmem:[#allocation9 + $0xe5c] ss:$36 sps:$4 sm:$0xff]   ;;  %v7969_v62 = vld [vmem:[#allocation9 + $0xe64] ss:$36 sps:$4 sm:$0xff]  }
 0x1ca   :  { %4727 = vmatpush1.bf16.msra.mxu1 %v7898_v63  ;;  %4942 = vmatpush1.bf16.msra.mxu0 %v7901_v1  ;;  %v7964_v63 = vld [vmem:[#allocation9 + $0xe58] ss:$36 sps:$4 sm:$0xff]   ;;  %v7967_v1 = vld [vmem:[#allocation9 + $0xe60] ss:$36 sps:$4 sm:$0xff]  }
 0x1cb   :  { %4728 = vmatprep.subr.bf16.mxu1 %v7906_v3  ;;  %4943 = vmatprep.subr.bf16.mxu0 %v7909_v4  ;;  %v7972_v3 = vld [vmem:[#allocation9 + $0xea4] ss:$36 sps:$4 sm:$0xff]   ;;  %v7975_v4 = vld [vmem:[#allocation9 + $0xeac] ss:$36 sps:$4 sm:$0xff]  }
 0x1ce   :  { %4729 = vmatpush1.bf16.msra.mxu1 %v7904_v6  ;;  %4944 = vmatpush1.bf16.msra.mxu0 %v7907_v7  ;;  %v7970_v6 = vld [vmem:[#allocation9 + $0xea0] ss:$36 sps:$4 sm:$0xff]   ;;  %v7973_v7 = vld [vmem:[#allocation9 + $0xea8] ss:$36 sps:$4 sm:$0xff]  }
 0x1cf   :  { %4730 = vmatprep.subr.bf16.mxu1 %v7912_v8  ;;  %4945 = vmatprep.subr.bf16.mxu0 %v7915_v9  ;;  %v7978_v8 = vld [vmem:[#allocation9 + $0xeec] ss:$36 sps:$4 sm:$0xff]   ;;  %v7981_v9 = vld [vmem:[#allocation9 + $0xef4] ss:$36 sps:$4 sm:$0xff]  }
 0x1d2   :  { %4731 = vmatpush1.bf16.msra.mxu1 %v7910_v10  ;;  %4946 = vmatpush1.bf16.msra.mxu0 %v7913_v11  ;;  %v7976_v10 = vld [vmem:[#allocation9 + $0xee8] ss:$36 sps:$4 sm:$0xff]   ;;  %v7979_v11 = vld [vmem:[#allocation9 + $0xef0] ss:$36 sps:$4 sm:$0xff]  }
 0x1d3   :  { %4732 = vmatprep.subr.bf16.mxu1 %v7918_v13  ;;  %4947 = vmatprep.subr.bf16.mxu0 %v7921_v29  ;;  %v7984_v13 = vld [vmem:[#allocation9 + $0xf34] ss:$36 sps:$4 sm:$0xff]   ;;  %v7987_v29 = vld [vmem:[#allocation9 + $0xf3c] ss:$36 sps:$4 sm:$0xff]  }
 0x1d6   :  { %4733 = vmatpush1.bf16.msra.mxu1 %v7916_v15  ;;  %4948 = vmatpush1.bf16.msra.mxu0 %v7919_v17  ;;  %v7982_v15 = vld [vmem:[#allocation9 + $0xf30] ss:$36 sps:$4 sm:$0xff]   ;;  %v7985_v17 = vld [vmem:[#allocation9 + $0xf38] ss:$36 sps:$4 sm:$0xff]  }
 0x1d7   :  { %4734 = vmatprep.subr.bf16.mxu1 %v7924_v18  ;;  %4949 = vmatprep.subr.bf16.mxu0 %v7927_v19  ;;  %v7990_v18 = vld [vmem:[#allocation9 + $0xf7c] ss:$36 sps:$4 sm:$0xff]   ;;  %v7993_v19 = vld [vmem:[#allocation9 + $0xf84] ss:$36 sps:$4 sm:$0xff]  }
 0x1da   :  { %4735 = vmatpush1.bf16.msra.mxu1 %v7922_v22  ;;  %4950 = vmatpush1.bf16.msra.mxu0 %v7925_v23  ;;  %v7988_v22 = vld [vmem:[#allocation9 + $0xf78] ss:$36 sps:$4 sm:$0xff]   ;;  %v7991_v23 = vld [vmem:[#allocation9 + $0xf80] ss:$36 sps:$4 sm:$0xff]  }
 0x1db   :  { %4736 = vmatprep.subr.bf16.mxu1 %v7930_v24  ;;  %4951 = vmatprep.subr.bf16.mxu0 %v7933_v25  ;;  %v7996_v24 = vld [vmem:[#allocation9 + $0xfc4] ss:$36 sps:$4 sm:$0xff]   ;;  %v7999_v25 = vld [vmem:[#allocation9 + $0xfcc] ss:$36 sps:$4 sm:$0xff]  }
 0x1de   :  { %4737 = vmatpush1.bf16.msra.mxu1 %v7928_v26  ;;  %4952 = vmatpush1.bf16.msra.mxu0 %v7931_v27  ;;  %v7994_v26 = vld [vmem:[#allocation9 + $0xfc0] ss:$36 sps:$4 sm:$0xff]   ;;  %v7997_v27 = vld [vmem:[#allocation9 + $0xfc8] ss:$36 sps:$4 sm:$0xff]  }
 0x1df   :  { %4738 = vmatprep.subr.bf16.mxu1 %v7936_v34  ;;  %4953 = vmatprep.subr.bf16.mxu0 %v7939_v36  ;;  %v8002_v34 = vld [vmem:[#allocation9 + $0x100c] ss:$36 sps:$4 sm:$0xff]   ;;  %v8005_v36 = vld [vmem:[#allocation9 + $0x1014] ss:$36 sps:$4 sm:$0xff]  }
 0x1e2   :  { %4739 = vmatpush1.bf16.msra.mxu1 %v7934_v38  ;;  %4954 = vmatpush1.bf16.msra.mxu0 %v7937_v39  ;;  %v8000_v38 = vld [vmem:[#allocation9 + $0x1008] ss:$36 sps:$4 sm:$0xff]   ;;  %v8003_v39 = vld [vmem:[#allocation9 + $0x1010] ss:$36 sps:$4 sm:$0xff]  }
 0x1e3   :  { %4740 = vmatprep.subr.bf16.mxu1 %v7942_v41  ;;  %4955 = vmatprep.subr.bf16.mxu0 %v7945_v42  ;;  %v8008_v41 = vld [vmem:[#allocation9 + $0x1054] ss:$36 sps:$4 sm:$0xff]   ;;  %v8011_v42 = vld [vmem:[#allocation9 + $0x105c] ss:$36 sps:$4 sm:$0xff]  }
 0x1e6   :  { %4741 = vmatpush1.bf16.msra.mxu1 %v7940_v43  ;;  %4956 = vmatpush1.bf16.msra.mxu0 %v7943_v45  ;;  %v8006_v43 = vld [vmem:[#allocation9 + $0x1050] ss:$36 sps:$4 sm:$0xff]   ;;  %v8009_v45 = vld [vmem:[#allocation9 + $0x1058] ss:$36 sps:$4 sm:$0xff]  }
 0x1e7   :  { %4753 = vmatprep.subr.bf16.mxu1 %v7948_v46  ;;  %4968 = vmatprep.subr.bf16.mxu0 %v7951_v47  ;;  %v8014_v46 = vld [vmem:[#allocation9 + $0x109c] ss:$36 sps:$4 sm:$0xff]   ;;  %v8017_v47 = vld [vmem:[#allocation9 + $0x10a4] ss:$36 sps:$4 sm:$0xff]  }
 0x1e9   :  { %4743 = vmatmul.mubr.bf16.vlgmr.msra.gmra.mrb[8].mxu1 %v9051_v32  ;;  %4958 = vmatmul.mubr.bf16.vlgmr.msra.gmra.mrb[12].mxu0 %v9051_v32 }
 0x1ea   :  { %4754 = vmatpush1.bf16.msra.mxu1 %v7946_v48  ;;  %4969 = vmatpush1.bf16.msra.mxu0 %v7949_v49  ;;  %v8012_v48 = vld [vmem:[#allocation9 + $0x1098] ss:$36 sps:$4 sm:$0xff]   ;;  %v8015_v49 = vld [vmem:[#allocation9 + $0x10a0] ss:$36 sps:$4 sm:$0xff]  }
 0x1eb   :  { %4755 = vmatprep.subr.bf16.mxu1 %v7954_v51  ;;  %4970 = vmatprep.subr.bf16.mxu0 %v7957_v52  ;;  %v8020_v51 = vld [vmem:[#allocation9 + $0x10e4] ss:$36 sps:$4 sm:$0xff]   ;;  %v8023_v52 = vld [vmem:[#allocation9 + $0x10ec] ss:$36 sps:$4 sm:$0xff]  }
 0x1ec   :  { %4785 = vmatprep.mubr.bf16.mxu1 %v9065_v16  ;;  %5000 = vmatprep.mubr.bf16.mxu0 %v9065_v16 }
 0x1ee   :  { %4756 = vmatpush1.bf16.msra.mxu1 %v7952_v53  ;;  %4971 = vmatpush1.bf16.msra.mxu0 %v7955_v54  ;;  %v8018_v53 = vld [vmem:[#allocation9 + $0x10e0] ss:$36 sps:$4 sm:$0xff]   ;;  %v8021_v54 = vld [vmem:[#allocation9 + $0x10e8] ss:$36 sps:$4 sm:$0xff]  }
 0x1ef   :  { %4757 = vmatprep.subr.bf16.mxu1 %v7960_v56  ;;  %4972 = vmatprep.subr.bf16.mxu0 %v7963_v57  ;;  %v8026_v56 = vld [vmem:[#allocation9 + $0x112c] ss:$36 sps:$4 sm:$0xff]   ;;  %v8029_v57 = vld [vmem:[#allocation9 + $0x1134] ss:$36 sps:$4 sm:$0xff]  }
 0x1f2   :  { %4758 = vmatpush1.bf16.msra.mxu1 %v7958_v58  ;;  %4973 = vmatpush1.bf16.msra.mxu0 %v7961_v59  ;;  %v8024_v58 = vld [vmem:[#allocation9 + $0x1128] ss:$36 sps:$4 sm:$0xff]   ;;  %v8027_v59 = vld [vmem:[#allocation9 + $0x1130] ss:$36 sps:$4 sm:$0xff]  }
 0x1f3   :  { %4759 = vmatprep.subr.bf16.mxu1 %v7966_v60  ;;  %4974 = vmatprep.subr.bf16.mxu0 %v7969_v62  ;;  %v8032_v60 = vld [vmem:[#allocation9 + $0x1174] ss:$36 sps:$4 sm:$0xff]   ;;  %v8035_v62 = vld [vmem:[#allocation9 + $0x117c] ss:$36 sps:$4 sm:$0xff]  }
 0x1f6   :  { %4760 = vmatpush1.bf16.msra.mxu1 %v7964_v63  ;;  %4975 = vmatpush1.bf16.msra.mxu0 %v7967_v1  ;;  %v8030_v63 = vld [vmem:[#allocation9 + $0x1170] ss:$36 sps:$4 sm:$0xff]   ;;  %v8033_v1 = vld [vmem:[#allocation9 + $0x1178] ss:$36 sps:$4 sm:$0xff]  }
 0x1f7   :  { %4761 = vmatprep.subr.bf16.mxu1 %v7972_v3  ;;  %4976 = vmatprep.subr.bf16.mxu0 %v7975_v4  ;;  %v8038_v3 = vld [vmem:[#allocation9 + $0x11bc] ss:$36 sps:$4 sm:$0xff]   ;;  %v8041_v4 = vld [vmem:[#allocation9 + $0x11c4] ss:$36 sps:$4 sm:$0xff]  }
 0x1fa   :  { %4762 = vmatpush1.bf16.msra.mxu1 %v7970_v6  ;;  %4977 = vmatpush1.bf16.msra.mxu0 %v7973_v7  ;;  %v8036_v6 = vld [vmem:[#allocation9 + $0x11b8] ss:$36 sps:$4 sm:$0xff]   ;;  %v8039_v7 = vld [vmem:[#allocation9 + $0x11c0] ss:$36 sps:$4 sm:$0xff]  }
 0x1fb   :  { %4763 = vmatprep.subr.bf16.mxu1 %v7978_v8  ;;  %4978 = vmatprep.subr.bf16.mxu0 %v7981_v9  ;;  %v8044_v8 = vld [vmem:[#allocation9 + $0x1204] ss:$36 sps:$4 sm:$0xff]   ;;  %v8047_v9 = vld [vmem:[#allocation9 + $0x120c] ss:$36 sps:$4 sm:$0xff]  }
 0x1fe   :  { %4764 = vmatpush1.bf16.msra.mxu1 %v7976_v10  ;;  %4979 = vmatpush1.bf16.msra.mxu0 %v7979_v11  ;;  %v8042_v10 = vld [vmem:[#allocation9 + $0x1200] ss:$36 sps:$4 sm:$0xff]   ;;  %v8045_v11 = vld [vmem:[#allocation9 + $0x1208] ss:$36 sps:$4 sm:$0xff]  }
 0x1ff   :  { %4765 = vmatprep.subr.bf16.mxu1 %v7984_v13  ;;  %4980 = vmatprep.subr.bf16.mxu0 %v7987_v29  ;;  %v8050_v13 = vld [vmem:[#allocation9 + $0x124c] ss:$36 sps:$4 sm:$0xff]   ;;  %v8053_v29 = vld [vmem:[#allocation9 + $0x1254] ss:$36 sps:$4 sm:$0xff]  }
 0x202   :  { %4766 = vmatpush1.bf16.msra.mxu1 %v7982_v15  ;;  %4981 = vmatpush1.bf16.msra.mxu0 %v7985_v17  ;;  %v8048_v15 = vld [vmem:[#allocation9 + $0x1248] ss:$36 sps:$4 sm:$0xff]   ;;  %v8051_v17 = vld [vmem:[#allocation9 + $0x1250] ss:$36 sps:$4 sm:$0xff]  }
 0x203   :  { %4767 = vmatprep.subr.bf16.mxu1 %v7990_v18  ;;  %4982 = vmatprep.subr.bf16.mxu0 %v7993_v19  ;;  %v8056_v18 = vld [vmem:[#allocation9 + $0x1294] ss:$36 sps:$4 sm:$0xff]   ;;  %v8059_v19 = vld [vmem:[#allocation9 + $0x129c] ss:$36 sps:$4 sm:$0xff]  }
 0x206   :  { %4768 = vmatpush1.bf16.msra.mxu1 %v7988_v22  ;;  %4983 = vmatpush1.bf16.msra.mxu0 %v7991_v23  ;;  %v8054_v22 = vld [vmem:[#allocation9 + $0x1290] ss:$36 sps:$4 sm:$0xff]   ;;  %v8057_v23 = vld [vmem:[#allocation9 + $0x1298] ss:$36 sps:$4 sm:$0xff]  }
 0x207   :  { %4769 = vmatprep.subr.bf16.mxu1 %v7996_v24  ;;  %4984 = vmatprep.subr.bf16.mxu0 %v7999_v25  ;;  %v8062_v24 = vld [vmem:[#allocation9 + $0x12dc] ss:$36 sps:$4 sm:$0xff]   ;;  %v8065_v25 = vld [vmem:[#allocation9 + $0x12e4] ss:$36 sps:$4 sm:$0xff]  }
 0x20a   :  { %4770 = vmatpush1.bf16.msra.mxu1 %v7994_v26  ;;  %4985 = vmatpush1.bf16.msra.mxu0 %v7997_v27  ;;  %v8060_v26 = vld [vmem:[#allocation9 + $0x12d8] ss:$36 sps:$4 sm:$0xff]   ;;  %v8063_v27 = vld [vmem:[#allocation9 + $0x12e0] ss:$36 sps:$4 sm:$0xff]  }
 0x20b   :  { %4771 = vmatprep.subr.bf16.mxu1 %v8002_v34  ;;  %4986 = vmatprep.subr.bf16.mxu0 %v8005_v36  ;;  %v8068_v34 = vld [vmem:[#allocation9 + $0x1324] ss:$36 sps:$4 sm:$0xff]   ;;  %v8071_v36 = vld [vmem:[#allocation9 + $0x132c] ss:$36 sps:$4 sm:$0xff]  }
 0x20e   :  { %4772 = vmatpush1.bf16.msra.mxu1 %v8000_v38  ;;  %4987 = vmatpush1.bf16.msra.mxu0 %v8003_v39  ;;  %v8066_v38 = vld [vmem:[#allocation9 + $0x1320] ss:$36 sps:$4 sm:$0xff]   ;;  %v8069_v39 = vld [vmem:[#allocation9 + $0x1328] ss:$36 sps:$4 sm:$0xff]  }
 0x20f   :  { %4773 = vmatprep.subr.bf16.mxu1 %v8008_v41  ;;  %4988 = vmatprep.subr.bf16.mxu0 %v8011_v42  ;;  %v8074_v41 = vld [vmem:[#allocation9 + $0x136c] ss:$36 sps:$4 sm:$0xff]   ;;  %v8077_v42 = vld [vmem:[#allocation9 + $0x1374] ss:$36 sps:$4 sm:$0xff]  }
 0x212   :  { %4774 = vmatpush1.bf16.msra.mxu1 %v8006_v43  ;;  %4989 = vmatpush1.bf16.msra.mxu0 %v8009_v45  ;;  %v8072_v43 = vld [vmem:[#allocation9 + $0x1368] ss:$36 sps:$4 sm:$0xff]   ;;  %v8075_v45 = vld [vmem:[#allocation9 + $0x1370] ss:$36 sps:$4 sm:$0xff]  }
 0x213   :  { %4775 = vmatprep.subr.bf16.mxu1 %v8014_v46  ;;  %4990 = vmatprep.subr.bf16.mxu0 %v8017_v47  ;;  %v8080_v46 = vld [vmem:[#allocation9 + $0x13b4] ss:$36 sps:$4 sm:$0xff]   ;;  %v8083_v47 = vld [vmem:[#allocation9 + $0x13bc] ss:$36 sps:$4 sm:$0xff]  }
 0x216   :  { %4776 = vmatpush1.bf16.msra.mxu1 %v8012_v48  ;;  %4991 = vmatpush1.bf16.msra.mxu0 %v8015_v49  ;;  %v8078_v48 = vld [vmem:[#allocation9 + $0x13b0] ss:$36 sps:$4 sm:$0xff]   ;;  %v8081_v49 = vld [vmem:[#allocation9 + $0x13b8] ss:$36 sps:$4 sm:$0xff]  }
 0x217   :  { %4777 = vmatprep.subr.bf16.mxu1 %v8020_v51  ;;  %4992 = vmatprep.subr.bf16.mxu0 %v8023_v52  ;;  %v8086_v51 = vld [vmem:[#allocation9 + $0x13fc] ss:$36 sps:$4 sm:$0xff]   ;;  %v8089_v52 = vld [vmem:[#allocation9 + $0x1404] ss:$36 sps:$4 sm:$0xff]  }
 0x21a   :  { %4778 = vmatpush1.bf16.msra.mxu1 %v8018_v53  ;;  %4993 = vmatpush1.bf16.msra.mxu0 %v8021_v54  ;;  %v8084_v53 = vld [vmem:[#allocation9 + $0x13f8] ss:$36 sps:$4 sm:$0xff]   ;;  %v8087_v54 = vld [vmem:[#allocation9 + $0x1400] ss:$36 sps:$4 sm:$0xff]  }
 0x21b   :  { %4779 = vmatprep.subr.bf16.mxu1 %v8026_v56  ;;  %4994 = vmatprep.subr.bf16.mxu0 %v8029_v57  ;;  %v8092_v56 = vld [vmem:[#allocation9 + $0x14] ss:$36 sps:$4 sm:$0xff]   ;;  %v8095_v57 = vld [vmem:[#allocation9 + $0x1c] ss:$36 sps:$4 sm:$0xff]  }
 0x21e   :  { %4780 = vmatpush1.bf16.msra.mxu1 %v8024_v58  ;;  %4995 = vmatpush1.bf16.msra.mxu0 %v8027_v59  ;;  %v8090_v58 = vld [vmem:[#allocation9 + $0x10] ss:$36 sps:$4 sm:$0xff]   ;;  %v8093_v59 = vld [vmem:[#allocation9 + $0x18] ss:$36 sps:$4 sm:$0xff]  }
 0x21f   :  { %4781 = vmatprep.subr.bf16.mxu1 %v8032_v60  ;;  %4996 = vmatprep.subr.bf16.mxu0 %v8035_v62  ;;  %v8098_v60 = vld [vmem:[#allocation9 + $0x5c] ss:$36 sps:$4 sm:$0xff]   ;;  %v8101_v62 = vld [vmem:[#allocation9 + $0x64] ss:$36 sps:$4 sm:$0xff]  }
 0x222   :  { %4782 = vmatpush1.bf16.msra.mxu1 %v8030_v63  ;;  %4997 = vmatpush1.bf16.msra.mxu0 %v8033_v1  ;;  %v8096_v63 = vld [vmem:[#allocation9 + $0x58] ss:$36 sps:$4 sm:$0xff]   ;;  %v8099_v1 = vld [vmem:[#allocation9 + $0x60] ss:$36 sps:$4 sm:$0xff]  }
 0x223   :  { %4783 = vmatprep.subr.bf16.mxu1 %v8038_v3  ;;  %4998 = vmatprep.subr.bf16.mxu0 %v8041_v4  ;;  %v8104_v3 = vld [vmem:[#allocation9 + $0xa4] ss:$36 sps:$4 sm:$0xff]   ;;  %v8107_v4 = vld [vmem:[#allocation9 + $0xac] ss:$36 sps:$4 sm:$0xff]  }
 0x226   :  { %4784 = vmatpush1.bf16.msra.mxu1 %v8036_v6  ;;  %4999 = vmatpush1.bf16.msra.mxu0 %v8039_v7  ;;  %v8102_v6 = vld [vmem:[#allocation9 + $0xa0] ss:$36 sps:$4 sm:$0xff]   ;;  %v8105_v7 = vld [vmem:[#allocation9 + $0xa8] ss:$36 sps:$4 sm:$0xff]  }
 0x227   :  { %4796 = vmatprep.subr.bf16.mxu1 %v8044_v8  ;;  %5011 = vmatprep.subr.bf16.mxu0 %v8047_v9  ;;  %v8110_v8 = vld [vmem:[#allocation9 + $0xec] ss:$36 sps:$4 sm:$0xff]   ;;  %v8113_v9 = vld [vmem:[#allocation9 + $0xf4] ss:$36 sps:$4 sm:$0xff]  }
 0x229   :  { %4786 = vmatmul.mubr.bf16.vlgmr.msra.gmra.mrb[8].mxu1 %v9063_v12  ;;  %5001 = vmatmul.mubr.bf16.vlgmr.msra.gmra.mrb[12].mxu0 %v9063_v12 }
 0x22a   :  { %4797 = vmatpush1.bf16.msra.mxu1 %v8042_v10  ;;  %5012 = vmatpush1.bf16.msra.mxu0 %v8045_v11  ;;  %v8108_v10 = vld [vmem:[#allocation9 + $0xe8] ss:$36 sps:$4 sm:$0xff]   ;;  %v8111_v11 = vld [vmem:[#allocation9 + $0xf0] ss:$36 sps:$4 sm:$0xff]  }
 0x22b   :  { %4798 = vmatprep.subr.bf16.mxu1 %v8050_v13  ;;  %5013 = vmatprep.subr.bf16.mxu0 %v8053_v29  ;;  %v8116_v13 = vld [vmem:[#allocation9 + $0x134] ss:$36 sps:$4 sm:$0xff]   ;;  %v8119_v29 = vld [vmem:[#allocation9 + $0x13c] ss:$36 sps:$4 sm:$0xff]  }
 0x22c   :  { %4828 = vmatprep.mubr.bf16.mxu1 %v8865_v0  ;;  %5043 = vmatprep.mubr.bf16.mxu0 %v8865_v0 }
 0x22e   :  { %4799 = vmatpush1.bf16.msra.mxu1 %v8048_v15  ;;  %5014 = vmatpush1.bf16.msra.mxu0 %v8051_v17  ;;  %v8114_v15 = vld [vmem:[#allocation9 + $0x130] ss:$36 sps:$4 sm:$0xff]   ;;  %v8117_v17 = vld [vmem:[#allocation9 + $0x138] ss:$36 sps:$4 sm:$0xff]  }
 0x22f   :  { %4800 = vmatprep.subr.bf16.mxu1 %v8056_v18  ;;  %5015 = vmatprep.subr.bf16.mxu0 %v8059_v19  ;;  %v8122_v18 = vld [vmem:[#allocation9 + $0x17c] ss:$36 sps:$4 sm:$0xff]   ;;  %v8125_v19 = vld [vmem:[#allocation9 + $0x184] ss:$36 sps:$4 sm:$0xff]  }
 0x232   :  { %4801 = vmatpush1.bf16.msra.mxu1 %v8054_v22  ;;  %5016 = vmatpush1.bf16.msra.mxu0 %v8057_v23  ;;  %v8120_v22 = vld [vmem:[#allocation9 + $0x178] ss:$36 sps:$4 sm:$0xff]   ;;  %v8123_v23 = vld [vmem:[#allocation9 + $0x180] ss:$36 sps:$4 sm:$0xff]  }
 0x233   :  { %4802 = vmatprep.subr.bf16.mxu1 %v8062_v24  ;;  %5017 = vmatprep.subr.bf16.mxu0 %v8065_v25  ;;  %v8128_v24 = vld [vmem:[#allocation9 + $0x1c4] ss:$36 sps:$4 sm:$0xff]   ;;  %v8131_v25 = vld [vmem:[#allocation9 + $0x1cc] ss:$36 sps:$4 sm:$0xff]  }
 0x236   :  { %4803 = vmatpush1.bf16.msra.mxu1 %v8060_v26  ;;  %5018 = vmatpush1.bf16.msra.mxu0 %v8063_v27  ;;  %v8126_v26 = vld [vmem:[#allocation9 + $0x1c0] ss:$36 sps:$4 sm:$0xff]   ;;  %v8129_v27 = vld [vmem:[#allocation9 + $0x1c8] ss:$36 sps:$4 sm:$0xff]  }
 0x237   :  { %4804 = vmatprep.subr.bf16.mxu1 %v8068_v34  ;;  %5019 = vmatprep.subr.bf16.mxu0 %v8071_v36  ;;  %v8134_v34 = vld [vmem:[#allocation9 + $0x20c] ss:$36 sps:$4 sm:$0xff]   ;;  %v8137_v36 = vld [vmem:[#allocation9 + $0x214] ss:$36 sps:$4 sm:$0xff]  }
 0x23a   :  { %4805 = vmatpush1.bf16.msra.mxu1 %v8066_v38  ;;  %5020 = vmatpush1.bf16.msra.mxu0 %v8069_v39  ;;  %v8132_v38 = vld [vmem:[#allocation9 + $0x208] ss:$36 sps:$4 sm:$0xff]   ;;  %v8135_v39 = vld [vmem:[#allocation9 + $0x210] ss:$36 sps:$4 sm:$0xff]  }
 0x23b   :  { %4806 = vmatprep.subr.bf16.mxu1 %v8074_v41  ;;  %5021 = vmatprep.subr.bf16.mxu0 %v8077_v42  ;;  %v8140_v41 = vld [vmem:[#allocation9 + $0x254] ss:$36 sps:$4 sm:$0xff]   ;;  %v8143_v42 = vld [vmem:[#allocation9 + $0x25c] ss:$36 sps:$4 sm:$0xff]  }
 0x23e   :  { %4807 = vmatpush1.bf16.msra.mxu1 %v8072_v43  ;;  %5022 = vmatpush1.bf16.msra.mxu0 %v8075_v45  ;;  %v8138_v43 = vld [vmem:[#allocation9 + $0x250] ss:$36 sps:$4 sm:$0xff]   ;;  %v8141_v45 = vld [vmem:[#allocation9 + $0x258] ss:$36 sps:$4 sm:$0xff]  }
 0x23f   :  { %4808 = vmatprep.subr.bf16.mxu1 %v8080_v46  ;;  %5023 = vmatprep.subr.bf16.mxu0 %v8083_v47  ;;  %v8146_v46 = vld [vmem:[#allocation9 + $0x29c] ss:$36 sps:$4 sm:$0xff]   ;;  %v8149_v47 = vld [vmem:[#allocation9 + $0x2a4] ss:$36 sps:$4 sm:$0xff]  }
 0x242   :  { %4809 = vmatpush1.bf16.msra.mxu1 %v8078_v48  ;;  %5024 = vmatpush1.bf16.msra.mxu0 %v8081_v49  ;;  %v8144_v48 = vld [vmem:[#allocation9 + $0x298] ss:$36 sps:$4 sm:$0xff]   ;;  %v8147_v49 = vld [vmem:[#allocation9 + $0x2a0] ss:$36 sps:$4 sm:$0xff]  }
 0x243   :  { %4810 = vmatprep.subr.bf16.mxu1 %v8086_v51  ;;  %5025 = vmatprep.subr.bf16.mxu0 %v8089_v52  ;;  %v8152_v51 = vld [vmem:[#allocation9 + $0x2e4] ss:$36 sps:$4 sm:$0xff]   ;;  %v8155_v52 = vld [vmem:[#allocation9 + $0x2ec] ss:$36 sps:$4 sm:$0xff]  }
 0x246   :  { %4811 = vmatpush1.bf16.msra.mxu1 %v8084_v53  ;;  %5026 = vmatpush1.bf16.msra.mxu0 %v8087_v54  ;;  %v8150_v53 = vld [vmem:[#allocation9 + $0x2e0] ss:$36 sps:$4 sm:$0xff]   ;;  %v8153_v54 = vld [vmem:[#allocation9 + $0x2e8] ss:$36 sps:$4 sm:$0xff]  }
 0x247   :  { %5054 = vmatprep.subr.bf16.mxu1 %v8092_v56  ;;  %5269 = vmatprep.subr.bf16.mxu0 %v8095_v57  ;;  %v8158_v56 = vld [vmem:[#allocation9 + $0x32c] ss:$36 sps:$4 sm:$0xff]   ;;  %v8161_v57 = vld [vmem:[#allocation9 + $0x334] ss:$36 sps:$4 sm:$0xff]  }
 0x249   :  { %4829 = vmatmul.mubr.bf16.vlgmr.msra.gmra.mrb[8].mxu1 %v9067_v5  ;;  %5044 = vmatmul.mubr.bf16.vlgmr.msra.gmra.mrb[12].mxu0 %v9067_v5 }
 0x24a   :  { %5055 = vmatpush1.bf16.msra.mxu1 %v8090_v58  ;;  %5086 = vmatprep.mubr.bf16.mxu1 %v9039_v2  ;;  %v8156_v58 = vld [vmem:[#allocation9 + $0x328] ss:$36 sps:$4 sm:$0xff]  }
 0x24b   :  { %5270 = vmatpush1.bf16.msra.mxu0 %v8093_v59  ;;  %5301 = vmatprep.mubr.bf16.mxu0 %v9039_v2  ;;  %v8159_v59 = vld [vmem:[#allocation9 + $0x330] ss:$36 sps:$4 sm:$0xff]  }
 0x24c   :  { %5056 = vmatprep.subr.bf16.mxu1 %v8098_v60  ;;  %5271 = vmatprep.subr.bf16.mxu0 %v8101_v62  ;;  %v8164_v60 = vld [vmem:[#allocation9 + $0x374] ss:$36 sps:$4 sm:$0xff]   ;;  %v8167_v62 = vld [vmem:[#allocation9 + $0x37c] ss:$36 sps:$4 sm:$0xff]  }
 0x24e   :  { %5057 = vmatpush1.bf16.msra.mxu1 %v8096_v63  ;;  %v8162_v63 = vld [vmem:[#allocation9 + $0x370] ss:$36 sps:$4 sm:$0xff]  }
 0x24f   :  { %5272 = vmatpush1.bf16.msra.mxu0 %v8099_v1  ;;  %5058 = vmatprep.subr.bf16.mxu1 %v8104_v3  ;;  %v8165_v1 = vld [vmem:[#allocation9 + $0x378] ss:$36 sps:$4 sm:$0xff]  }
 0x250   :  { %5273 = vmatprep.subr.bf16.mxu0 %v8107_v4  ;;  %v8170_v3 = vld [vmem:[#allocation9 + $0x3bc] ss:$36 sps:$4 sm:$0xff]   ;;  %v8173_v4 = vld [vmem:[#allocation9 + $0x3c4] ss:$36 sps:$4 sm:$0xff]  }
 0x252   :  { %5059 = vmatpush1.bf16.msra.mxu1 %v8102_v6  ;;  %v8168_v6 = vld [vmem:[#allocation9 + $0x3b8] ss:$36 sps:$4 sm:$0xff]  }
 0x253   :  { %5274 = vmatpush1.bf16.msra.mxu0 %v8105_v7  ;;  %5060 = vmatprep.subr.bf16.mxu1 %v8110_v8  ;;  %v8171_v7 = vld [vmem:[#allocation9 + $0x3c0] ss:$36 sps:$4 sm:$0xff]  }
 0x254   :  { %5275 = vmatprep.subr.bf16.mxu0 %v8113_v9  ;;  %v8176_v8 = vld [vmem:[#allocation9 + $0x404] ss:$36 sps:$4 sm:$0xff]   ;;  %v8179_v9 = vld [vmem:[#allocation9 + $0x40c] ss:$36 sps:$4 sm:$0xff]  }
 0x256   :  { %5061 = vmatpush1.bf16.msra.mxu1 %v8108_v10  ;;  %v8174_v10 = vld [vmem:[#allocation9 + $0x400] ss:$36 sps:$4 sm:$0xff]  }
 0x257   :  { %5276 = vmatpush1.bf16.msra.mxu0 %v8111_v11  ;;  %5062 = vmatprep.subr.bf16.mxu1 %v8116_v13  ;;  %v8177_v11 = vld [vmem:[#allocation9 + $0x408] ss:$36 sps:$4 sm:$0xff]  }
 0x258   :  { %5277 = vmatprep.subr.bf16.mxu0 %v8119_v29  ;;  %v8182_v13 = vld [vmem:[#allocation9 + $0x44c] ss:$36 sps:$4 sm:$0xff]   ;;  %v8185_v29 = vld [vmem:[#allocation9 + $0x454] ss:$36 sps:$4 sm:$0xff]  }
 0x25a   :  { %5063 = vmatpush1.bf16.msra.mxu1 %v8114_v15  ;;  %v8180_v15 = vld [vmem:[#allocation9 + $0x448] ss:$36 sps:$4 sm:$0xff]  }
 0x25b   :  { %5278 = vmatpush1.bf16.msra.mxu0 %v8117_v17  ;;  %5064 = vmatprep.subr.bf16.mxu1 %v8122_v18  ;;  %v8183_v17 = vld [vmem:[#allocation9 + $0x450] ss:$36 sps:$4 sm:$0xff]  }
 0x25c   :  { %5279 = vmatprep.subr.bf16.mxu0 %v8125_v19  ;;  %v8188_v18 = vld [vmem:[#allocation9 + $0x494] ss:$36 sps:$4 sm:$0xff]   ;;  %v8191_v19 = vld [vmem:[#allocation9 + $0x49c] ss:$36 sps:$4 sm:$0xff]  }
 0x25e   :  { %5065 = vmatpush1.bf16.msra.mxu1 %v8120_v22  ;;  %v8186_v22 = vld [vmem:[#allocation9 + $0x490] ss:$36 sps:$4 sm:$0xff]  }
 0x25f   :  { %5280 = vmatpush1.bf16.msra.mxu0 %v8123_v23  ;;  %5066 = vmatprep.subr.bf16.mxu1 %v8128_v24  ;;  %v8189_v23 = vld [vmem:[#allocation9 + $0x498] ss:$36 sps:$4 sm:$0xff]  }
 0x260   :  { %5281 = vmatprep.subr.bf16.mxu0 %v8131_v25  ;;  %v8194_v24 = vld [vmem:[#allocation9 + $0x4dc] ss:$36 sps:$4 sm:$0xff]   ;;  %v8197_v25 = vld [vmem:[#allocation9 + $0x4e4] ss:$36 sps:$4 sm:$0xff]  }
 0x262   :  { %5067 = vmatpush1.bf16.msra.mxu1 %v8126_v26  ;;  %v8192_v26 = vld [vmem:[#allocation9 + $0x4d8] ss:$36 sps:$4 sm:$0xff]  }
 0x263   :  { %5282 = vmatpush1.bf16.msra.mxu0 %v8129_v27  ;;  %5068 = vmatprep.subr.bf16.mxu1 %v8134_v34  ;;  %v8195_v27 = vld [vmem:[#allocation9 + $0x4e0] ss:$36 sps:$4 sm:$0xff]  }
 0x264   :  { %5283 = vmatprep.subr.bf16.mxu0 %v8137_v36  ;;  %v8200_v34 = vld [vmem:[#allocation9 + $0x524] ss:$36 sps:$4 sm:$0xff]   ;;  %v8203_v36 = vld [vmem:[#allocation9 + $0x52c] ss:$36 sps:$4 sm:$0xff]  }
 0x266   :  { %5069 = vmatpush1.bf16.msra.mxu1 %v8132_v38  ;;  %v8198_v38 = vld [vmem:[#allocation9 + $0x520] ss:$36 sps:$4 sm:$0xff]  }
 0x267   :  { %5284 = vmatpush1.bf16.msra.mxu0 %v8135_v39  ;;  %5070 = vmatprep.subr.bf16.mxu1 %v8140_v41  ;;  %v8201_v39 = vld [vmem:[#allocation9 + $0x528] ss:$36 sps:$4 sm:$0xff]  }
 0x268   :  { %5285 = vmatprep.subr.bf16.mxu0 %v8143_v42  ;;  %v8206_v41 = vld [vmem:[#allocation9 + $0x56c] ss:$36 sps:$4 sm:$0xff]   ;;  %v8209_v42 = vld [vmem:[#allocation9 + $0x574] ss:$36 sps:$4 sm:$0xff]  }
 0x26a   :  { %5071 = vmatpush1.bf16.msra.mxu1 %v8138_v43  ;;  %v8204_v43 = vld [vmem:[#allocation9 + $0x568] ss:$36 sps:$4 sm:$0xff]  }
 0x26b   :  { %5286 = vmatpush1.bf16.msra.mxu0 %v8141_v45  ;;  %5072 = vmatprep.subr.bf16.mxu1 %v8146_v46  ;;  %v8207_v45 = vld [vmem:[#allocation9 + $0x570] ss:$36 sps:$4 sm:$0xff]  }
 0x26c   :  { %5287 = vmatprep.subr.bf16.mxu0 %v8149_v47  ;;  %v8212_v46 = vld [vmem:[#allocation9 + $0x5b4] ss:$36 sps:$4 sm:$0xff]   ;;  %v8215_v47 = vld [vmem:[#allocation9 + $0x5bc] ss:$36 sps:$4 sm:$0xff]  }
 0x26e   :  { %5073 = vmatpush1.bf16.msra.mxu1 %v8144_v48  ;;  %v8210_v48 = vld [vmem:[#allocation9 + $0x5b0] ss:$36 sps:$4 sm:$0xff]  }
 0x26f   :  { %5288 = vmatpush1.bf16.msra.mxu0 %v8147_v49  ;;  %5074 = vmatprep.subr.bf16.mxu1 %v8152_v51  ;;  %v8213_v49 = vld [vmem:[#allocation9 + $0x5b8] ss:$36 sps:$4 sm:$0xff]  }
 0x270   :  { %5289 = vmatprep.subr.bf16.mxu0 %v8155_v52  ;;  %v8218_v51 = vld [vmem:[#allocation9 + $0x5fc] ss:$36 sps:$4 sm:$0xff]   ;;  %v8221_v52 = vld [vmem:[#allocation9 + $0x604] ss:$36 sps:$4 sm:$0xff]  }
 0x272   :  { %5075 = vmatpush1.bf16.msra.mxu1 %v8150_v53  ;;  %v8216_v53 = vld [vmem:[#allocation9 + $0x5f8] ss:$36 sps:$4 sm:$0xff]  }
 0x273   :  { %5290 = vmatpush1.bf16.msra.mxu0 %v8153_v54  ;;  %5076 = vmatprep.subr.bf16.mxu1 %v8158_v56  ;;  %v8219_v54 = vld [vmem:[#allocation9 + $0x600] ss:$36 sps:$4 sm:$0xff]  }
 0x274   :  { %5291 = vmatprep.subr.bf16.mxu0 %v8161_v57  ;;  %v8224_v56 = vld [vmem:[#allocation9 + $0x644] ss:$36 sps:$4 sm:$0xff]   ;;  %v8227_v57 = vld [vmem:[#allocation9 + $0x64c] ss:$36 sps:$4 sm:$0xff]  }
 0x276   :  { %5077 = vmatpush1.bf16.msra.mxu1 %v8156_v58  ;;  %v8222_v58 = vld [vmem:[#allocation9 + $0x640] ss:$36 sps:$4 sm:$0xff]  }
 0x277   :  { %5292 = vmatpush1.bf16.msra.mxu0 %v8159_v59  ;;  %5078 = vmatprep.subr.bf16.mxu1 %v8164_v60  ;;  %v8225_v59 = vld [vmem:[#allocation9 + $0x648] ss:$36 sps:$4 sm:$0xff]  }
 0x278   :  { %5293 = vmatprep.subr.bf16.mxu0 %v8167_v62  ;;  %v8230_v60 = vld [vmem:[#allocation9 + $0x68c] ss:$36 sps:$4 sm:$0xff]   ;;  %v8233_v62 = vld [vmem:[#allocation9 + $0x694] ss:$36 sps:$4 sm:$0xff]  }
 0x27a   :  { %5079 = vmatpush1.bf16.msra.mxu1 %v8162_v63  ;;  %v8228_v63 = vld [vmem:[#allocation9 + $0x688] ss:$36 sps:$4 sm:$0xff]  }
 0x27b   :  { %5294 = vmatpush1.bf16.msra.mxu0 %v8165_v1  ;;  %5080 = vmatprep.subr.bf16.mxu1 %v8170_v3  ;;  %v8231_v1 = vld [vmem:[#allocation9 + $0x690] ss:$36 sps:$4 sm:$0xff]  }
 0x27c   :  { %5295 = vmatprep.subr.bf16.mxu0 %v8173_v4  ;;  %v8236_v3 = vld [vmem:[#allocation9 + $0x6d4] ss:$36 sps:$4 sm:$0xff]   ;;  %v8239_v4 = vld [vmem:[#allocation9 + $0x6dc] ss:$36 sps:$4 sm:$0xff]  }
 0x27e   :  { %5081 = vmatpush1.bf16.msra.mxu1 %v8168_v6  ;;  %v8234_v6 = vld [vmem:[#allocation9 + $0x6d0] ss:$36 sps:$4 sm:$0xff]  }
 0x27f   :  { %5296 = vmatpush1.bf16.msra.mxu0 %v8171_v7  ;;  %5082 = vmatprep.subr.bf16.mxu1 %v8176_v8  ;;  %v8237_v7 = vld [vmem:[#allocation9 + $0x6d8] ss:$36 sps:$4 sm:$0xff]  }
 0x280   :  { %5297 = vmatprep.subr.bf16.mxu0 %v8179_v9  ;;  %v8242_v8 = vld [vmem:[#allocation9 + $0x71c] ss:$36 sps:$4 sm:$0xff]   ;;  %v8245_v9 = vld [vmem:[#allocation9 + $0x724] ss:$36 sps:$4 sm:$0xff]  }
 0x282   :  { %5083 = vmatpush1.bf16.msra.mxu1 %v8174_v10  ;;  %v8240_v10 = vld [vmem:[#allocation9 + $0x718] ss:$36 sps:$4 sm:$0xff]  }
 0x283   :  { %5298 = vmatpush1.bf16.msra.mxu0 %v8177_v11  ;;  %5084 = vmatprep.subr.bf16.mxu1 %v8182_v13  ;;  %v8243_v11 = vld [vmem:[#allocation9 + $0x720] ss:$36 sps:$4 sm:$0xff]  }
 0x284   :  { %5299 = vmatprep.subr.bf16.mxu0 %v8185_v29  ;;  %v8248_v13 = vld [vmem:[#allocation9 + $0x764] ss:$36 sps:$4 sm:$0xff]   ;;  %v8251_v29 = vld [vmem:[#allocation9 + $0x76c] ss:$36 sps:$4 sm:$0xff]  }
 0x286   :  { %5085 = vmatpush1.bf16.msra.mxu1 %v8180_v15  ;;  %v8246_v15 = vld [vmem:[#allocation9 + $0x760] ss:$36 sps:$4 sm:$0xff]  }
 0x287   :  { %5300 = vmatpush1.bf16.msra.mxu0 %v8183_v17  ;;  %5097 = vmatprep.subr.bf16.mxu1 %v8188_v18  ;;  %v8249_v17 = vld [vmem:[#allocation9 + $0x768] ss:$36 sps:$4 sm:$0xff]  }
 0x288   :  { %5312 = vmatprep.subr.bf16.mxu0 %v8191_v19  ;;  %v8254_v18 = vld [vmem:[#allocation9 + $0x7ac] ss:$36 sps:$4 sm:$0xff]   ;;  %v8257_v19 = vld [vmem:[#allocation9 + $0x7b4] ss:$36 sps:$4 sm:$0xff]  }
 0x289   :  { %5087 = vmatmul.mubr.bf16.vlgmr.msra.gmra.mrb[12].mxu1 %v9037_v61 }
 0x28a   :  { %5302 = vmatmul.mubr.bf16.vlgmr.msra.gmra.mrb[16].mxu0 %v9037_v61  ;;  %5098 = vmatpush1.bf16.msra.mxu1 %v8186_v22  ;;  %v8252_v22 = vld [vmem:[#allocation9 + $0x7a8] ss:$36 sps:$4 sm:$0xff]  }
 0x28b   :  { %5129 = vmatprep.mubr.bf16.mxu1 %v9047_v20  ;;  %5313 = vmatpush1.bf16.msra.mxu0 %v8189_v23  ;;  %v8255_v23 = vld [vmem:[#allocation9 + $0x7b0] ss:$36 sps:$4 sm:$0xff]  }
 0x28c   :  { %5344 = vmatprep.mubr.bf16.mxu0 %v9047_v20  ;;  %5099 = vmatprep.subr.bf16.mxu1 %v8194_v24  ;;  %v8260_v24 = vld [vmem:[#allocation9 + $0x7f4] ss:$36 sps:$4 sm:$0xff]  }
 0x28d   :  { %5314 = vmatprep.subr.bf16.mxu0 %v8197_v25  ;;  %v8263_v25 = vld [vmem:[#allocation9 + $0x7fc] ss:$36 sps:$4 sm:$0xff]  }
 0x28e   :  { %5100 = vmatpush1.bf16.msra.mxu1 %v8192_v26  ;;  %v8258_v26 = vld [vmem:[#allocation9 + $0x7f0] ss:$36 sps:$4 sm:$0xff]  }
 0x28f   :  { %5315 = vmatpush1.bf16.msra.mxu0 %v8195_v27  ;;  %5101 = vmatprep.subr.bf16.mxu1 %v8200_v34  ;;  %v8261_v27 = vld [vmem:[#allocation9 + $0x7f8] ss:$36 sps:$4 sm:$0xff]  }
 0x290   :  { %5316 = vmatprep.subr.bf16.mxu0 %v8203_v36  ;;  %v8266_v34 = vld [vmem:[#allocation9 + $0x83c] ss:$36 sps:$4 sm:$0xff]   ;;  %v8269_v36 = vld [vmem:[#allocation9 + $0x844] ss:$36 sps:$4 sm:$0xff]  }
 0x292   :  { %5102 = vmatpush1.bf16.msra.mxu1 %v8198_v38  ;;  %v8264_v38 = vld [vmem:[#allocation9 + $0x838] ss:$36 sps:$4 sm:$0xff]  }
 0x293   :  { %5317 = vmatpush1.bf16.msra.mxu0 %v8201_v39  ;;  %5103 = vmatprep.subr.bf16.mxu1 %v8206_v41  ;;  %v8267_v39 = vld [vmem:[#allocation9 + $0x840] ss:$36 sps:$4 sm:$0xff]  }
 0x294   :  { %5318 = vmatprep.subr.bf16.mxu0 %v8209_v42  ;;  %v8272_v41 = vld [vmem:[#allocation9 + $0x884] ss:$36 sps:$4 sm:$0xff]   ;;  %v8275_v42 = vld [vmem:[#allocation9 + $0x88c] ss:$36 sps:$4 sm:$0xff]  }
 0x296   :  { %5104 = vmatpush1.bf16.msra.mxu1 %v8204_v43  ;;  %v8270_v43 = vld [vmem:[#allocation9 + $0x880] ss:$36 sps:$4 sm:$0xff]  }
 0x297   :  { %5319 = vmatpush1.bf16.msra.mxu0 %v8207_v45  ;;  %5105 = vmatprep.subr.bf16.mxu1 %v8212_v46  ;;  %v8273_v45 = vld [vmem:[#allocation9 + $0x888] ss:$36 sps:$4 sm:$0xff]  }
 0x298   :  { %5320 = vmatprep.subr.bf16.mxu0 %v8215_v47  ;;  %v8278_v46 = vld [vmem:[#allocation9 + $0x8cc] ss:$36 sps:$4 sm:$0xff]   ;;  %v8281_v47 = vld [vmem:[#allocation9 + $0x8d4] ss:$36 sps:$4 sm:$0xff]  }
 0x29a   :  { %5106 = vmatpush1.bf16.msra.mxu1 %v8210_v48  ;;  %v8276_v48 = vld [vmem:[#allocation9 + $0x8c8] ss:$36 sps:$4 sm:$0xff]  }
 0x29b   :  { %5321 = vmatpush1.bf16.msra.mxu0 %v8213_v49  ;;  %5107 = vmatprep.subr.bf16.mxu1 %v8218_v51  ;;  %v8279_v49 = vld [vmem:[#allocation9 + $0x8d0] ss:$36 sps:$4 sm:$0xff]  }
 0x29c   :  { %5322 = vmatprep.subr.bf16.mxu0 %v8221_v52  ;;  %v8284_v51 = vld [vmem:[#allocation9 + $0x914] ss:$36 sps:$4 sm:$0xff]   ;;  %v8287_v52 = vld [vmem:[#allocation9 + $0x91c] ss:$36 sps:$4 sm:$0xff]  }
 0x29e   :  { %5108 = vmatpush1.bf16.msra.mxu1 %v8216_v53  ;;  %v8282_v53 = vld [vmem:[#allocation9 + $0x910] ss:$36 sps:$4 sm:$0xff]  }
 0x29f   :  { %5323 = vmatpush1.bf16.msra.mxu0 %v8219_v54  ;;  %5109 = vmatprep.subr.bf16.mxu1 %v8224_v56  ;;  %v8285_v54 = vld [vmem:[#allocation9 + $0x918] ss:$36 sps:$4 sm:$0xff]  }
 0x2a0   :  { %5324 = vmatprep.subr.bf16.mxu0 %v8227_v57  ;;  %v8290_v56 = vld [vmem:[#allocation9 + $0x95c] ss:$36 sps:$4 sm:$0xff]   ;;  %v8293_v57 = vld [vmem:[#allocation9 + $0x964] ss:$36 sps:$4 sm:$0xff]  }
 0x2a2   :  { %5110 = vmatpush1.bf16.msra.mxu1 %v8222_v58  ;;  %v8288_v58 = vld [vmem:[#allocation9 + $0x958] ss:$36 sps:$4 sm:$0xff]  }
 0x2a3   :  { %5325 = vmatpush1.bf16.msra.mxu0 %v8225_v59  ;;  %5111 = vmatprep.subr.bf16.mxu1 %v8230_v60  ;;  %v8291_v59 = vld [vmem:[#allocation9 + $0x960] ss:$36 sps:$4 sm:$0xff]  }
 0x2a4   :  { %5326 = vmatprep.subr.bf16.mxu0 %v8233_v62  ;;  %v8296_v60 = vld [vmem:[#allocation9 + $0x9a4] ss:$36 sps:$4 sm:$0xff]   ;;  %v8299_v62 = vld [vmem:[#allocation9 + $0x9ac] ss:$36 sps:$4 sm:$0xff]  }
 0x2a6   :  { %5112 = vmatpush1.bf16.msra.mxu1 %v8228_v63  ;;  %v8294_v63 = vld [vmem:[#allocation9 + $0x9a0] ss:$36 sps:$4 sm:$0xff]  }
 0x2a7   :  { %5327 = vmatpush1.bf16.msra.mxu0 %v8231_v1  ;;  %5113 = vmatprep.subr.bf16.mxu1 %v8236_v3  ;;  %v8297_v1 = vld [vmem:[#allocation9 + $0x9a8] ss:$36 sps:$4 sm:$0xff]  }
 0x2a8   :  { %5328 = vmatprep.subr.bf16.mxu0 %v8239_v4  ;;  %v8302_v3 = vld [vmem:[#allocation9 + $0x9ec] ss:$36 sps:$4 sm:$0xff]   ;;  %v8305_v4 = vld [vmem:[#allocation9 + $0x9f4] ss:$36 sps:$4 sm:$0xff]  }
 0x2aa   :  { %5114 = vmatpush1.bf16.msra.mxu1 %v8234_v6  ;;  %v8300_v6 = vld [vmem:[#allocation9 + $0x9e8] ss:$36 sps:$4 sm:$0xff]  }
 0x2ab   :  { %5329 = vmatpush1.bf16.msra.mxu0 %v8237_v7  ;;  %5115 = vmatprep.subr.bf16.mxu1 %v8242_v8  ;;  %v8303_v7 = vld [vmem:[#allocation9 + $0x9f0] ss:$36 sps:$4 sm:$0xff]  }
 0x2ac   :  { %5330 = vmatprep.subr.bf16.mxu0 %v8245_v9  ;;  %v8308_v8 = vld [vmem:[#allocation9 + $0xa34] ss:$36 sps:$4 sm:$0xff]   ;;  %v8311_v9 = vld [vmem:[#allocation9 + $0xa3c] ss:$36 sps:$4 sm:$0xff]  }
 0x2ae   :  { %5116 = vmatpush1.bf16.msra.mxu1 %v8240_v10  ;;  %v8306_v10 = vld [vmem:[#allocation9 + $0xa30] ss:$36 sps:$4 sm:$0xff]  }
 0x2af   :  { %5331 = vmatpush1.bf16.msra.mxu0 %v8243_v11  ;;  %5117 = vmatprep.subr.bf16.mxu1 %v8248_v13  ;;  %v8309_v11 = vld [vmem:[#allocation9 + $0xa38] ss:$36 sps:$4 sm:$0xff]  }
 0x2b0   :  { %5332 = vmatprep.subr.bf16.mxu0 %v8251_v29  ;;  %v8314_v13 = vld [vmem:[#allocation9 + $0xa7c] ss:$36 sps:$4 sm:$0xff]   ;;  %v8317_v29 = vld [vmem:[#allocation9 + $0xa84] ss:$36 sps:$4 sm:$0xff]  }
 0x2b2   :  { %5118 = vmatpush1.bf16.msra.mxu1 %v8246_v15  ;;  %v8312_v15 = vld [vmem:[#allocation9 + $0xa78] ss:$36 sps:$4 sm:$0xff]  }
 0x2b3   :  { %5333 = vmatpush1.bf16.msra.mxu0 %v8249_v17  ;;  %5119 = vmatprep.subr.bf16.mxu1 %v8254_v18  ;;  %v8315_v17 = vld [vmem:[#allocation9 + $0xa80] ss:$36 sps:$4 sm:$0xff]  }
 0x2b4   :  { %5334 = vmatprep.subr.bf16.mxu0 %v8257_v19  ;;  %v8320_v18 = vld [vmem:[#allocation9 + $0xac4] ss:$36 sps:$4 sm:$0xff]   ;;  %v8323_v19 = vld [vmem:[#allocation9 + $0xacc] ss:$36 sps:$4 sm:$0xff]  }
 0x2b6   :  { %5120 = vmatpush1.bf16.msra.mxu1 %v8252_v22  ;;  %v8318_v22 = vld [vmem:[#allocation9 + $0xac0] ss:$36 sps:$4 sm:$0xff]  }
 0x2b7   :  { %5335 = vmatpush1.bf16.msra.mxu0 %v8255_v23  ;;  %5121 = vmatprep.subr.bf16.mxu1 %v8260_v24  ;;  %v8321_v23 = vld [vmem:[#allocation9 + $0xac8] ss:$36 sps:$4 sm:$0xff]  }
 0x2b8   :  { %5336 = vmatprep.subr.bf16.mxu0 %v8263_v25  ;;  %v8326_v24 = vld [vmem:[#allocation9 + $0xb0c] ss:$36 sps:$4 sm:$0xff]   ;;  %v8329_v25 = vld [vmem:[#allocation9 + $0xb14] ss:$36 sps:$4 sm:$0xff]  }
 0x2ba   :  { %5122 = vmatpush1.bf16.msra.mxu1 %v8258_v26  ;;  %v8324_v26 = vld [vmem:[#allocation9 + $0xb08] ss:$36 sps:$4 sm:$0xff]  }
 0x2bb   :  { %5337 = vmatpush1.bf16.msra.mxu0 %v8261_v27  ;;  %5123 = vmatprep.subr.bf16.mxu1 %v8266_v34  ;;  %v8327_v27 = vld [vmem:[#allocation9 + $0xb10] ss:$36 sps:$4 sm:$0xff]  }
 0x2bc   :  { %5338 = vmatprep.subr.bf16.mxu0 %v8269_v36  ;;  %v8332_v34 = vld [vmem:[#allocation9 + $0xb54] ss:$36 sps:$4 sm:$0xff]   ;;  %v8335_v36 = vld [vmem:[#allocation9 + $0xb5c] ss:$36 sps:$4 sm:$0xff]  }
 0x2be   :  { %5124 = vmatpush1.bf16.msra.mxu1 %v8264_v38  ;;  %v8330_v38 = vld [vmem:[#allocation9 + $0xb50] ss:$36 sps:$4 sm:$0xff]  }
 0x2bf   :  { %5339 = vmatpush1.bf16.msra.mxu0 %v8267_v39  ;;  %5125 = vmatprep.subr.bf16.mxu1 %v8272_v41  ;;  %v8333_v39 = vld [vmem:[#allocation9 + $0xb58] ss:$36 sps:$4 sm:$0xff]  }
 0x2c0   :  { %5340 = vmatprep.subr.bf16.mxu0 %v8275_v42  ;;  %v8338_v41 = vld [vmem:[#allocation9 + $0xb9c] ss:$36 sps:$4 sm:$0xff]   ;;  %v8341_v42 = vld [vmem:[#allocation9 + $0xba4] ss:$36 sps:$4 sm:$0xff]  }
 0x2c2   :  { %5126 = vmatpush1.bf16.msra.mxu1 %v8270_v43  ;;  %v8336_v43 = vld [vmem:[#allocation9 + $0xb98] ss:$36 sps:$4 sm:$0xff]  }
 0x2c3   :  { %5341 = vmatpush1.bf16.msra.mxu0 %v8273_v45  ;;  %5127 = vmatprep.subr.bf16.mxu1 %v8278_v46  ;;  %v8339_v45 = vld [vmem:[#allocation9 + $0xba0] ss:$36 sps:$4 sm:$0xff]  }
 0x2c4   :  { %5342 = vmatprep.subr.bf16.mxu0 %v8281_v47  ;;  %v8344_v46 = vld [vmem:[#allocation9 + $0xbe4] ss:$36 sps:$4 sm:$0xff]   ;;  %v8347_v47 = vld [vmem:[#allocation9 + $0xbec] ss:$36 sps:$4 sm:$0xff]  }
 0x2c6   :  { %5128 = vmatpush1.bf16.msra.mxu1 %v8276_v48  ;;  %v8342_v48 = vld [vmem:[#allocation9 + $0xbe0] ss:$36 sps:$4 sm:$0xff]  }
 0x2c7   :  { %5343 = vmatpush1.bf16.msra.mxu0 %v8279_v49  ;;  %5140 = vmatprep.subr.bf16.mxu1 %v8284_v51  ;;  %v8345_v49 = vld [vmem:[#allocation9 + $0xbe8] ss:$36 sps:$4 sm:$0xff]  }
 0x2c8   :  { %5355 = vmatprep.subr.bf16.mxu0 %v8287_v52  ;;  %v8350_v51 = vld [vmem:[#allocation9 + $0xc2c] ss:$36 sps:$4 sm:$0xff]   ;;  %v8353_v52 = vld [vmem:[#allocation9 + $0xc34] ss:$36 sps:$4 sm:$0xff]  }
 0x2c9   :  { %5130 = vmatmul.mubr.bf16.vlgmr.msra.gmra.mrb[12].mxu1 %v9045_v14 }
 0x2ca   :  { %5345 = vmatmul.mubr.bf16.vlgmr.msra.gmra.mrb[16].mxu0 %v9045_v14  ;;  %5141 = vmatpush1.bf16.msra.mxu1 %v8282_v53  ;;  %v8348_v53 = vld [vmem:[#allocation9 + $0xc28] ss:$36 sps:$4 sm:$0xff]  }
 0x2cb   :  { %5172 = vmatprep.mubr.bf16.mxu1 %v9053_v37  ;;  %5356 = vmatpush1.bf16.msra.mxu0 %v8285_v54  ;;  %v8351_v54 = vld [vmem:[#allocation9 + $0xc30] ss:$36 sps:$4 sm:$0xff]  }
 0x2cc   :  { %5387 = vmatprep.mubr.bf16.mxu0 %v9053_v37  ;;  %5142 = vmatprep.subr.bf16.mxu1 %v8290_v56  ;;  %v8356_v56 = vld [vmem:[#allocation9 + $0xc74] ss:$36 sps:$4 sm:$0xff]  }
 0x2cd   :  { %5357 = vmatprep.subr.bf16.mxu0 %v8293_v57  ;;  %v8359_v57 = vld [vmem:[#allocation9 + $0xc7c] ss:$36 sps:$4 sm:$0xff]  }
 0x2ce   :  { %5143 = vmatpush1.bf16.msra.mxu1 %v8288_v58  ;;  %v8354_v58 = vld [vmem:[#allocation9 + $0xc70] ss:$36 sps:$4 sm:$0xff]  }
 0x2cf   :  { %5358 = vmatpush1.bf16.msra.mxu0 %v8291_v59  ;;  %5144 = vmatprep.subr.bf16.mxu1 %v8296_v60  ;;  %v8357_v59 = vld [vmem:[#allocation9 + $0xc78] ss:$36 sps:$4 sm:$0xff]  }
 0x2d0   :  { %5359 = vmatprep.subr.bf16.mxu0 %v8299_v62  ;;  %v8362_v60 = vld [vmem:[#allocation9 + $0xcbc] ss:$36 sps:$4 sm:$0xff]   ;;  %v8365_v62 = vld [vmem:[#allocation9 + $0xcc4] ss:$36 sps:$4 sm:$0xff]  }
 0x2d2   :  { %5145 = vmatpush1.bf16.msra.mxu1 %v8294_v63  ;;  %v8360_v63 = vld [vmem:[#allocation9 + $0xcb8] ss:$36 sps:$4 sm:$0xff]  }
 0x2d3   :  { %5360 = vmatpush1.bf16.msra.mxu0 %v8297_v1  ;;  %5146 = vmatprep.subr.bf16.mxu1 %v8302_v3  ;;  %v8363_v1 = vld [vmem:[#allocation9 + $0xcc0] ss:$36 sps:$4 sm:$0xff]  }
 0x2d4   :  { %5361 = vmatprep.subr.bf16.mxu0 %v8305_v4  ;;  %v8368_v3 = vld [vmem:[#allocation9 + $0xd04] ss:$36 sps:$4 sm:$0xff]   ;;  %v8371_v4 = vld [vmem:[#allocation9 + $0xd0c] ss:$36 sps:$4 sm:$0xff]  }
 0x2d6   :  { %5147 = vmatpush1.bf16.msra.mxu1 %v8300_v6  ;;  %v8366_v6 = vld [vmem:[#allocation9 + $0xd00] ss:$36 sps:$4 sm:$0xff]  }
 0x2d7   :  { %5362 = vmatpush1.bf16.msra.mxu0 %v8303_v7  ;;  %5148 = vmatprep.subr.bf16.mxu1 %v8308_v8  ;;  %v8369_v7 = vld [vmem:[#allocation9 + $0xd08] ss:$36 sps:$4 sm:$0xff]  }
 0x2d8   :  { %5363 = vmatprep.subr.bf16.mxu0 %v8311_v9  ;;  %v8374_v8 = vld [vmem:[#allocation9 + $0xd4c] ss:$36 sps:$4 sm:$0xff]   ;;  %v8377_v9 = vld [vmem:[#allocation9 + $0xd54] ss:$36 sps:$4 sm:$0xff]  }
 0x2da   :  { %5149 = vmatpush1.bf16.msra.mxu1 %v8306_v10  ;;  %v8372_v10 = vld [vmem:[#allocation9 + $0xd48] ss:$36 sps:$4 sm:$0xff]  }
 0x2db   :  { %5364 = vmatpush1.bf16.msra.mxu0 %v8309_v11  ;;  %5150 = vmatprep.subr.bf16.mxu1 %v8314_v13  ;;  %v8375_v11 = vld [vmem:[#allocation9 + $0xd50] ss:$36 sps:$4 sm:$0xff]  }
 0x2dc   :  { %5365 = vmatprep.subr.bf16.mxu0 %v8317_v29  ;;  %v8380_v13 = vld [vmem:[#allocation9 + $0xd94] ss:$36 sps:$4 sm:$0xff]   ;;  %v8383_v29 = vld [vmem:[#allocation9 + $0xd9c] ss:$36 sps:$4 sm:$0xff]  }
 0x2de   :  { %5151 = vmatpush1.bf16.msra.mxu1 %v8312_v15  ;;  %v8378_v15 = vld [vmem:[#allocation9 + $0xd90] ss:$36 sps:$4 sm:$0xff]  }
 0x2df   :  { %5366 = vmatpush1.bf16.msra.mxu0 %v8315_v17  ;;  %5152 = vmatprep.subr.bf16.mxu1 %v8320_v18  ;;  %v8381_v17 = vld [vmem:[#allocation9 + $0xd98] ss:$36 sps:$4 sm:$0xff]  }
 0x2e0   :  { %5367 = vmatprep.subr.bf16.mxu0 %v8323_v19  ;;  %v8386_v18 = vld [vmem:[#allocation9 + $0xddc] ss:$36 sps:$4 sm:$0xff]   ;;  %v8389_v19 = vld [vmem:[#allocation9 + $0xde4] ss:$36 sps:$4 sm:$0xff]  }
 0x2e2   :  { %5153 = vmatpush1.bf16.msra.mxu1 %v8318_v22  ;;  %v8384_v22 = vld [vmem:[#allocation9 + $0xdd8] ss:$36 sps:$4 sm:$0xff]  }
 0x2e3   :  { %5368 = vmatpush1.bf16.msra.mxu0 %v8321_v23  ;;  %5154 = vmatprep.subr.bf16.mxu1 %v8326_v24  ;;  %v8387_v23 = vld [vmem:[#allocation9 + $0xde0] ss:$36 sps:$4 sm:$0xff]  }
 0x2e4   :  { %5369 = vmatprep.subr.bf16.mxu0 %v8329_v25  ;;  %v8392_v24 = vld [vmem:[#allocation9 + $0xe24] ss:$36 sps:$4 sm:$0xff]   ;;  %v8395_v25 = vld [vmem:[#allocation9 + $0xe2c] ss:$36 sps:$4 sm:$0xff]  }
 0x2e6   :  { %5155 = vmatpush1.bf16.msra.mxu1 %v8324_v26  ;;  %v8390_v26 = vld [vmem:[#allocation9 + $0xe20] ss:$36 sps:$4 sm:$0xff]  }
 0x2e7   :  { %5370 = vmatpush1.bf16.msra.mxu0 %v8327_v27  ;;  %5156 = vmatprep.subr.bf16.mxu1 %v8332_v34  ;;  %v8393_v27 = vld [vmem:[#allocation9 + $0xe28] ss:$36 sps:$4 sm:$0xff]  }
 0x2e8   :  { %5371 = vmatprep.subr.bf16.mxu0 %v8335_v36  ;;  %v8398_v34 = vld [vmem:[#allocation9 + $0xe6c] ss:$36 sps:$4 sm:$0xff]   ;;  %v8401_v36 = vld [vmem:[#allocation9 + $0xe74] ss:$36 sps:$4 sm:$0xff]  }
 0x2ea   :  { %5157 = vmatpush1.bf16.msra.mxu1 %v8330_v38  ;;  %v8396_v38 = vld [vmem:[#allocation9 + $0xe68] ss:$36 sps:$4 sm:$0xff]  }
 0x2eb   :  { %5372 = vmatpush1.bf16.msra.mxu0 %v8333_v39  ;;  %5158 = vmatprep.subr.bf16.mxu1 %v8338_v41  ;;  %v8399_v39 = vld [vmem:[#allocation9 + $0xe70] ss:$36 sps:$4 sm:$0xff]  }
 0x2ec   :  { %5373 = vmatprep.subr.bf16.mxu0 %v8341_v42  ;;  %v8404_v41 = vld [vmem:[#allocation9 + $0xeb4] ss:$36 sps:$4 sm:$0xff]   ;;  %v8407_v42 = vld [vmem:[#allocation9 + $0xebc] ss:$36 sps:$4 sm:$0xff]  }
 0x2ee   :  { %5159 = vmatpush1.bf16.msra.mxu1 %v8336_v43  ;;  %v8402_v43 = vld [vmem:[#allocation9 + $0xeb0] ss:$36 sps:$4 sm:$0xff]  }
 0x2ef   :  { %5374 = vmatpush1.bf16.msra.mxu0 %v8339_v45  ;;  %5160 = vmatprep.subr.bf16.mxu1 %v8344_v46  ;;  %v9097_v45 = vld [vmem:[#allocation11] sm:$0xff]  ;;  %v8405_v46 = vld [vmem:[#allocation9 + $0xeb8] ss:$36 sps:$4 sm:$0xff]  }
 0x2f0   :  { %5375 = vmatprep.subr.bf16.mxu0 %v8347_v47  ;;  %v8410_v47 = vld [vmem:[#allocation9 + $0xefc] ss:$36 sps:$4 sm:$0xff]  }
 0x2f2   :  { %5161 = vmatpush1.bf16.msra.mxu1 %v8342_v48  ;;  %v8413_v48 = vld [vmem:[#allocation9 + $0xf04] ss:$36 sps:$4 sm:$0xff]  }
 0x2f3   :  { %5376 = vmatpush1.bf16.msra.mxu0 %v8345_v49  ;;  %5162 = vmatprep.subr.bf16.mxu1 %v8350_v51  ;;  %v1270_v49 = vrot.slane %v9097_v45, %v146_v30  ;;  %v1278_v51 = vrot.slane %v9097_v45, %v154_v33 }
 0x2f4   :  { %5377 = vmatprep.subr.bf16.mxu0 %v8353_v52  ;;  %v1274_v52 = vrot.slane %v9097_v45, %v150_v31 }
 0x2f6   :  { %5163 = vmatpush1.bf16.msra.mxu1 %v8348_v53  ;;  %v1282_v53 = vrot.slane %v9097_v45, %v158_v35 }
 0x2f7   :  { %5378 = vmatpush1.bf16.msra.mxu0 %v8351_v54  ;;  %5164 = vmatprep.subr.bf16.mxu1 %v8356_v56  ;;  %v8408_v54 = vld [vmem:[#allocation9 + $0xef8] ss:$36 sps:$4 sm:$0xff]   ;;  %v8411_v56 = vld [vmem:[#allocation9 + $0xf00] ss:$36 sps:$4 sm:$0xff]  }
 0x2f8   :  { %5379 = vmatprep.subr.bf16.mxu0 %v8359_v57  ;;  %v8416_v57 = vld [vmem:[#allocation9 + $0xf44] ss:$36 sps:$4 sm:$0xff]  }
 0x2fa   :  { %5165 = vmatpush1.bf16.msra.mxu1 %v8354_v58 }
 0x2fb   :  { %5380 = vmatpush1.bf16.msra.mxu0 %v8357_v59  ;;  %5166 = vmatprep.subr.bf16.mxu1 %v8362_v60  ;;  %v8419_v59 = vld [vmem:[#allocation9 + $0xf4c] ss:$36 sps:$4 sm:$0xff]  }
 0x2fc   :  { %5381 = vmatprep.subr.bf16.mxu0 %v8365_v62 }
 0x2fe   :  { %5167 = vmatpush1.bf16.msra.mxu1 %v8360_v63 }
 0x2ff   :  { %5382 = vmatpush1.bf16.msra.mxu0 %v8363_v1  ;;  %5168 = vmatprep.subr.bf16.mxu1 %v8368_v3 }
 0x300   :  { %5383 = vmatprep.subr.bf16.mxu0 %v8371_v4 }
 0x302   :  { %5169 = vmatpush1.bf16.msra.mxu1 %v8366_v6  ;;  %v8414_v6 = vld [vmem:[#allocation9 + $0xf40] ss:$36 sps:$4 sm:$0xff]  }
 0x303   :  { %5384 = vmatpush1.bf16.msra.mxu0 %v8369_v7  ;;  %5170 = vmatprep.subr.bf16.mxu1 %v8374_v8 }
 0x304   :  { %5385 = vmatprep.subr.bf16.mxu0 %v8377_v9 }
 0x306   :  { %5171 = vmatpush1.bf16.msra.mxu1 %v8372_v10  ;;  %v8417_v10 = vld [vmem:[#allocation9 + $0xf48] ss:$36 sps:$4 sm:$0xff]  }
 0x307   :  { %5386 = vmatpush1.bf16.msra.mxu0 %v8375_v11  ;;  %5183 = vmatprep.subr.bf16.mxu1 %v8380_v13  ;;  %v8422_v11 = vld [vmem:[#allocation9 + $0xf8c] ss:$36 sps:$4 sm:$0xff]  }
 0x308   :  { %5398 = vmatprep.subr.bf16.mxu0 %v8383_v29 }
 0x309   :  { %5173 = vmatmul.mubr.bf16.vlgmr.msra.gmra.mrb[12].mxu1 %v9051_v32 }
 0x30a   :  { %5388 = vmatmul.mubr.bf16.vlgmr.msra.gmra.mrb[16].mxu0 %v9051_v32  ;;  %5184 = vmatpush1.bf16.msra.mxu1 %v8378_v15  ;;  %v8425_v15 = vld [vmem:[#allocation9 + $0xf94] ss:$36 sps:$4 sm:$0xff]  }
 0x30b   :  { %5215 = vmatprep.mubr.bf16.mxu1 %v9065_v16  ;;  %5399 = vmatpush1.bf16.msra.mxu0 %v8381_v17 }
 0x30c   :  { %5430 = vmatprep.mubr.bf16.mxu0 %v9065_v16  ;;  %5185 = vmatprep.subr.bf16.mxu1 %v8386_v18 }
 0x30d   :  { %5400 = vmatprep.subr.bf16.mxu0 %v8389_v19 }
 0x30e   :  { %5186 = vmatpush1.bf16.msra.mxu1 %v8384_v22 }
 0x30f   :  { %5401 = vmatpush1.bf16.msra.mxu0 %v8387_v23  ;;  %5187 = vmatprep.subr.bf16.mxu1 %v8392_v24 }
 0x310   :  { %5402 = vmatprep.subr.bf16.mxu0 %v8395_v25 }
 0x312   :  { %5188 = vmatpush1.bf16.msra.mxu1 %v8390_v26 }
 0x313   :  { %5403 = vmatpush1.bf16.msra.mxu0 %v8393_v27  ;;  %5189 = vmatprep.subr.bf16.mxu1 %v8398_v34  ;;  %v8420_v27 = vld [vmem:[#allocation9 + $0xf88] ss:$36 sps:$4 sm:$0xff]  }
 0x314   :  { %5404 = vmatprep.subr.bf16.mxu0 %v8401_v36 }
 0x316   :  { %5190 = vmatpush1.bf16.msra.mxu1 %v8396_v38  ;;  %v8423_v38 = vld [vmem:[#allocation9 + $0xf90] ss:$36 sps:$4 sm:$0xff]  }
 0x317   :  { %5405 = vmatpush1.bf16.msra.mxu0 %v8399_v39  ;;  %5191 = vmatprep.subr.bf16.mxu1 %v8404_v41  ;;  %v8428_v39 = vld [vmem:[#allocation9 + $0xfd4] ss:$36 sps:$4 sm:$0xff]  }
 0x318   :  { %5406 = vmatprep.subr.bf16.mxu0 %v8407_v42 }
 0x31a   :  { %5192 = vmatpush1.bf16.msra.mxu1 %v8402_v43  ;;  %v8431_v43 = vld [vmem:[#allocation9 + $0xfdc] ss:$36 sps:$4 sm:$0xff]  }
 0x31b   :  { %5407 = vmatpush1.bf16.msra.mxu0 %v8405_v46  ;;  %5193 = vmatprep.subr.bf16.mxu1 %v8410_v47  ;;  %v8426_v46 = vld [vmem:[#allocation9 + $0xfd0] ss:$36 sps:$4 sm:$0xff]   ;;  %v8429_v47 = vld [vmem:[#allocation9 + $0xfd8] ss:$36 sps:$4 sm:$0xff]  }
 0x31c   :  { %v4830_v58 = vpop.f32.mrb[8].mxu1  ;;  %v5045_v30 = vpop.f32.mrb[12].mxu0  ;;  %5408 = vmatprep.subr.bf16.mxu0 %v8413_v48  ;;  %v8434_v48 = vld [vmem:[#allocation9 + $0x101c] ss:$36 sps:$4 sm:$0xff]  }
 0x31d   :  { %v7535_v60 = vadd.f32 %v4830_v58, %v1270_v49  ;;  %v7539_v33 = vadd.f32 %v5045_v30, %v1278_v51  ;;  %v4832_v62 = vpop.f32.mrb[9].mxu1  ;;  %v5047_v63 = vpop.f32.mrb[13].mxu0  ;;  %v8446_v58 = vld [vmem:[#allocation9 + $0x10ac] ss:$36 sps:$4 sm:$0xff]   ;;  %v8449_v30 = vld [vmem:[#allocation9 + $0x10b4] ss:$36 sps:$4 sm:$0xff]  }
 0x31e   :  { %v7536_v1 = vadd.f32 %v4832_v62, %v1274_v52  ;;  %v7540_v3 = vadd.f32 %v5047_v63, %v1282_v53  ;;  %v4834_v31 = vpop.f32.mrb[10].mxu1  ;;  %v5049_v4 = vpop.f32.mrb[14].mxu0  ;;  %5194 = vmatpush1.bf16.msra.mxu1 %v8408_v54  ;;  %v8443_v54 = vld [vmem:[#allocation9 + $0x106c] ss:$36 sps:$4 sm:$0xff]   ;;  %v8455_v62 = vld [vmem:[#allocation9 + $0x10fc] ss:$36 sps:$4 sm:$0xff]  }
 0x31f   :  { %v7537_v35 = vadd.f32 %v4834_v31, %v1270_v49  ;;  %v7541_v7 = vadd.f32 %v5049_v4, %v1278_v51  ;;  %5409 = vmatpush1.bf16.msra.mxu0 %v8411_v56  ;;  %v4836_v8 = vpop.f32.mrb[11].mxu1  ;;  %v5051_v9 = vpop.f32.mrb[15].mxu0  ;;  %5195 = vmatprep.subr.bf16.mxu1 %v8416_v57  ;;  %v5689_v17 = vmax.f32 %v7535_v60, 0.0  ;;  %v5691_v18 = vmax.f32 %v7539_v33, 0.0  ;;  %v8437_v49 = vld [vmem:[#allocation9 + $0x1024] ss:$36 sps:$4 sm:$0xff]  }
 0x320   :  { %v7538_v13 = vadd.f32 %v4836_v8, %v1274_v52  ;;  %v7542_v29 = vadd.f32 %v5051_v9, %v1282_v53  ;;  %5410 = vmatprep.subr.bf16.mxu0 %v8419_v59  ;;  %v5690_v23 = vmax.f32 %v7536_v1, 0.0  ;;  %v5692_v24 = vmax.f32 %v7540_v3, 0.0  ;;  %v8432_v51 = vld [vmem:[#allocation9 + $0x1018] ss:$36 sps:$4 sm:$0xff]   ;;  %v8435_v52 = vld [vmem:[#allocation9 + $0x1020] ss:$36 sps:$4 sm:$0xff]  }
 0x321   :  { %v5698_v19 = vmax.f32 %v7537_v35, 0.0  ;;  %v5700_v22 = vmax.f32 %v7541_v7, 0.0  ;;  %v8440_v53 = vld [vmem:[#allocation9 + $0x1064] ss:$36 sps:$4 sm:$0xff]   ;;  %v8447_v60 = vld [vmem:[#allocation9 + $0x10b0] ss:$36 sps:$4 sm:$0xff]  }
 0x322   :  { %v5699_v25 = vmax.f32 %v7538_v13, 0.0  ;;  %v5701_v26 = vmax.f32 %v7542_v29, 0.0  ;;  %5196 = vmatpush1.bf16.msra.mxu1 %v8414_v6  ;;  %v8438_v56 = vld [vmem:[#allocation9 + $0x1060] ss:$36 sps:$4 sm:$0xff]   ;;  %v8441_v57 = vld [vmem:[#allocation9 + $0x1068] ss:$36 sps:$4 sm:$0xff]  }
 0x323   :  { %v9111_v34 = vpack.c.bf16 %v5698_v19, %v5689_v17  ;;  %v9113_v36 = vpack.c.bf16 %v5700_v22, %v5691_v18  ;;  %5411 = vmatpush1.bf16.msra.mxu0 %v8417_v10  ;;  %5197 = vmatprep.subr.bf16.mxu1 %v8422_v11  ;;  %v8444_v59 = vld [vmem:[#allocation9 + $0x10a8] ss:$36 sps:$4 sm:$0xff]   ;;  %v8452_v33 = vld [vmem:[#allocation9 + $0x10f4] ss:$36 sps:$4 sm:$0xff]   ;;  %v8458_v3 = vld [vmem:[#allocation9 + $0x113c] ss:$36 sps:$4 sm:$0xff]  }
 0x324   :  { %v9115_v41 = vpack.c.bf16 %v5699_v25, %v5690_v23  ;;  %v9117_v42 = vpack.c.bf16 %v5701_v26, %v5692_v24  ;;  %5412 = vmatprep.subr.bf16.mxu0 %v8425_v15  ;;  %v8450_v63 = vld [vmem:[#allocation9 + $0x10f0] ss:$36 sps:$4 sm:$0xff]   ;;  %v8453_v1 = vld [vmem:[#allocation9 + $0x10f8] ss:$36 sps:$4 sm:$0xff]   ;;  %v8461_v31 = vld [vmem:[#allocation9 + $0x1144] ss:$36 sps:$4 sm:$0xff]  }
 0x325   :  { %v8456_v4 = vld [vmem:[#allocation9 + $0x1138] ss:$36 sps:$4 sm:$0xff]   ;;  %v8459_v6 = vld [vmem:[#allocation9 + $0x1140] ss:$36 sps:$4 sm:$0xff]   ;;  %v8467_v7 = vld [vmem:[#allocation9 + $0x118c] ss:$36 sps:$4 sm:$0xff]  }
 0x326   :  { %5198 = vmatpush1.bf16.msra.mxu1 %v8420_v27  ;;  %v8464_v35 = vld [vmem:[#allocation9 + $0x1184] ss:$36 sps:$4 sm:$0xff]   ;;  %v8470_v10 = vld [vmem:[#allocation9 + $0x11cc] ss:$36 sps:$4 sm:$0xff]   ;;  %v8473_v11 = vld [vmem:[#allocation9 + $0x11d4] ss:$36 sps:$4 sm:$0xff]  }
 0x327   :  { %5413 = vmatpush1.bf16.msra.mxu0 %v8423_v38  ;;  %5199 = vmatprep.subr.bf16.mxu1 %v8428_v39  ;;  %v8462_v8 = vld [vmem:[#allocation9 + $0x1180] ss:$36 sps:$4 sm:$0xff]   ;;  %v8465_v9 = vld [vmem:[#allocation9 + $0x1188] ss:$36 sps:$4 sm:$0xff]   ;;  %v8471_v29 = vld [vmem:[#allocation9 + $0x11d0] ss:$36 sps:$4 sm:$0xff]  }
 0x328   :  { %5414 = vmatprep.subr.bf16.mxu0 %v8431_v43  ;;  %v8468_v13 = vld [vmem:[#allocation9 + $0x11c8] ss:$36 sps:$4 sm:$0xff]   ;;  %v8476_v15 = vld [vmem:[#allocation9 + $0x1214] ss:$36 sps:$4 sm:$0xff]   ;;  %v8479_v17 = vld [vmem:[#allocation9 + $0x121c] ss:$36 sps:$4 sm:$0xff]  }
 0x329   :  { %v8474_v18 = vld [vmem:[#allocation9 + $0x1210] ss:$36 sps:$4 sm:$0xff]   ;;  %v8477_v19 = vld [vmem:[#allocation9 + $0x1218] ss:$36 sps:$4 sm:$0xff]   ;;  %v8485_v23 = vld [vmem:[#allocation9 + $0x1264] ss:$36 sps:$4 sm:$0xff]  }
 0x32a   :  { %5200 = vmatpush1.bf16.msra.mxu1 %v8426_v46  ;;  %v8482_v22 = vld [vmem:[#allocation9 + $0x125c] ss:$36 sps:$4 sm:$0xff]   ;;  %v8488_v26 = vld [vmem:[#allocation9 + $0x12a4] ss:$36 sps:$4 sm:$0xff]   ;;  %v8491_v27 = vld [vmem:[#allocation9 + $0x12ac] ss:$36 sps:$4 sm:$0xff]  }
 0x32b   :  { %5415 = vmatpush1.bf16.msra.mxu0 %v8429_v47  ;;  %5201 = vmatprep.subr.bf16.mxu1 %v8434_v48  ;;  %v8480_v24 = vld [vmem:[#allocation9 + $0x1258] ss:$36 sps:$4 sm:$0xff]   ;;  %v8483_v25 = vld [vmem:[#allocation9 + $0x1260] ss:$36 sps:$4 sm:$0xff]   ;;  %v8489_v39 = vld [vmem:[#allocation9 + $0x12a8] ss:$36 sps:$4 sm:$0xff]  }
 0x32c   :  { %5416 = vmatprep.subr.bf16.mxu0 %v8437_v49  ;;  %v8486_v38 = vld [vmem:[#allocation9 + $0x12a0] ss:$36 sps:$4 sm:$0xff]   ;;  %v8494_v43 = vld [vmem:[#allocation9 + $0x12ec] ss:$36 sps:$4 sm:$0xff]   ;;  %v8497_v46 = vld [vmem:[#allocation9 + $0x12f4] ss:$36 sps:$4 sm:$0xff]  }
 0x32d   :  { %v8492_v47 = vld [vmem:[#allocation9 + $0x12e8] ss:$36 sps:$4 sm:$0xff]   ;;  %v8495_v48 = vld [vmem:[#allocation9 + $0x12f0] ss:$36 sps:$4 sm:$0xff]  }
 0x32e   :  { %5202 = vmatpush1.bf16.msra.mxu1 %v8432_v51  ;;  %v8500_v49 = vld [vmem:[#allocation9 + $0x1334] ss:$36 sps:$4 sm:$0xff]   ;;  %v8503_v51 = vld [vmem:[#allocation9 + $0x133c] ss:$36 sps:$4 sm:$0xff]  }
 0x32f   :  { %5417 = vmatpush1.bf16.msra.mxu0 %v8435_v52  ;;  %5203 = vmatprep.subr.bf16.mxu1 %v8440_v53  ;;  %v8498_v52 = vld [vmem:[#allocation9 + $0x1330] ss:$36 sps:$4 sm:$0xff]   ;;  %v8506_v53 = vld [vmem:[#allocation9 + $0x137c] ss:$36 sps:$4 sm:$0xff]  }
 0x330   :  { %5418 = vmatprep.subr.bf16.mxu0 %v8443_v54  ;;  %v8509_v54 = vld [vmem:[#allocation9 + $0x1384] ss:$36 sps:$4 sm:$0xff]  }
 0x332   :  { %5204 = vmatpush1.bf16.msra.mxu1 %v8438_v56  ;;  %v8504_v56 = vld [vmem:[#allocation9 + $0x1378] ss:$36 sps:$4 sm:$0xff]  }
 0x333   :  { %5419 = vmatpush1.bf16.msra.mxu0 %v8441_v57  ;;  %5205 = vmatprep.subr.bf16.mxu1 %v8446_v58  ;;  %v8507_v57 = vld [vmem:[#allocation9 + $0x1380] ss:$36 sps:$4 sm:$0xff]  }
 0x334   :  { %5420 = vmatprep.subr.bf16.mxu0 %v8449_v30  ;;  %v8512_v58 = vld [vmem:[#allocation9 + $0x13c4] ss:$36 sps:$4 sm:$0xff]   ;;  %v8515_v30 = vld [vmem:[#allocation9 + $0x13cc] ss:$36 sps:$4 sm:$0xff]  }
 0x336   :  { %5206 = vmatpush1.bf16.msra.mxu1 %v8444_v59  ;;  %v8510_v59 = vld [vmem:[#allocation9 + $0x13c0] ss:$36 sps:$4 sm:$0xff]  }
 0x337   :  { %5421 = vmatpush1.bf16.msra.mxu0 %v8447_v60  ;;  %5207 = vmatprep.subr.bf16.mxu1 %v8452_v33  ;;  %v8513_v60 = vld [vmem:[#allocation9 + $0x13c8] ss:$36 sps:$4 sm:$0xff]  }
 0x338   :  { %5422 = vmatprep.subr.bf16.mxu0 %v8455_v62  ;;  %v8518_v33 = vld [vmem:[#allocation9 + $0x140c] ss:$36 sps:$4 sm:$0xff]   ;;  %v8521_v62 = vld [vmem:[#allocation9 + $0x1414] ss:$36 sps:$4 sm:$0xff]  }
 0x33a   :  { %5208 = vmatpush1.bf16.msra.mxu1 %v8450_v63  ;;  %v8516_v63 = vld [vmem:[#allocation9 + $0x1408] ss:$36 sps:$4 sm:$0xff]  }
 0x33b   :  { %5423 = vmatpush1.bf16.msra.mxu0 %v8453_v1  ;;  %5209 = vmatprep.subr.bf16.mxu1 %v8458_v3  ;;  %v8519_v1 = vld [vmem:[#allocation9 + $0x1410] ss:$36 sps:$4 sm:$0xff]   ;;  %v8522_v3 = vld [vmem:[#allocation9 + $0x260] ss:$36 sps:$4 sm:$0xff]  }
 0x33c   :  { %5424 = vmatprep.subr.bf16.mxu0 %v8461_v31  ;;  %v8523_v31 = vld [vmem:[#allocation9 + $0x6e0] ss:$36 sps:$4 sm:$0xff]  }
 0x33e   :  { %5210 = vmatpush1.bf16.msra.mxu1 %v8456_v4  ;;  %v8524_v4 = vld [vmem:[#allocation9 + $0x20] ss:$36 sps:$4 sm:$0xff]  }
 0x33f   :  { %5425 = vmatpush1.bf16.msra.mxu0 %v8459_v6  ;;  %5211 = vmatprep.subr.bf16.mxu1 %v8464_v35  ;;  %v8525_v6 = vld [vmem:[#allocation9 + $0x4a0] ss:$36 sps:$4 sm:$0xff]   ;;  %v8526_v35 = vld [vmem:[#allocation9 + $0x2a8] ss:$36 sps:$4 sm:$0xff]  }
 0x340   :  { %5426 = vmatprep.subr.bf16.mxu0 %v8467_v7  ;;  %v8527_v7 = vld [vmem:[#allocation9 + $0x728] ss:$36 sps:$4 sm:$0xff]  }
 0x342   :  { %5212 = vmatpush1.bf16.msra.mxu1 %v8462_v8  ;;  %v8528_v8 = vld [vmem:[#allocation9 + $0x68] ss:$36 sps:$4 sm:$0xff]  }
 0x343   :  { %5427 = vmatpush1.bf16.msra.mxu0 %v8465_v9  ;;  %5213 = vmatprep.subr.bf16.mxu1 %v8470_v10  ;;  %v8529_v9 = vld [vmem:[#allocation9 + $0x4e8] ss:$36 sps:$4 sm:$0xff]   ;;  %v8530_v10 = vld [vmem:[#allocation9 + $0x2f0] ss:$36 sps:$4 sm:$0xff]  }
 0x344   :  { %5428 = vmatprep.subr.bf16.mxu0 %v8473_v11  ;;  %v8531_v11 = vld [vmem:[#allocation9 + $0x770] ss:$36 sps:$4 sm:$0xff]  }
 0x346   :  { %5214 = vmatpush1.bf16.msra.mxu1 %v8468_v13  ;;  %v8532_v13 = vld [vmem:[#allocation9 + $0xb0] ss:$36 sps:$4 sm:$0xff]  }
 0x347   :  { %5429 = vmatpush1.bf16.msra.mxu0 %v8471_v29  ;;  %5226 = vmatprep.subr.bf16.mxu1 %v8476_v15  ;;  %v8533_v29 = vld [vmem:[#allocation9 + $0x530] ss:$36 sps:$4 sm:$0xff]   ;;  %v8534_v15 = vld [vmem:[#allocation9 + $0x338] ss:$36 sps:$4 sm:$0xff]  }
 0x348   :  { %5441 = vmatprep.subr.bf16.mxu0 %v8479_v17  ;;  %v8535_v17 = vld [vmem:[#allocation9 + $0x7b8] ss:$36 sps:$4 sm:$0xff]  }
 0x349   :  { %5216 = vmatmul.mubr.bf16.vlgmr.msra.gmra.mrb[12].mxu1 %v9063_v12 }
 0x34a   :  { %5431 = vmatmul.mubr.bf16.vlgmr.msra.gmra.mrb[16].mxu0 %v9063_v12  ;;  %5227 = vmatpush1.bf16.msra.mxu1 %v8474_v18  ;;  %v8536_v18 = vld [vmem:[#allocation9 + $0xf8] ss:$36 sps:$4 sm:$0xff]  }
 0x34b   :  { %5442 = vmatpush1.bf16.msra.mxu0 %v8477_v19  ;;  %5228 = vmatprep.subr.bf16.mxu1 %v8482_v22  ;;  %v8538_v19 = vld [vmem:[#allocation9 + $0x380] ss:$36 sps:$4 sm:$0xff]  }
 0x34c   :  { %5443 = vmatprep.subr.bf16.mxu0 %v8485_v23  ;;  %5258 = vmatprep.mubr.bf16.mxu1 %v8865_v0  ;;  %v8539_v22 = vld [vmem:[#allocation9 + $0x800] ss:$36 sps:$4 sm:$0xff]  }
 0x34d   :  { %5473 = vmatprep.mubr.bf16.mxu0 %v8865_v0  ;;  %v8501_v0 = vld [vmem:[#allocation9 + $0x1338] ss:$36 sps:$4 sm:$0xff]   ;;  %v8541_v23 = vld [vmem:[#allocation9 + $0x5c0] ss:$36 sps:$4 sm:$0xff]  }
 0x34e   :  { %5229 = vmatpush1.bf16.msra.mxu1 %v8480_v24  ;;  %v8542_v24 = vld [vmem:[#allocation9 + $0x3c8] ss:$36 sps:$4 sm:$0xff]  }
 0x34f   :  { %5444 = vmatpush1.bf16.msra.mxu0 %v8483_v25  ;;  %5230 = vmatprep.subr.bf16.mxu1 %v8488_v26  ;;  %v8543_v25 = vld [vmem:[#allocation9 + $0x848] ss:$36 sps:$4 sm:$0xff]  }
 0x350   :  { %5445 = vmatprep.subr.bf16.mxu0 %v8491_v27  ;;  %v8544_v26 = vld [vmem:[#allocation9 + $0x188] ss:$36 sps:$4 sm:$0xff]  }
 0x351   :  { %v8545_v27 = vld [vmem:[#allocation9 + $0x608] ss:$36 sps:$4 sm:$0xff]  }
 0x352   :  { %5231 = vmatpush1.bf16.msra.mxu1 %v8486_v38  ;;  %v8546_v38 = vld [vmem:[#allocation9 + $0x410] ss:$36 sps:$4 sm:$0xff]  }
 0x353   :  { %5446 = vmatpush1.bf16.msra.mxu0 %v8489_v39  ;;  %5232 = vmatprep.subr.bf16.mxu1 %v8494_v43  ;;  %v8547_v39 = vld [vmem:[#allocation9 + $0x890] ss:$36 sps:$4 sm:$0xff]  }
 0x354   :  { %5447 = vmatprep.subr.bf16.mxu0 %v8497_v46  ;;  %v8548_v43 = vld [vmem:[#allocation9 + $0x1d0] ss:$36 sps:$4 sm:$0xff]  }
 0x355   :  { %v8549_v46 = vld [vmem:[#allocation9 + $0x650] ss:$36 sps:$4 sm:$0xff]  }
 0x356   :  { %5233 = vmatpush1.bf16.msra.mxu1 %v8492_v47  ;;  %v8550_v47 = vld [vmem:[#allocation9 + $0x458] ss:$36 sps:$4 sm:$0xff]  }
 0x357   :  { %5448 = vmatpush1.bf16.msra.mxu0 %v8495_v48  ;;  %5234 = vmatprep.subr.bf16.mxu1 %v8500_v49  ;;  %v8551_v48 = vld [vmem:[#allocation9 + $0x8d8] ss:$36 sps:$4 sm:$0xff]  }
 0x358   :  { %5449 = vmatprep.subr.bf16.mxu0 %v8503_v51  ;;  %v8552_v49 = vld [vmem:[#allocation9 + $0x218] ss:$36 sps:$4 sm:$0xff]  }
 0x359   :  { %v8553_v51 = vld [vmem:[#allocation9 + $0x698] ss:$36 sps:$4 sm:$0xff]  }
 0x35a   :  { %5235 = vmatpush1.bf16.msra.mxu1 %v8498_v52  ;;  %v8554_v52 = vld [vmem:[#allocation9 + $0xb60] ss:$36 sps:$4 sm:$0xff]  }
 0x35b   :  { %5450 = vmatpush1.bf16.msra.mxu0 %v8501_v0  ;;  %5236 = vmatprep.subr.bf16.mxu1 %v8506_v53  ;;  %v8555_v0 = vld [vmem:[#allocation9 + $0xfe0] ss:$36 sps:$4 sm:$0xff]  }
 0x35c   :  { %5451 = vmatprep.subr.bf16.mxu0 %v8509_v54  ;;  %v8556_v53 = vld [vmem:[#allocation9 + $0x920] ss:$36 sps:$4 sm:$0xff]  }
 0x35d   :  { %v8557_v54 = vld [vmem:[#allocation9 + $0xda0] ss:$36 sps:$4 sm:$0xff]  }
 0x35e   :  { %5237 = vmatpush1.bf16.msra.mxu1 %v8504_v56  ;;  %v8558_v56 = vld [vmem:[#allocation9 + $0xba8] ss:$36 sps:$4 sm:$0xff]  }
 0x35f   :  { %5452 = vmatpush1.bf16.msra.mxu0 %v8507_v57  ;;  %5238 = vmatprep.subr.bf16.mxu1 %v8512_v58  ;;  %v8559_v57 = vld [vmem:[#allocation9 + $0x1028] ss:$36 sps:$4 sm:$0xff]  }
 0x360   :  { %5453 = vmatprep.subr.bf16.mxu0 %v8515_v30  ;;  %v8560_v58 = vld [vmem:[#allocation9 + $0x968] ss:$36 sps:$4 sm:$0xff]  }
 0x361   :  { %v8561_v30 = vld [vmem:[#allocation9 + $0xde8] ss:$36 sps:$4 sm:$0xff]  }
 0x362   :  { %5239 = vmatpush1.bf16.msra.mxu1 %v8510_v59  ;;  %v8562_v59 = vld [vmem:[#allocation9 + $0xbf0] ss:$36 sps:$4 sm:$0xff]  }
 0x363   :  { %5454 = vmatpush1.bf16.msra.mxu0 %v8513_v60  ;;  %5240 = vmatprep.subr.bf16.mxu1 %v8518_v33  ;;  %v8563_v60 = vld [vmem:[#allocation9 + $0x1070] ss:$36 sps:$4 sm:$0xff]  }
 0x364   :  { %5455 = vmatprep.subr.bf16.mxu0 %v8521_v62  ;;  %v8564_v33 = vld [vmem:[#allocation9 + $0x9b0] ss:$36 sps:$4 sm:$0xff]   ;;  %v8566_v62 = vld [vmem:[#allocation9 + $0xc38] ss:$36 sps:$4 sm:$0xff]  }
 0x366   :  { %5241 = vmatpush1.bf16.msra.mxu1 %v8516_v63  ;;  %v8568_v63 = vld [vmem:[#allocation9 + $0x9f8] ss:$36 sps:$4 sm:$0xff]  }
 0x367   :  { %5456 = vmatpush1.bf16.msra.mxu0 %v8519_v1  ;;  %7293 = vmatprep.subr.bf16.mxu1 %v8522_v3  ;;  %v8570_v1 = vld [vmem:[#allocation9 + $0xc80] ss:$36 sps:$4 sm:$0xff]  }
 0x368   :  { %7315 = vmatprep.subr.bf16.mxu0 %v8523_v31  ;;  %v8571_v3 = vld [vmem:[#allocation9 + $0x1100] ss:$36 sps:$4 sm:$0xff]  }
 0x369   :  { %5259 = vmatmul.mubr.bf16.vlgmr.msra.gmra.mrb[12].mxu1 %v9067_v5  ;;  %v8573_v31 = vld [vmem:[#allocation9 + $0xec0] ss:$36 sps:$4 sm:$0xff]  }
 0x36a   :  { %5474 = vmatmul.mubr.bf16.vlgmr.msra.gmra.mrb[16].mxu0 %v9067_v5  ;;  %7294 = vmatpush3.bf16.msra.mxu1 %v8524_v4  ;;  %v8574_v4 = vld [vmem:[#allocation9 + $0xcc8] ss:$36 sps:$4 sm:$0xff]  }
 0x36b   :  { %5516 = vmatprep.mubr.bf16.mxu1 %v9039_v2  ;;  %7316 = vmatpush3.bf16.msra.mxu0 %v8525_v6  ;;  %v8537_v2 = vld [vmem:[#allocation9 + $0x578] ss:$36 sps:$4 sm:$0xff]   ;;  %v8575_v6 = vld [vmem:[#allocation9 + $0x1148] ss:$36 sps:$4 sm:$0xff]  }
 0x36c   :  { %5557 = vmatprep.mubr.bf16.mxu0 %v9047_v20  ;;  %7295 = vmatprep.subr.bf16.mxu1 %v8526_v35  ;;  %v8540_v20 = vld [vmem:[#allocation9 + $0x140] ss:$36 sps:$4 sm:$0xff]   ;;  %v8576_v35 = vld [vmem:[#allocation9 + $0xa88] ss:$36 sps:$4 sm:$0xff]  }
 0x36d   :  { %7317 = vmatprep.subr.bf16.mxu0 %v8527_v7  ;;  %v8577_v7 = vld [vmem:[#allocation9 + $0xf08] ss:$36 sps:$4 sm:$0xff]  }
 0x36e   :  { %7296 = vmatpush3.bf16.msra.mxu1 %v8528_v8  ;;  %v8578_v8 = vld [vmem:[#allocation9 + $0xd10] ss:$36 sps:$4 sm:$0xff]  }
 0x36f   :  { %7318 = vmatpush3.bf16.msra.mxu0 %v8529_v9  ;;  %7297 = vmatprep.subr.bf16.mxu1 %v8530_v10  ;;  %v8579_v9 = vld [vmem:[#allocation9 + $0x1190] ss:$36 sps:$4 sm:$0xff]  }
 0x370   :  { %7319 = vmatprep.subr.bf16.mxu0 %v8531_v11  ;;  %v8580_v10 = vld [vmem:[#allocation9 + $0xad0] ss:$36 sps:$4 sm:$0xff]  }
 0x371   :  { %v8581_v11 = vld [vmem:[#allocation9 + $0xf50] ss:$36 sps:$4 sm:$0xff]  }
 0x372   :  { %7298 = vmatpush3.bf16.msra.mxu1 %v8532_v13  ;;  %v8582_v13 = vld [vmem:[#allocation9 + $0xd58] ss:$36 sps:$4 sm:$0xff]  }
 0x373   :  { %7320 = vmatpush3.bf16.msra.mxu0 %v8533_v29  ;;  %7299 = vmatprep.subr.bf16.mxu1 %v8534_v15  ;;  %v8583_v29 = vld [vmem:[#allocation9 + $0x11d8] ss:$36 sps:$4 sm:$0xff]  }
 0x374   :  { %7321 = vmatprep.subr.bf16.mxu0 %v8535_v17  ;;  %v8584_v15 = vld [vmem:[#allocation9 + $0xb18] ss:$36 sps:$4 sm:$0xff]  }
 0x375   :  { %v8585_v17 = vld [vmem:[#allocation9 + $0xf98] ss:$36 sps:$4 sm:$0xff]  }
 0x376   :  { %7300 = vmatpush3.bf16.msra.mxu1 %v8536_v18  ;;  %v8586_v18 = vld [vmem:[#allocation12 + $0x40] sm:$0xff]  }
 0x377   :  { %7322 = vmatpush3.bf16.msra.mxu0 %v8537_v2  ;;  %7301 = vmatprep.subr.bf16.mxu1 %v8538_v19  ;;  %v8587_v2 = vld [vmem:[#allocation9 + $0x1220] ss:$36 sps:$4 sm:$0xff]   ;;  %v8588_v19 = vld [vmem:[#allocation12] sm:$0xff]  }
 0x378   :  { %7323 = vmatprep.subr.bf16.mxu0 %v8539_v22  ;;  %v8589_v22 = vld [vmem:[#allocation12 + $0x48] sm:$0xff]  }
 0x37a   :  { %7302 = vmatpush3.bf16.msra.mxu1 %v8540_v20  ;;  %v8590_v20 = vld [vmem:[#allocation9 + $0x1268] ss:$36 sps:$4 sm:$0xff]  }
 0x37b   :  { %7324 = vmatpush3.bf16.msra.mxu0 %v8541_v23  ;;  %7303 = vmatprep.subr.bf16.mxu1 %v8542_v24  ;;  %v8591_v23 = vld [vmem:[#allocation12 + $0x8] sm:$0xff]   ;;  %v8592_v24 = vld [vmem:[#allocation12 + $0x50] sm:$0xff]  }
 0x37c   :  { %7325 = vmatprep.subr.bf16.mxu0 %v8543_v25  ;;  %v8593_v25 = vld [vmem:[#allocation9 + $0x12b0] ss:$36 sps:$4 sm:$0xff]  }
 0x37e   :  { %7304 = vmatpush3.bf16.msra.mxu1 %v8544_v26  ;;  %v8596_v26 = vld [vmem:[#allocation9 + $0x12f8] ss:$36 sps:$4 sm:$0xff]  }
 0x37f   :  { %7326 = vmatpush3.bf16.msra.mxu0 %v8545_v27  ;;  %7305 = vmatprep.subr.bf16.mxu1 %v8546_v38  ;;  %v8598_v27 = vld [vmem:[#allocation12 + $0x60] sm:$0xff]   ;;  %v8599_v38 = vld [vmem:[#allocation9 + $0x1340] ss:$36 sps:$4 sm:$0xff]  }
 0x380   :  { %7327 = vmatprep.subr.bf16.mxu0 %v8547_v39  ;;  %v8600_v39 = vld [vmem:[#allocation12 + $0x20] sm:$0xff]  }
 0x382   :  { %7306 = vmatpush3.bf16.msra.mxu1 %v8548_v43  ;;  %v8601_v43 = vld [vmem:[#allocation12 + $0x68] sm:$0xff]  }
 0x383   :  { %7328 = vmatpush3.bf16.msra.mxu0 %v8549_v46  ;;  %7307 = vmatprep.subr.bf16.mxu1 %v8550_v47  ;;  %v8602_v46 = vld [vmem:[#allocation9 + $0x1388] ss:$36 sps:$4 sm:$0xff]   ;;  %v8603_v47 = vld [vmem:[#allocation12 + $0x28] sm:$0xff]  }
 0x384   :  { %7329 = vmatprep.subr.bf16.mxu0 %v8551_v48  ;;  %v8604_v48 = vld [vmem:[#allocation12 + $0x70] sm:$0xff]  }
 0x386   :  { %7308 = vmatpush3.bf16.msra.mxu1 %v8552_v49  ;;  %v8605_v49 = vld [vmem:[#allocation9 + $0x13d0] ss:$36 sps:$4 sm:$0xff]  }
 0x387   :  { %7330 = vmatpush3.bf16.msra.mxu0 %v8553_v51  ;;  %7337 = vmatprep.subr.bf16.mxu1 %v8554_v52  ;;  %v8606_v51 = vld [vmem:[#allocation12 + $0x30] sm:$0xff]   ;;  %v8607_v52 = vld [vmem:[#allocation12 + $0x78] sm:$0xff]  }
 0x388   :  { %7359 = vmatprep.subr.bf16.mxu0 %v8555_v0  ;;  %v8608_v0 = vld [vmem:[#allocation9 + $0x1418] ss:$36 sps:$4 sm:$0xff]  }
 0x389   :  { %5517 = vmatmul.mubr.bf16.vlgmr.msra.gmra.mrb[16].mxu1 %v9037_v61  ;;  %v8565_v61 = vld [vmem:[#allocation9 + $0xe30] ss:$36 sps:$4 sm:$0xff]  }
 0x38a   :  { %5558 = vmatmul.mubr.bf16.vlgmr.msra.gmra.mrb[20].mxu0 %v9045_v14  ;;  %7338 = vmatpush3.bf16.msra.mxu1 %v8556_v53  ;;  %v8567_v14 = vld [vmem:[#allocation9 + $0x10b8] ss:$36 sps:$4 sm:$0xff]   ;;  %v8609_v53 = vld [vmem:[#allocation12 + $0x38] sm:$0xff]  }
 0x38b   :  { %5598 = vmatprep.mubr.bf16.mxu1 %v9053_v37  ;;  %7360 = vmatpush3.bf16.msra.mxu0 %v8557_v54  ;;  %v8569_v37 = vld [vmem:[#allocation9 + $0xe78] ss:$36 sps:$4 sm:$0xff]   ;;  %v8610_v54 = vld [vmem:[#allocation12 + $0xc0] sm:$0xff]  }
 0x38c   :  { %5639 = vmatprep.mubr.bf16.mxu0 %v9065_v16  ;;  %7339 = vmatprep.subr.bf16.mxu1 %v8558_v56  ;;  %v8572_v16 = vld [vmem:[#allocation9 + $0xa40] ss:$36 sps:$4 sm:$0xff]   ;;  %v8626_v56 = vld [vmem:[#allocation12 + $0x140] sm:$0xff]  }
 0x38d   :  { %7361 = vmatprep.subr.bf16.mxu0 %v8559_v57  ;;  %v8611_v57 = vld [vmem:[#allocation12 + $0x80] sm:$0xff]  }
 0x38e   :  { %7340 = vmatpush3.bf16.msra.mxu1 %v8560_v58  ;;  %v8612_v58 = vld [vmem:[#allocation12 + $0xc8] sm:$0xff]  }
 0x38f   :  { %7362 = vmatpush3.bf16.msra.mxu0 %v8561_v30  ;;  %7341 = vmatprep.subr.bf16.mxu1 %v8562_v59  ;;  %v8628_v30 = vld [vmem:[#allocation12 + $0x100] sm:$0xff]   ;;  %v8630_v59 = vld [vmem:[#allocation12 + $0x148] sm:$0xff]  }
 0x390   :  { %7363 = vmatprep.subr.bf16.mxu0 %v8563_v60  ;;  %v8613_v60 = vld [vmem:[#allocation12 + $0x88] sm:$0xff]  }
 0x392   :  { %7342 = vmatpush3.bf16.msra.mxu1 %v8564_v33  ;;  %v8614_v33 = vld [vmem:[#allocation12 + $0xd0] sm:$0xff]  }
 0x393   :  { %7364 = vmatpush3.bf16.msra.mxu0 %v8565_v61  ;;  %7343 = vmatprep.subr.bf16.mxu1 %v8566_v62  ;;  %v8632_v61 = vld [vmem:[#allocation12 + $0x108] sm:$0xff]   ;;  %v8634_v62 = vld [vmem:[#allocation12 + $0x150] sm:$0xff]  }
 0x394   :  { %7365 = vmatprep.subr.bf16.mxu0 %v8567_v14  ;;  %v8615_v14 = vld [vmem:[#allocation12 + $0x90] sm:$0xff]  }
 0x396   :  { %7344 = vmatpush3.bf16.msra.mxu1 %v8568_v63  ;;  %v8616_v63 = vld [vmem:[#allocation12 + $0xd8] sm:$0xff]  }
 0x397   :  { %7366 = vmatpush3.bf16.msra.mxu0 %v8569_v37  ;;  %7345 = vmatprep.subr.bf16.mxu1 %v8570_v1  ;;  %v8636_v37 = vld [vmem:[#allocation12 + $0x110] sm:$0xff]   ;;  %v8618_v1 = vld [vmem:[#allocation12 + $0xe0] sm:$0xff]  }
 0x398   :  { %7367 = vmatprep.subr.bf16.mxu0 %v8571_v3  ;;  %v8642_v3 = vld [vmem:[#allocation12 + $0x160] sm:$0xff]  }
 0x39a   :  { %7346 = vmatpush3.bf16.msra.mxu1 %v8572_v16  ;;  %v8619_v16 = vld [vmem:[#allocation12 + $0xa0] sm:$0xff]  }
 0x39b   :  { %7368 = vmatpush3.bf16.msra.mxu0 %v8573_v31  ;;  %7347 = vmatprep.subr.bf16.mxu1 %v8574_v4  ;;  %v8620_v31 = vld [vmem:[#allocation12 + $0xe8] sm:$0xff]   ;;  %v8644_v4 = vld [vmem:[#allocation12 + $0x120] sm:$0xff]  }
 0x39c   :  { %7369 = vmatprep.subr.bf16.mxu0 %v8575_v6  ;;  %v8646_v6 = vld [vmem:[#allocation12 + $0x168] sm:$0xff]  }
 0x39e   :  { %7348 = vmatpush3.bf16.msra.mxu1 %v8576_v35  ;;  %v8621_v35 = vld [vmem:[#allocation12 + $0xa8] sm:$0xff]  }
 0x39f   :  { %7370 = vmatpush3.bf16.msra.mxu0 %v8577_v7  ;;  %7349 = vmatprep.subr.bf16.mxu1 %v8578_v8  ;;  %v8622_v7 = vld [vmem:[#allocation12 + $0xf0] sm:$0xff]   ;;  %v8648_v8 = vld [vmem:[#allocation12 + $0x128] sm:$0xff]  }
 0x3a0   :  { %7371 = vmatprep.subr.bf16.mxu0 %v8579_v9  ;;  %v8650_v9 = vld [vmem:[#allocation12 + $0x170] sm:$0xff]  }
 0x3a2   :  { %7350 = vmatpush3.bf16.msra.mxu1 %v8580_v10  ;;  %v8623_v10 = vld [vmem:[#allocation12 + $0xb0] sm:$0xff]  }
 0x3a3   :  { %7372 = vmatpush3.bf16.msra.mxu0 %v8581_v11  ;;  %7351 = vmatprep.subr.bf16.mxu1 %v8582_v13  ;;  %v8624_v11 = vld [vmem:[#allocation12 + $0xf8] sm:$0xff]   ;;  %v8652_v13 = vld [vmem:[#allocation12 + $0x130] sm:$0xff]  }
 0x3a4   :  { %7373 = vmatprep.subr.bf16.mxu0 %v8583_v29  ;;  %v8654_v29 = vld [vmem:[#allocation12 + $0x178] sm:$0xff]  }
 0x3a6   :  { %7352 = vmatpush3.bf16.msra.mxu1 %v8584_v15  ;;  %v8625_v15 = vld [vmem:[#allocation12 + $0xb8] sm:$0xff]  }
 0x3a7   :  { %7374 = vmatpush3.bf16.msra.mxu0 %v8585_v17  ;;  %7495 = vmatprep.subr.bf16.mxu1 %v8866_v21  ;;  %v8627_v17 = vld [vmem:[#allocation12 + $0x1c0] sm:$0xff]  }
 0x3a8   :  { %7390 = vmatprep.subr.bf16.mxu0 %v8586_v18  ;;  %v8656_v18 = vld [vmem:[#allocation12 + $0x138] sm:$0xff]  }
 0x3a9   :  { %5599 = vmatmul.mubr.bf16.vlgmr.msra.gmra.mrb[20].mxu1 %v9051_v32  ;;  %v8594_v32 = vld [vmem:[#allocation12 + $0x10] sm:$0xff]  }
 0x3aa   :  { %5640 = vmatmul.mubr.bf16.vlgmr.msra.gmra.mrb[24].mxu0 %v9063_v12  ;;  %7496 = vmatpush3.bf16.msra.mxu1 %v8587_v2  ;;  %v8595_v12 = vld [vmem:[#allocation12 + $0x58] sm:$0xff]   ;;  %v8629_v2 = vld [vmem:[#allocation12 + $0x180] sm:$0xff]  }
 0x3ab   :  { %7391 = vmatpush3.bf16.msra.mxu0 %v8588_v19  ;;  %6349 = vmatprep.mubr.bf16.mxu0 %v9115_v41  ;;  %v8597_v41 = vld [vmem:[#allocation12 + $0x18] sm:$0xff]   ;;  %v8631_v19 = vld [vmem:[#allocation12 + $0x1c8] sm:$0xff]  }
 0x3ac   :  { %7497 = vmatprep.subr.bf16.mxu1 %v8866_v21  ;;  %7392 = vmatprep.subr.bf16.mxu0 %v8589_v22  ;;  %v8633_v22 = vld [vmem:[#allocation12 + $0x188] sm:$0xff]  }
 0x3ad   :  { %7511 = vmatprep.mubr.msk.bf16.mxu1 %vm8867_vm1, %v8866_v21 }
 0x3ae   :  { %7498 = vmatpush3.bf16.msra.mxu1 %v8590_v20  ;;  %v8635_v20 = vld [vmem:[#allocation12 + $0x1d0] sm:$0xff]  }
 0x3af   :  { %7393 = vmatpush3.bf16.msra.mxu0 %v8591_v23  ;;  %7499 = vmatprep.subr.bf16.mxu1 %v8866_v21  ;;  %v8637_v23 = vld [vmem:[#allocation12 + $0x190] sm:$0xff]  }
 0x3b0   :  { %7394 = vmatprep.subr.bf16.mxu0 %v8592_v24  ;;  %v8639_v24 = vld [vmem:[#allocation12 + $0x1d8] sm:$0xff]  }
 0x3b2   :  { %7500 = vmatpush3.bf16.msra.mxu1 %v8593_v25  ;;  %v8641_v25 = vld [vmem:[#allocation12 + $0x198] sm:$0xff]  }
 0x3b3   :  { %7395 = vmatpush3.bf16.msra.mxu0 %v8594_v32  ;;  %7501 = vmatprep.subr.bf16.mxu1 %v8866_v21  ;;  %v8643_v32 = vld [vmem:[#allocation12 + $0x1e0] sm:$0xff]  }
 0x3b4   :  { %7396 = vmatprep.subr.bf16.mxu0 %v8595_v12  ;;  %v8645_v12 = vld [vmem:[#allocation12 + $0x1a0] sm:$0xff]  }
 0x3b6   :  { %7502 = vmatpush3.bf16.msra.mxu1 %v8596_v26  ;;  %v8647_v26 = vld [vmem:[#allocation12 + $0x1e8] sm:$0xff]  }
 0x3b7   :  { %7397 = vmatpush3.bf16.msra.mxu0 %v8597_v41  ;;  %7503 = vmatprep.subr.bf16.mxu1 %v8866_v21  ;;  %v8651_v41 = vld [vmem:[#allocation12 + $0x1f0] sm:$0xff]  }
 0x3b8   :  { %7398 = vmatprep.subr.bf16.mxu0 %v8598_v27  ;;  %v8653_v27 = vld [vmem:[#allocation12 + $0x1b0] sm:$0xff]  }
 0x3ba   :  { %7504 = vmatpush3.bf16.msra.mxu1 %v8599_v38  ;;  %v8655_v38 = vld [vmem:[#allocation12 + $0x1f8] sm:$0xff]  }
 0x3bb   :  { %7399 = vmatpush3.bf16.msra.mxu0 %v8600_v39  ;;  %7505 = vmatprep.subr.bf16.mxu1 %v8866_v21  ;;  %v8657_v39 = vld [vmem:[#allocation12 + $0x1b8] sm:$0xff]  }
 0x3bc   :  { %7400 = vmatprep.subr.bf16.mxu0 %v8601_v43  ;;  %v1286_v43 = vrot.slane %v9097_v45, %v162_v40 }
 0x3be   :  { %7506 = vmatpush3.bf16.msra.mxu1 %v8602_v46  ;;  %v1294_v46 = vrot.slane %v9097_v45, %v170_v50 }
 0x3bf   :  { %7401 = vmatpush3.bf16.msra.mxu0 %v8603_v47  ;;  %7507 = vmatprep.subr.bf16.mxu1 %v8866_v21  ;;  %v1290_v47 = vrot.slane %v9097_v45, %v166_v44 }
 0x3c0   :  { %7402 = vmatprep.subr.bf16.mxu0 %v8604_v48  ;;  %v1298_v48 = vrot.slane %v9097_v45, %v174_v55 }
 0x3c2   :  { %7508 = vmatpush3.bf16.msra.mxu1 %v8605_v49 }
 0x3c3   :  { %7403 = vmatpush3.bf16.msra.mxu0 %v8606_v51  ;;  %7509 = vmatprep.subr.bf16.mxu1 %v8866_v21 }
 0x3c4   :  { %7404 = vmatprep.subr.bf16.mxu0 %v8607_v52 }
 0x3c6   :  { %7510 = vmatpush3.bf16.msra.mxu1 %v8608_v0 }
 0x3c7   :  { %7405 = vmatpush3.bf16.msra.mxu0 %v8609_v53  ;;  %7412 = vmatprep.subr.bf16.mxu1 %v8610_v54 }
 0x3c8   :  { %7434 = vmatprep.subr.bf16.mxu0 %v8626_v56 }
 0x3c9   :  { %7512 = vmatmul.mubr.bf16.vlgmr.msra.gmra.mrb[24].mxu1 %v9067_v5  ;;  %v8638_v5 = vld [vmem:[#allocation12 + $0x158] sm:$0xff]  }
 0x3ca   :  { %6350 = vmatmul.mubr.bf16.vlgmr.msra.gmra.mrb[28].mxu0 %v9111_v34  ;;  %7413 = vmatpush3.bf16.msra.mxu1 %v8611_v57  ;;  %v8617_v34 = vld [vmem:[#allocation12 + $0x98] sm:$0xff]  }
 0x3cb   :  { %6390 = vmatprep.mubr.bf16.mxu1 %v9117_v42  ;;  %7414 = vmatprep.subr.bf16.mxu1 %v8612_v58  ;;  %v8640_v42 = vld [vmem:[#allocation12 + $0x118] sm:$0xff]  }
 0x3cc   :  { %7435 = vmatpush3.bf16.msra.mxu0 %v8628_v30 }
 0x3cd   :  { %7436 = vmatprep.subr.bf16.mxu0 %v8630_v59 }
 0x3ce   :  { %7415 = vmatpush3.bf16.msra.mxu1 %v8613_v60 }
 0x3cf   :  { %7416 = vmatprep.subr.bf16.mxu1 %v8614_v33 }
 0x3d0   :  { %7437 = vmatpush3.bf16.msra.mxu0 %v8632_v61 }
 0x3d1   :  { %7438 = vmatprep.subr.bf16.mxu0 %v8634_v62 }
 0x3d2   :  { %7417 = vmatpush3.bf16.msra.mxu1 %v8615_v14 }
 0x3d3   :  { %7418 = vmatprep.subr.bf16.mxu1 %v8616_v63 }
 0x3d4   :  { %7439 = vmatpush3.bf16.msra.mxu0 %v8636_v37 }
 0x3d5   :  { %7440 = vmatprep.subr.bf16.mxu0 %v8638_v5 }
 0x3d6   :  { %7419 = vmatpush3.bf16.msra.mxu1 %v8617_v34 }
 0x3d7   :  { %7420 = vmatprep.subr.bf16.mxu1 %v8618_v1 }
 0x3d8   :  { %7441 = vmatpush3.bf16.msra.mxu0 %v8640_v42  ;;  %v8658_v42 = vld [vmem:[#allocation12 + $0x200] sm:$0xff]  }
 0x3d9   :  { %7442 = vmatprep.subr.bf16.mxu0 %v8642_v3 }
 0x3da   :  { %7421 = vmatpush3.bf16.msra.mxu1 %v8619_v16  ;;  %v8659_v16 = vld [vmem:[#allocation12 + $0x208] sm:$0xff]  }
 0x3db   :  { %7422 = vmatprep.subr.bf16.mxu1 %v8620_v31  ;;  %v8660_v31 = vld [vmem:[#allocation12 + $0x210] sm:$0xff]  }
 0x3dc   :  { %7443 = vmatpush3.bf16.msra.mxu0 %v8644_v4  ;;  %v8661_v4 = vld [vmem:[#allocation12 + $0x218] sm:$0xff]  }
 0x3dd   :  { %7444 = vmatprep.subr.bf16.mxu0 %v8646_v6  ;;  %v8662_v6 = vld [vmem:[#allocation12 + $0x220] sm:$0xff]  }
 0x3de   :  { %7423 = vmatpush3.bf16.msra.mxu1 %v8621_v35  ;;  %v8663_v35 = vld [vmem:[#allocation12 + $0x228] sm:$0xff]  }
 0x3df   :  { %7424 = vmatprep.subr.bf16.mxu1 %v8622_v7 }
 0x3e0   :  { %7445 = vmatpush3.bf16.msra.mxu0 %v8648_v8  ;;  %v8664_v8 = vld [vmem:[#allocation12 + $0x230] sm:$0xff]  }
 0x3e1   :  { %7446 = vmatprep.subr.bf16.mxu0 %v8650_v9 }
 0x3e2   :  { %7425 = vmatpush3.bf16.msra.mxu1 %v8623_v10  ;;  %v6568_v10 = vld [vmem:[#allocation11 + $0x8] ss:$0 sm:$0xff] }
 0x3e3   :  { %7426 = vmatprep.subr.bf16.mxu1 %v8624_v11 }
 0x3e4   :  { %7447 = vmatpush3.bf16.msra.mxu0 %v8652_v13 }
 0x3e5   :  { %7448 = vmatprep.subr.bf16.mxu0 %v8654_v29 }
 0x3e6   :  { %7427 = vmatpush3.bf16.msra.mxu1 %v8625_v15 }
 0x3e7   :  { %7456 = vmatprep.subr.bf16.mxu1 %v8627_v17 }
 0x3e8   :  { %7449 = vmatpush3.bf16.msra.mxu0 %v8656_v18 }
 0x3e9   :  { %6391 = vmatmul.mubr.bf16.vlgmr.msra.gmra.mrb[28].mxu1 %v9113_v36  ;;  %7515 = vmatprep.subr.bf16.mxu0 %v8866_v21  ;;  %v8649_v36 = vld [vmem:[#allocation12 + $0x1a8] sm:$0xff]  }
 0x3ea   :  { %7457 = vmatpush3.bf16.msra.mxu1 %v8629_v2 }
 0x3eb   :  { %7458 = vmatprep.subr.bf16.mxu1 %v8631_v19 }
 0x3ee   :  { %7459 = vmatpush3.bf16.msra.mxu1 %v8633_v22 }
 0x3ef   :  { %7460 = vmatprep.subr.bf16.mxu1 %v8635_v20 }
 0x3f2   :  { %7461 = vmatpush3.bf16.msra.mxu1 %v8637_v23  ;;  %v8665_v23 = vld [vmem:[#allocation12 + $0x238] sm:$0xff]  }
 0x3f3   :  { %7462 = vmatprep.subr.bf16.mxu1 %v8639_v24 }
 0x3f6   :  { %7463 = vmatpush3.bf16.msra.mxu1 %v8641_v25 }
 0x3f7   :  { %7464 = vmatprep.subr.bf16.mxu1 %v8643_v32 }
 0x3fa   :  { %7465 = vmatpush3.bf16.msra.mxu1 %v8645_v12 }
 0x3fb   :  { %7466 = vmatprep.subr.bf16.mxu1 %v8647_v26 }
 0x3fe   :  { %7467 = vmatpush3.bf16.msra.mxu1 %v8649_v36 }
 0x3ff   :  { %7468 = vmatprep.subr.bf16.mxu1 %v8651_v41 }
 0x402   :  { %7469 = vmatpush3.bf16.msra.mxu1 %v8653_v27 }
 0x403   :  { %7470 = vmatprep.subr.bf16.mxu1 %v8655_v38 }
 0x406   :  { %7471 = vmatpush3.bf16.msra.mxu1 %v8657_v39 }
 0x43c   :  { %v5260_v49 = vpop.f32.mrb[12].mxu1 }
 0x43d   :  { %v7543_v51 = vadd.f32 %v5260_v49, %v1286_v43  ;;  %v5475_v52 = vpop.f32.mrb[16].mxu0  ;;  %v5262_v0 = vpop.f32.mrb[13].mxu1 }
 0x43e   :  { %v7547_v53 = vadd.f32 %v5475_v52, %v1294_v46  ;;  %v7544_v54 = vadd.f32 %v5262_v0, %v1290_v47  ;;  %v5477_v56 = vpop.f32.mrb[17].mxu0  ;;  %v5264_v40 = vpop.f32.mrb[14].mxu1 }
 0x43f   :  { %v7548_v57 = vadd.f32 %v5477_v56, %v1298_v48  ;;  %v7545_v58 = vadd.f32 %v5264_v40, %v1286_v43  ;;  %v5479_v30 = vpop.f32.mrb[18].mxu0  ;;  %v5266_v50 = vpop.f32.mrb[15].mxu1  ;;  %v5693_v44 = vmax.f32 %v7543_v51, 0.0 }
 0x440   :  { %v7549_v59 = vadd.f32 %v5479_v30, %v1294_v46  ;;  %v7546_v60 = vadd.f32 %v5266_v50, %v1290_v47  ;;  %v5481_v33 = vpop.f32.mrb[19].mxu0  ;;  %v5695_v62 = vmax.f32 %v7547_v53, 0.0  ;;  %v5694_v55 = vmax.f32 %v7544_v54, 0.0 }
 0x441   :  { %v5702_v61 = vmax.f32 %v7545_v58, 0.0  ;;  %v7550_v28 = vadd.f32 %v5481_v33, %v1298_v48  ;;  %v5696_v63 = vmax.f32 %v7548_v57, 0.0 }
 0x442   :  { %v5704_v45 = vmax.f32 %v7549_v59, 0.0  ;;  %v5703_v14 = vmax.f32 %v7546_v60, 0.0 }
 0x443   :  { %v5711_v37 = vpack.c.bf16 %v5702_v61, %v5693_v44  ;;  %v5705_v5 = vmax.f32 %v7550_v28, 0.0 }
 0x444   :  { %v5713_v34 = vpack.c.bf16 %v5704_v45, %v5695_v62  ;;  %v5712_v1 = vpack.c.bf16 %v5703_v14, %v5694_v55  ;;  %v7217_v45 = vld [vmem:[#allocation14] ss:$0 sm:$0xff] }
 0x445   :  { %v5714_v3 = vpack.c.bf16 %v5705_v5, %v5696_v63 }
 0x446   :  { %6431 = vmatprep.mubr.bf16.mxu0 %v5712_v1 }
 0x447   :  { %6472 = vmatprep.mubr.bf16.mxu1 %v5714_v3  ;;  %6432 = vmatmul.mubr.bf16.vlgmr.msra.gmra.mrb[32].mxu0 %v5711_v37 }
 0x448   :  { %6473 = vmatmul.mubr.bf16.vlgmr.msra.gmra.mrb[32].mxu1 %v5713_v34  ;;  %7516 = vmatpush3.bf16.msra.mxu0 %v8658_v42 }
 0x449   :  { %7517 = vmatprep.subr.bf16.mxu0 %v8866_v21  ;;  %7531 = vmatprep.mubr.msk.bf16.mxu0 %vm8867_vm1, %v8866_v21 }
 0x44c   :  { %7518 = vmatpush3.bf16.msra.mxu0 %v8659_v16 }
 0x44d   :  { %7519 = vmatprep.subr.bf16.mxu0 %v8866_v21 }
 0x450   :  { %7520 = vmatpush3.bf16.msra.mxu0 %v8660_v31 }
 0x451   :  { %7521 = vmatprep.subr.bf16.mxu0 %v8866_v21 }
 0x454   :  { %7522 = vmatpush3.bf16.msra.mxu0 %v8661_v4 }
 0x455   :  { %7523 = vmatprep.subr.bf16.mxu0 %v8866_v21 }
 0x458   :  { %7524 = vmatpush3.bf16.msra.mxu0 %v8662_v6 }
 0x459   :  { %7525 = vmatprep.subr.bf16.mxu0 %v8866_v21 }
 0x45c   :  { %v7309_v7 = vpop.f32.mrb[16].mxu1  ;;  %7526 = vmatpush3.bf16.msra.mxu0 %v8663_v35 }
 0x45d   :  { %v7331_v9 = vpop.f32.mrb[20].mxu0  ;;  %v7310_v11 = vpop.f32.mrb[17].mxu1  ;;  %7527 = vmatprep.subr.bf16.mxu0 %v8866_v21 }
 0x45e   :  { %v7311_v13 = vadd.f32 %v7310_v11, %v7309_v7  ;;  %v7332_v29 = vpop.f32.mrb[21].mxu0  ;;  %v7312_v15 = vpop.f32.mrb[18].mxu1 }
 0x45f   :  { %v7333_v17 = vadd.f32 %v7332_v29, %v7331_v9  ;;  %v7334_v18 = vpop.f32.mrb[22].mxu0  ;;  %v7313_v2 = vpop.f32.mrb[19].mxu1 }
 0x460   :  { %v5519_v19 = vadd.f32 %v7311_v13, %v6568_v10  ;;  %v7314_v22 = vadd.f32 %v7313_v2, %v7312_v15  ;;  %v7335_v20 = vpop.f32.mrb[23].mxu0  ;;  %7528 = vmatpush3.bf16.msra.mxu0 %v8664_v8 }
 0x461   :  { %v7336_v24 = vadd.f32 %v7335_v20, %v7334_v18  ;;  %7529 = vmatprep.subr.bf16.mxu0 %v8866_v21 }
 0x462   :  { %v5560_v25 = vadd.f32 %v7333_v17, %v5519_v19  ;;  %v5522_v32 = vadd.f32 %v7314_v22, %v6568_v10 }
 0x464   :  { %v5563_v12 = vadd.f32 %v7336_v24, %v5522_v32  ;;  %7530 = vmatpush3.bf16.msra.mxu0 %v8665_v23 }
 0x47c   :  { %v7353_v26 = vpop.f32.mrb[20].mxu1 }
 0x47d   :  { %v7375_v36 = vpop.f32.mrb[24].mxu0  ;;  %v7354_v41 = vpop.f32.mrb[21].mxu1 }
 0x47e   :  { %v7355_v27 = vadd.f32 %v7354_v41, %v7353_v26  ;;  %v7376_v38 = vpop.f32.mrb[25].mxu0  ;;  %v7356_v39 = vpop.f32.mrb[22].mxu1 }
 0x47f   :  { %v7377_v43 = vadd.f32 %v7376_v38, %v7375_v36  ;;  %v7378_v46 = vpop.f32.mrb[26].mxu0  ;;  %v7357_v47 = vpop.f32.mrb[23].mxu1 }
 0x480   :  { %v5601_v48 = vadd.f32 %v7355_v27, %v5560_v25  ;;  %v7358_v49 = vadd.f32 %v7357_v47, %v7356_v39  ;;  %v7379_v51 = vpop.f32.mrb[27].mxu0 }
 0x481   :  { %v7380_v52 = vadd.f32 %v7379_v51, %v7378_v46 }
 0x482   :  { %v5604_v0 = vadd.f32 %v7358_v49, %v5563_v12  ;;  %v5642_v53 = vadd.f32 %v7377_v43, %v5601_v48 }
 0x484   :  { %v5645_v21 = vadd.f32 %v7380_v52, %v5604_v0 }
 0x49c   :  { %v5682_v54 = vpop.f32.mrb[24].mxu1 }
 0x49d   :  { %v5683_v56 = vadd.f32 %v5682_v54, %v5642_v53  ;;  %v7406_v40 = vpop.f32.mrb[28].mxu0  ;;  %v7513_v57 = vpop.f32.mrb[25].mxu1 }
 0x49e   :  { %v7407_v58 = vpop.f32.mrb[29].mxu0  ;;  %v5685_v30 = vpop.f32.mrb[26].mxu1 }
 0x49f   :  { %v7408_v50 = vadd.f32 %v7407_v58, %v7406_v40  ;;  %v5686_v59 = vadd.f32 %v5685_v30, %v5645_v21  ;;  %v7409_v60 = vpop.f32.mrb[30].mxu0  ;;  %v7514_v33 = vpop.f32.mrb[27].mxu1  ;;  %v5697_v61 = vmax.f32 %v5683_v56, 0.0 }
 0x4a0   :  { %v7410_v44 = vpop.f32.mrb[31].mxu0 }
 0x4a1   :  { %v5706_v28 = vmax.f32 %v5686_v59, 0.0  ;;  %v7411_v62 = vadd.f32 %v7410_v44, %v7409_v60  ;;  %v6352_v37 = vadd.f32 %v7408_v50, %v7217_v45 }
 0x4a3   :  { %v5715_v55 = vpack.c.bf16 %v5706_v28, %v5697_v61  ;;  %v6355_v42 = vadd.f32 %v7411_v62, %v7217_v45 }
 0x4a5   :  { %7532 = vmatmul.mubr.bf16.vlgmr.msra.gmra.mrb[36].mxu0 %v5715_v55 }
 0x4bc   :  { %v7428_v14 = vpop.f32.mrb[28].mxu1 }
 0x4bd   :  { %v7429_v63 = vpop.f32.mrb[29].mxu1 }
 0x4be   :  { %v7430_v5 = vadd.f32 %v7429_v63, %v7428_v14  ;;  %v7431_v34 = vpop.f32.mrb[30].mxu1 }
 0x4bf   :  { %v7432_v1 = vpop.f32.mrb[31].mxu1 }
 0x4c0   :  { %v6393_v3 = vadd.f32 %v7430_v5, %v6352_v37  ;;  %v7433_v16 = vadd.f32 %v7432_v1, %v7431_v34 }
 0x4c2   :  { %v6396_v31 = vadd.f32 %v7433_v16, %v6355_v42 }
 0x51a   :  { %v7450_v4 = vpop.f32.mrb[32].mxu0 }
 0x51b   :  { %v7472_v6 = vpop.f32.mrb[32].mxu1  ;;  %v7451_v35 = vpop.f32.mrb[33].mxu0 }
 0x51c   :  { %v7452_v7 = vadd.f32 %v7451_v35, %v7450_v4  ;;  %v7473_v8 = vpop.f32.mrb[33].mxu1  ;;  %v7453_v9 = vpop.f32.mrb[34].mxu0 }
 0x51d   :  { %v7474_v10 = vadd.f32 %v7473_v8, %v7472_v6  ;;  %v7475_v11 = vpop.f32.mrb[34].mxu1  ;;  %v7454_v13 = vpop.f32.mrb[35].mxu0 }
 0x51e   :  { %v6434_v29 = vadd.f32 %v7452_v7, %v6393_v3  ;;  %v7455_v15 = vadd.f32 %v7454_v13, %v7453_v9  ;;  %v7476_v17 = vpop.f32.mrb[35].mxu1 }
 0x51f   :  { %v7477_v18 = vadd.f32 %v7476_v17, %v7475_v11 }
 0x520   :  { %v6437_v2 = vadd.f32 %v7455_v15, %v6396_v31  ;;  %v6475_v19 = vadd.f32 %v7474_v10, %v6434_v29 }
 0x522   :  { %v6478_v22 = vadd.f32 %v7477_v18, %v6437_v2 }
 0x578   :  { %v6515_v20 = vpop.f32.mrb[36].mxu0 }
 0x579   :  { %v6516_v23 = vadd.f32 %v6515_v20, %v6475_v19  ;;  %v7533_v24 = vpop.f32.mrb[37].mxu0 }
 0x57a   :  { %v6518_v25 = vpop.f32.mrb[38].mxu0 }
 0x57b   :  { %6522 = vst [vmem:[#allocation15] sm:$0xff] %v6516_v23  ;;  %v6519_v32 = vadd.f32 %v6518_v25, %v6478_v22  ;;  %v7534_v12 = vpop.f32.mrb[39].mxu0 }
 0x57d   :  { %6523 = vst [vmem:[#allocation15 + $0x8] sm:$0xff] %v6519_v32 }
 0x57e   :  { %8831 = shalt.err (!%p8828_p4)
}
 0x57f   :  { %s8832_s20 = scalar_lea.hbm %s9192_s7, 256 }
 0x580   :  { %p8833_p5 = scmp.ne.s32.totalorder %s9192_s7, %s8832_s20  ;;  %p8836_p6 = scmp.lt.u32.totalorder %s8832_s20, %s9192_s7 }
 0x582   :  { %p8838_p7 = pnand %p8836_p6, %p8833_p5 }
 0x584   :  { %8841 = shalt.err (!%p8838_p7)
}
 0x585   :  { %6535 = dma.vmem_to_hbm [thread:$0]  %s6530_s15, 256, %s9192_s7, [#allocation5], %s8860_s5, %s8860_s5, %s8861_s18  }
 0x586   :  { %8850 = dma.done.wait [#allocation5], 256  }
 0x587   :  { %8851 = vsyncadd [#allocation5], 4294967040 }
 0x588   :  { %6539 = vsyncpa [#allocation4], 1 }
 0x589   :  { %6540 = vsyncpa [#allocation7], 1 }
 0x58a   :  { %6541 = vsyncpa [#allocation10], 1 }
 0x58b   :  { %6542 = vsyncpa [#allocation13], 1 }
 0x58c   :  { %6543 = vsyncpa [#allocation5], 1 }

</bundles_post_ra>
